<compile_context>
chip_gen: v7x
topology: tpu7x:2x2x1
jax: 0.10.0
libtpu: 0.0.40
codegen_flags: <defaults>
</compile_context>

<pallas_src>
import numpy as np
import jax
import jax.numpy as jnp
from jax import lax
from jax.experimental import pallas as pl
from jax.experimental.pallas import tpu as pltpu

EPS = 1e-5


# ---------------------------------------------------------------------------
# Host-side geometry for a ConvTranspose2d(k, stride=2, padding=1) consuming a
# 1-pixel zero-padded flattened grid (row-major (n, y, x)).
# PyTorch semantics: out[oh, ow] += x[ih, iw] * w[kh, kw] when
#   oh = 2*ih - 1 + kh,  ow = 2*iw - 1 + kw.
# Parity class (eh, ew) = (oh % 2, ow % 2); within a class each tap is a
# contiguous slice (offset r*Wp + c) of the flat padded input.
# ---------------------------------------------------------------------------
def _convt_plan(N, H, W, k, pad_out):
    Hp, Wp = H + 2, W + 2
    Mp = N * Hp * Wp
    OH = 2 * (H - 1) - 2 + k
    OW = 2 * (W - 1) - 2 + k
    OHp, OWp = OH + 2 * pad_out, OW + 2 * pad_out
    Mp_out = N * OHp * OWp
    classes = []
    for eh in (0, 1):
        for ew in (0, 1):
            khs = [kh for kh in range(k) if (eh + 1 - kh) % 2 == 0]
            kws = [kw for kw in range(k) if (ew + 1 - kw) % 2 == 0]
            OHc = len(range(eh, OH, 2))
            OWc = len(range(ew, OW, 2))
            taps = []
            for kh in khs:
                r = (eh + 1 - kh) // 2 + 1          # padded row offset (>= 0)
                for kw in kws:
                    c = (ew + 1 - kw) // 2 + 1      # padded col offset (>= 0)
                    taps.append((kh, kw, r * Wp + c))
            L = ((N - 1) * Hp + (OHc - 1)) * Wp + (OWc - 1) + 1
            classes.append(dict(eh=eh, ew=ew, taps=taps, OHc=OHc, OWc=OWc, L=L))
    return dict(N=N, H=H, W=W, k=k, Hp=Hp, Wp=Wp, Mp=Mp, OH=OH, OW=OW,
                OHp=OHp, OWp=OWp, Mp_out=Mp_out, pad_out=pad_out,
                classes=classes)


def _class_mask_and_scatter(plan, cls, L):
    """Valid-anchor mask (1, L) and 0/1 scatter matrix (L, Mp_out)."""
    N, Hp, Wp = plan['N'], plan['Hp'], plan['Wp']
    OHp, OWp, po = plan['OHp'], plan['OWp'], plan['pad_out']
    OHc, OWc = cls['OHc'], cls['OWc']
    q = np.arange(L)
    n = q // (Hp * Wp)
    a = (q // Wp) % Hp
    b = q % Wp
    valid = (a < OHc) & (b < OWc) & (n < N)
    mask = valid.astype(np.float32).reshape(1, L)
    P = np.zeros((L, plan['Mp_out']), np.float32)
    m2 = (n * OHp + (2 * a + cls['eh'] + po)) * OWp + (2 * b + cls['ew'] + po)
    P[q[valid], m2[valid]] = 1.0
    return mask, P


def _layer_consts(plan, wt, with_scatter=True):
    """Class-merged (block-diagonal) ConvT constants.

    Returns:
      offs : per-tap flat input offsets, class-major order.
      Lp   : common lane width (max per-class anchor count).
      Wblk : (4*Cout, Cin*ntaps_total) block-diagonal weight.
      Mfull: (4*Cout, Lp) valid-anchor mask, or None.
      Pall : (4*Lp, Mp_out) stacked 0/1 scatter into next padded grid, or None.
    """
    Cin, Cout = wt.shape[0], wt.shape[1]
    Lp = max(c['L'] for c in plan['classes'])
    ktot = Cin * sum(len(c['taps']) for c in plan['classes'])
    Wblk = np.zeros((4 * Cout, ktot), np.float32)
    Mfull = np.zeros((4 * Cout, Lp), np.float32) if with_scatter else None
    Pall = np.zeros((4 * Lp, plan['Mp_out']), np.float32) if with_scatter else None
    offs = []
    col = 0
    for ci, cls in enumerate(plan['classes']):
        for (kh, kw, off) in cls['taps']:
            assert off + Lp <= plan['Mp'], (off, Lp, plan['Mp'])
            offs.append(off)
            Wblk[ci * Cout:(ci + 1) * Cout, col:col + Cin] = wt[:, :, kh, kw].T
            col += Cin
        if with_scatter:
            mask, P = _class_mask_and_scatter(plan, cls, Lp)
            Mfull[ci * Cout:(ci + 1) * Cout, :] = mask
            Pall[ci * Lp:(ci + 1) * Lp, :] = P
    return offs, Lp, Wblk, Mfull, Pall


# ---------------------------------------------------------------------------
# Build the fused generator: precompute all constants once, return a jitted
# forward(x, consts, fidx) using a single pallas_call.
# ---------------------------------------------------------------------------
def build_generator(params, N):
    (w1, g1, b1), (w2, g2, b2), (w3, g3, b3), (w4,) = params
    w1 = np.asarray(w1, np.float32); w2 = np.asarray(w2, np.float32)
    w3 = np.asarray(w3, np.float32); w4 = np.asarray(w4, np.float32)
    g1 = np.asarray(g1, np.float32); b1 = np.asarray(b1, np.float32)
    g2 = np.asarray(g2, np.float32); b2 = np.asarray(b2, np.float32)
    g3 = np.asarray(g3, np.float32); b3 = np.asarray(b3, np.float32)

    nz, C1 = w1.shape[0], w1.shape[1]
    C2, C3, nc = w2.shape[1], w3.shape[1], w4.shape[1]

    plan2 = _convt_plan(N, 4, 4, 3, pad_out=1)     # 4x4  -> 7x7
    plan3 = _convt_plan(N, 7, 7, 4, pad_out=1)     # 7x7  -> 14x14
    plan4 = _convt_plan(N, 14, 14, 4, pad_out=0)   # 14x14-> 28x28
    Hp1, Wp1 = 6, 6
    Mp1 = N * Hp1 * Wp1
    assert plan2['Mp'] == Mp1
    assert plan3['Mp'] == plan2['Mp_out'] and plan4['Mp'] == plan3['Mp_out']

    # ---- layer 1: ConvT on a 1x1 input == per-output-pixel weighted sum of z.
    # w1pn[n*nz+z, c, m] = w1[z, c, h, w] at sample-n interior positions, 0 at
    # pad / other samples -> latent enters as N*nz SMEM scalars.
    w1pn = np.zeros((N * nz, C1, Mp1), np.float32)
    mask1 = np.zeros((1, Mp1), np.float32)
    for n in range(N):
        for h in range(4):
            for w_ in range(4):
                m = (n * Hp1 + h + 1) * Wp1 + (w_ + 1)
                w1pn[n * nz:(n + 1) * nz, :, m] = w1[:, :, h, w_]
                mask1[0, m] = 1.0

    offs2, Lp2, W2blk, M2full, P2all = _layer_consts(plan2, w2)
    offs3, Lp3, W3blk, M3full, P3all = _layer_consts(plan3, w3)
    offs4, L4, W4blk, _, _ = _layer_consts(plan4, w4, with_scatter=False)

    OUT_LANES = -(-L4 // 128) * 128                # lane-dense, 128-padded
    OUT_ROWS = 4 * nc

    # final NCHW gather indices (tiny output-side layout plumbing, in XLA)
    Hp4, Wp4 = plan4['Hp'], plan4['Wp']
    fidx = np.zeros((N, nc, 28, 28), np.int32)
    for n in range(N):
        for oh in range(28):
            for ow in range(28):
                cls_i = 2 * (oh % 2) + (ow % 2)
                q = (n * Hp4 + oh // 2) * Wp4 + ow // 2
                for co in range(nc):
                    fidx[n, co, oh, ow] = (cls_i * nc + co) * OUT_LANES + q
    fidx = jnp.asarray(fidx.reshape(-1))

    consts = (jnp.asarray(w1pn),
              jnp.asarray(g1.reshape(C1, 1)), jnp.asarray(b1.reshape(C1, 1)),
              jnp.asarray(mask1),
              jnp.asarray(W2blk, jnp.bfloat16), jnp.asarray(M2full),
              jnp.asarray(P2all, jnp.bfloat16),
              jnp.asarray(g2.reshape(C2, 1)), jnp.asarray(b2.reshape(C2, 1)),
              jnp.asarray(W3blk, jnp.bfloat16), jnp.asarray(M3full),
              jnp.asarray(P3all, jnp.bfloat16),
              jnp.asarray(g3.reshape(C3, 1)), jnp.asarray(b3.reshape(C3, 1)),
              jnp.asarray(W4blk, jnp.bfloat16))

    cnt1 = float(N * 16)
    cnt2 = float(N * plan2['OH'] * plan2['OW'])
    cnt3 = float(N * plan3['OH'] * plan3['OW'])
    n_lat = N * nz

    # ------------------------- fused kernel -------------------------
    def _patches(act, offs, Lp, cast_bf16):
        # de-dup lane slices (several taps share the same flat offset)
        uniq = {}
        pieces = []
        for off in offs:
            if off not in uniq:
                uniq[off] = act[:, off:off + Lp]
            pieces.append(uniq[off])
        p = pieces[0] if len(pieces) == 1 else jnp.concatenate(pieces, axis=0)
        return p.astype(jnp.bfloat16) if cast_bf16 else p

    def _convt_bn_relu_scatter(act, offs, Lp, cout, w_ref, m_ref, p_ref,
                               g_ref, b_ref, count, cast_patches):
        patches = _patches(act, offs, Lp, cast_bf16=cast_patches)
        # one block-diagonal MXU dot: rows = (class, channel)
        y = jnp.dot(w_ref[...], patches, preferred_element_type=jnp.float32)
        # BN batch stats: 2 masked lane reductions for the whole layer.
        # TODO(synk): one-pass E[y^2]-mean^2 can cancel if |mean| >> std.
        ym = y * m_ref[...]
        rs1 = jnp.sum(ym, axis=1, keepdims=True)            # (4C, 1)
        rs2 = jnp.sum(y * ym, axis=1, keepdims=True)
        s1 = (rs1[0:cout] + rs1[cout:2 * cout]
              + rs1[2 * cout:3 * cout] + rs1[3 * cout:4 * cout])
        s2 = (rs2[0:cout] + rs2[cout:2 * cout]
              + rs2[2 * cout:3 * cout] + rs2[3 * cout:4 * cout])
        mean = s1 / count
        var = s2 / count - mean * mean
        scale = g_ref[...] * lax.rsqrt(jnp.maximum(var, 0.0) + EPS)
        shift = b_ref[...] - mean * scale
        scale4 = jnp.concatenate([scale] * 4, axis=0)
        shift4 = jnp.concatenate([shift] * 4, axis=0)
        z = jnp.maximum(y * scale4 + shift4, 0.0)            # f32 (4C, Lp)
        # rearrange classes onto lanes, then ONE fused 0/1 scatter dot.
        zall = jnp.concatenate([z[0:cout], z[cout:2 * cout],
                                z[2 * cout:3 * cout], z[3 * cout:4 * cout]],
                               axis=1).astype(jnp.bfloat16)   # (C, 4*Lp)
        return jnp.dot(zall, p_ref[...], preferred_element_type=jnp.float32)

    def kernel(xs_ref, w1pn_ref, g1_ref, b1_ref, m1_ref,
               w2_ref, m2_ref, p2_ref, g2_ref, b2_ref,
               w3_ref, m3_ref, p3_ref, g3_ref, b3_ref,
               w4_ref, o_ref):
        # ---- layer 1: SMEM latent scalars x padded weight planes (VPU FMAs)
        acc = xs_ref[0] * w1pn_ref[0]
        for j in range(1, n_lat):
            acc = acc + xs_ref[j] * w1pn_ref[j]
        # padded columns of acc are exactly 0 -> unmasked sums are correct
        s1 = jnp.sum(acc, axis=1, keepdims=True)
        s2 = jnp.sum(acc * acc, axis=1, keepdims=True)
        mean = s1 / cnt1
        var = s2 / cnt1 - mean * mean
        scale = g1_ref[...] * lax.rsqrt(jnp.maximum(var, 0.0) + EPS)
        shift = b1_ref[...] - mean * scale
        act1 = (jnp.maximum(acc * scale + shift, 0.0)
                * m1_ref[...]).astype(jnp.bfloat16)           # (C1, Mp1)

        # ---- layers 2 & 3: merged sub-pixel ConvT + BN + ReLU + scatter ----
        act2 = _convt_bn_relu_scatter(act1, offs2, Lp2, C2, w2_ref, m2_ref,
                                      p2_ref, g2_ref, b2_ref, cnt2,
                                      cast_patches=False).astype(jnp.bfloat16)
        act3 = _convt_bn_relu_scatter(act2, offs3, Lp3, C3, w3_ref, m3_ref,
                                      p3_ref, g3_ref, b3_ref, cnt3,
                                      cast_patches=False)     # keep f32: 8-row
                                                              # slices tile clean
        # ---- layer 4: single block-diagonal ConvT + ONE tanh ----
        patches4 = _patches(act3, offs4, L4, cast_bf16=True)  # (128, L4)
        y4 = jnp.dot(w4_ref[...], patches4,
                     preferred_element_type=jnp.float32)      # (4*nc, L4)
        o_ref[:, 0:L4] = jnp.tanh(y4)                         # lane-dense slab

    vmem = pl.BlockSpec(memory_space=pltpu.MemorySpace.VMEM)
    smem = pl.BlockSpec(memory_space=pltpu.MemorySpace.SMEM)
    in_specs = [smem] + [vmem] * len(consts)

    @jax.jit
    def forward(x, consts_, fidx_):
        xs = x.reshape(N * nz)        # latent -> SMEM scalars (no repeat/copy)
        out = pl.pallas_call(
            kernel,
            out_shape=jax.ShapeDtypeStruct((OUT_ROWS, OUT_LANES), jnp.float32),
            in_specs=in_specs,
            out_specs=vmem,
        )(xs, *consts_)
        # output-side plumbing: gather parity-class columns into NCHW.
        img = jnp.take(out.reshape(-1), fidx_, axis=0)
        return img.reshape(N, nc, 28, 28)

    return forward, consts, fidx


# ---------------------------------------------------------------------------
# Pure-JAX reference (independent path via lax.conv_general_dilated)
# ---------------------------------------------------------------------------
def _ref_convt(x, w, stride, pad):
    kH, kW = w.shape[2], w.shape[3]
    kern = jnp.transpose(w[:, :, ::-1, ::-1], (1, 0, 2, 3))  # (Cout, Cin, kH, kW)
    return lax.conv_general_dilated(
        x, kern, window_strides=(1, 1),
        padding=[(kH - 1 - pad, kH - 1 - pad), (kW - 1 - pad, kW - 1 - pad)],
        lhs_dilation=(stride, stride),
        dimension_numbers=("NCHW", "OIHW", "NCHW"),
        precision=lax.Precision.HIGHEST)


def _ref_bn_relu(x, g, b):
    mean = x.mean(axis=(0, 2, 3), keepdims=True)
    var = ((x - mean) ** 2).mean(axis=(0, 2, 3), keepdims=True)
    xn = (x - mean) * lax.rsqrt(var + EPS) * g.reshape(1, -1, 1, 1) + b.reshape(1, -1, 1, 1)
    return jnp.maximum(xn, 0.0)


def generator_forward_ref(x, params):
    (w1, g1, b1), (w2, g2, b2), (w3, g3, b3), (w4,) = params
    x = _ref_bn_relu(_ref_convt(x, w1, 1, 0), g1, b1)
    x = _ref_bn_relu(_ref_convt(x, w2, 2, 1), g2, b2)
    x = _ref_bn_relu(_ref_convt(x, w3, 2, 1), g3, b3)
    return jnp.tanh(_ref_convt(x, w4, 2, 1))


# ---------------------------------------------------------------------------
if __name__ == "__main__":
    nz, ngf, nc, N = 16, 8, 3, 2

    key = jax.random.PRNGKey(0)
    ks = jax.random.split(key, 12)

    def conv_w(k, shape):
        return 0.05 * jax.random.normal(k, shape, jnp.float32)

    def bn_params(kg, kb, c):
        return (1.0 + 0.1 * jax.random.normal(kg, (c,), jnp.float32),
                0.1 * jax.random.normal(kb, (c,), jnp.float32))

    w1 = conv_w(ks[0], (nz, ngf * 4, 4, 4)); g1, b1 = bn_params(ks[1], ks[2], ngf * 4)
    w2 = conv_w(ks[3], (ngf * 4, ngf * 2, 3, 3)); g2, b2 = bn_params(ks[4], ks[5], ngf * 2)
    w3 = conv_w(ks[6], (ngf * 2, ngf, 4, 4)); g3, b3 = bn_params(ks[7], ks[8], ngf)
    w4 = conv_w(ks[9], (ngf, nc, 4, 4))
    params = ((w1, g1, b1), (w2, g2, b2), (w3, g3, b3), (w4,))

    x = jax.random.normal(ks[10], (N, nz, 1, 1), jnp.float32)

    # All constants (block-diagonal class weights, masks, stacked scatter
    # matrices, gather indices) are built ONCE here, outside the jitted forward.
    forward, consts, fidx = build_generator(params, N)

    out = forward(x, consts, fidx)
    out = jax.block_until_ready(out)
    assert out.shape == (N, nc, 28, 28), out.shape

    ref = generator_forward_ref(x, params)
    np.testing.assert_allclose(np.asarray(out), np.asarray(ref), atol=5e-2, rtol=0)

    print("KERNEL_OK")
</pallas_src>

<mosaic_0001>
module attributes {stable_mosaic.version = 11 : i64} {
  func.func private @main(%arg0: i32) attributes {dimension_semantics = [#tpu.dimension_semantics<core_parallel>], iteration_bounds = array<i64: 2>, tpu.core_type = #tpu.core_type<sc_scalar_subcore>, window_params = []} {
    return
  }
}

module attributes {stable_mosaic.version = 11 : i64} {
  func.func private @main(%arg0: i32) attributes {dimension_semantics = [#tpu.dimension_semantics<core_parallel>], iteration_bounds = array<i64: 2>, tpu.core_type = #tpu.core_type<sc_scalar_subcore>, window_params = []} {
    return
  }
}

module attributes {stable_mosaic.version = 11 : i64} {
  func.func @kernel(%arg0: memref<32xf32, #tpu.memory_space<smem>>, %arg1: memref<32x32x72xf32, #tpu.memory_space<vmem>>, %arg2: memref<32x1xf32, #tpu.memory_space<vmem>>, %arg3: memref<32x1xf32, #tpu.memory_space<vmem>>, %arg4: memref<1x72xf32, #tpu.memory_space<vmem>>, %arg5: memref<64x288xbf16, #tpu.memory_space<vmem>>, %arg6: memref<64x58xf32, #tpu.memory_space<vmem>>, %arg7: memref<232x162xbf16, #tpu.memory_space<vmem>>, %arg8: memref<16x1xf32, #tpu.memory_space<vmem>>, %arg9: memref<16x1xf32, #tpu.memory_space<vmem>>, %arg10: memref<32x256xbf16, #tpu.memory_space<vmem>>, %arg11: memref<32x142xf32, #tpu.memory_space<vmem>>, %arg12: memref<568x512xbf16, #tpu.memory_space<vmem>>, %arg13: memref<8x1xf32, #tpu.memory_space<vmem>>, %arg14: memref<8x1xf32, #tpu.memory_space<vmem>>, %arg15: memref<12x128xbf16, #tpu.memory_space<vmem>>, %arg16: memref<12x512xf32, #tpu.memory_space<vmem>>) attributes {dimension_semantics = [], scalar_prefetch = 0 : i64, scratch_operands = 0 : i64, tpu.core_type = #tpu.core_type<tc>} {
    %c0 = arith.constant 0 : index
    %0 = memref.load %arg0[%c0] : memref<32xf32, #tpu.memory_space<smem>>
    %c0_0 = arith.constant 0 : index
    %c0_1 = arith.constant 0 : index
    %c0_2 = arith.constant 0 : index
    %1 = vector.load %arg1[%c0_0, %c0_1, %c0_2] : memref<32x32x72xf32, #tpu.memory_space<vmem>>, vector<1x32x72xf32>
    %2 = vector.shape_cast %1 : vector<1x32x72xf32> to vector<32x72xf32>
    %3 = vector.broadcast %0 : f32 to vector<32x72xf32>
    %4 = arith.mulf %3, %2 : vector<32x72xf32>
    %c1 = arith.constant 1 : index
    %5 = memref.load %arg0[%c1] : memref<32xf32, #tpu.memory_space<smem>>
    %c1_3 = arith.constant 1 : index
    %c0_4 = arith.constant 0 : index
    %c0_5 = arith.constant 0 : index
    %6 = vector.load %arg1[%c1_3, %c0_4, %c0_5] : memref<32x32x72xf32, #tpu.memory_space<vmem>>, vector<1x32x72xf32>
    %7 = vector.shape_cast %6 : vector<1x32x72xf32> to vector<32x72xf32>
    %8 = vector.broadcast %5 : f32 to vector<32x72xf32>
    %9 = arith.mulf %8, %7 : vector<32x72xf32>
    %10 = arith.addf %4, %9 : vector<32x72xf32>
    %c2 = arith.constant 2 : index
    %11 = memref.load %arg0[%c2] : memref<32xf32, #tpu.memory_space<smem>>
    %c2_6 = arith.constant 2 : index
    %c0_7 = arith.constant 0 : index
    %c0_8 = arith.constant 0 : index
    %12 = vector.load %arg1[%c2_6, %c0_7, %c0_8] : memref<32x32x72xf32, #tpu.memory_space<vmem>>, vector<1x32x72xf32>
    %13 = vector.shape_cast %12 : vector<1x32x72xf32> to vector<32x72xf32>
    %14 = vector.broadcast %11 : f32 to vector<32x72xf32>
    %15 = arith.mulf %14, %13 : vector<32x72xf32>
    %16 = arith.addf %10, %15 : vector<32x72xf32>
    %c3 = arith.constant 3 : index
    %17 = memref.load %arg0[%c3] : memref<32xf32, #tpu.memory_space<smem>>
    %c3_9 = arith.constant 3 : index
    %c0_10 = arith.constant 0 : index
    %c0_11 = arith.constant 0 : index
    %18 = vector.load %arg1[%c3_9, %c0_10, %c0_11] : memref<32x32x72xf32, #tpu.memory_space<vmem>>, vector<1x32x72xf32>
    %19 = vector.shape_cast %18 : vector<1x32x72xf32> to vector<32x72xf32>
    %20 = vector.broadcast %17 : f32 to vector<32x72xf32>
    %21 = arith.mulf %20, %19 : vector<32x72xf32>
    %22 = arith.addf %16, %21 : vector<32x72xf32>
    %c4 = arith.constant 4 : index
    %23 = memref.load %arg0[%c4] : memref<32xf32, #tpu.memory_space<smem>>
    %c4_12 = arith.constant 4 : index
    %c0_13 = arith.constant 0 : index
    %c0_14 = arith.constant 0 : index
    %24 = vector.load %arg1[%c4_12, %c0_13, %c0_14] : memref<32x32x72xf32, #tpu.memory_space<vmem>>, vector<1x32x72xf32>
    %25 = vector.shape_cast %24 : vector<1x32x72xf32> to vector<32x72xf32>
    %26 = vector.broadcast %23 : f32 to vector<32x72xf32>
    %27 = arith.mulf %26, %25 : vector<32x72xf32>
    %28 = arith.addf %22, %27 : vector<32x72xf32>
    %c5 = arith.constant 5 : index
    %29 = memref.load %arg0[%c5] : memref<32xf32, #tpu.memory_space<smem>>
    %c5_15 = arith.constant 5 : index
    %c0_16 = arith.constant 0 : index
    %c0_17 = arith.constant 0 : index
    %30 = vector.load %arg1[%c5_15, %c0_16, %c0_17] : memref<32x32x72xf32, #tpu.memory_space<vmem>>, vector<1x32x72xf32>
    %31 = vector.shape_cast %30 : vector<1x32x72xf32> to vector<32x72xf32>
    %32 = vector.broadcast %29 : f32 to vector<32x72xf32>
    %33 = arith.mulf %32, %31 : vector<32x72xf32>
    %34 = arith.addf %28, %33 : vector<32x72xf32>
    %c6 = arith.constant 6 : index
    %35 = memref.load %arg0[%c6] : memref<32xf32, #tpu.memory_space<smem>>
    %c6_18 = arith.constant 6 : index
    %c0_19 = arith.constant 0 : index
    %c0_20 = arith.constant 0 : index
    %36 = vector.load %arg1[%c6_18, %c0_19, %c0_20] : memref<32x32x72xf32, #tpu.memory_space<vmem>>, vector<1x32x72xf32>
    %37 = vector.shape_cast %36 : vector<1x32x72xf32> to vector<32x72xf32>
    %38 = vector.broadcast %35 : f32 to vector<32x72xf32>
    %39 = arith.mulf %38, %37 : vector<32x72xf32>
    %40 = arith.addf %34, %39 : vector<32x72xf32>
    %c7 = arith.constant 7 : index
    %41 = memref.load %arg0[%c7] : memref<32xf32, #tpu.memory_space<smem>>
    %c7_21 = arith.constant 7 : index
    %c0_22 = arith.constant 0 : index
    %c0_23 = arith.constant 0 : index
    %42 = vector.load %arg1[%c7_21, %c0_22, %c0_23] : memref<32x32x72xf32, #tpu.memory_space<vmem>>, vector<1x32x72xf32>
    %43 = vector.shape_cast %42 : vector<1x32x72xf32> to vector<32x72xf32>
    %44 = vector.broadcast %41 : f32 to vector<32x72xf32>
    %45 = arith.mulf %44, %43 : vector<32x72xf32>
    %46 = arith.addf %40, %45 : vector<32x72xf32>
    %c8 = arith.constant 8 : index
    %47 = memref.load %arg0[%c8] : memref<32xf32, #tpu.memory_space<smem>>
    %c8_24 = arith.constant 8 : index
    %c0_25 = arith.constant 0 : index
    %c0_26 = arith.constant 0 : index
    %48 = vector.load %arg1[%c8_24, %c0_25, %c0_26] : memref<32x32x72xf32, #tpu.memory_space<vmem>>, vector<1x32x72xf32>
    %49 = vector.shape_cast %48 : vector<1x32x72xf32> to vector<32x72xf32>
    %50 = vector.broadcast %47 : f32 to vector<32x72xf32>
    %51 = arith.mulf %50, %49 : vector<32x72xf32>
    %52 = arith.addf %46, %51 : vector<32x72xf32>
    %c9 = arith.constant 9 : index
    %53 = memref.load %arg0[%c9] : memref<32xf32, #tpu.memory_space<smem>>
    %c9_27 = arith.constant 9 : index
    %c0_28 = arith.constant 0 : index
    %c0_29 = arith.constant 0 : index
    %54 = vector.load %arg1[%c9_27, %c0_28, %c0_29] : memref<32x32x72xf32, #tpu.memory_space<vmem>>, vector<1x32x72xf32>
    %55 = vector.shape_cast %54 : vector<1x32x72xf32> to vector<32x72xf32>
    %56 = vector.broadcast %53 : f32 to vector<32x72xf32>
    %57 = arith.mulf %56, %55 : vector<32x72xf32>
    %58 = arith.addf %52, %57 : vector<32x72xf32>
    %c10 = arith.constant 10 : index
    %59 = memref.load %arg0[%c10] : memref<32xf32, #tpu.memory_space<smem>>
    %c10_30 = arith.constant 10 : index
    %c0_31 = arith.constant 0 : index
    %c0_32 = arith.constant 0 : index
    %60 = vector.load %arg1[%c10_30, %c0_31, %c0_32] : memref<32x32x72xf32, #tpu.memory_space<vmem>>, vector<1x32x72xf32>
    %61 = vector.shape_cast %60 : vector<1x32x72xf32> to vector<32x72xf32>
    %62 = vector.broadcast %59 : f32 to vector<32x72xf32>
    %63 = arith.mulf %62, %61 : vector<32x72xf32>
    %64 = arith.addf %58, %63 : vector<32x72xf32>
    %c11 = arith.constant 11 : index
    %65 = memref.load %arg0[%c11] : memref<32xf32, #tpu.memory_space<smem>>
    %c11_33 = arith.constant 11 : index
    %c0_34 = arith.constant 0 : index
    %c0_35 = arith.constant 0 : index
    %66 = vector.load %arg1[%c11_33, %c0_34, %c0_35] : memref<32x32x72xf32, #tpu.memory_space<vmem>>, vector<1x32x72xf32>
    %67 = vector.shape_cast %66 : vector<1x32x72xf32> to vector<32x72xf32>
    %68 = vector.broadcast %65 : f32 to vector<32x72xf32>
    %69 = arith.mulf %68, %67 : vector<32x72xf32>
    %70 = arith.addf %64, %69 : vector<32x72xf32>
    %c12 = arith.constant 12 : index
    %71 = memref.load %arg0[%c12] : memref<32xf32, #tpu.memory_space<smem>>
    %c12_36 = arith.constant 12 : index
    %c0_37 = arith.constant 0 : index
    %c0_38 = arith.constant 0 : index
    %72 = vector.load %arg1[%c12_36, %c0_37, %c0_38] : memref<32x32x72xf32, #tpu.memory_space<vmem>>, vector<1x32x72xf32>
    %73 = vector.shape_cast %72 : vector<1x32x72xf32> to vector<32x72xf32>
    %74 = vector.broadcast %71 : f32 to vector<32x72xf32>
    %75 = arith.mulf %74, %73 : vector<32x72xf32>
    %76 = arith.addf %70, %75 : vector<32x72xf32>
    %c13 = arith.constant 13 : index
    %77 = memref.load %arg0[%c13] : memref<32xf32, #tpu.memory_space<smem>>
    %c13_39 = arith.constant 13 : index
    %c0_40 = arith.constant 0 : index
    %c0_41 = arith.constant 0 : index
    %78 = vector.load %arg1[%c13_39, %c0_40, %c0_41] : memref<32x32x72xf32, #tpu.memory_space<vmem>>, vector<1x32x72xf32>
    %79 = vector.shape_cast %78 : vector<1x32x72xf32> to vector<32x72xf32>
    %80 = vector.broadcast %77 : f32 to vector<32x72xf32>
    %81 = arith.mulf %80, %79 : vector<32x72xf32>
    %82 = arith.addf %76, %81 : vector<32x72xf32>
    %c14 = arith.constant 14 : index
    %83 = memref.load %arg0[%c14] : memref<32xf32, #tpu.memory_space<smem>>
    %c14_42 = arith.constant 14 : index
    %c0_43 = arith.constant 0 : index
    %c0_44 = arith.constant 0 : index
    %84 = vector.load %arg1[%c14_42, %c0_43, %c0_44] : memref<32x32x72xf32, #tpu.memory_space<vmem>>, vector<1x32x72xf32>
    %85 = vector.shape_cast %84 : vector<1x32x72xf32> to vector<32x72xf32>
    %86 = vector.broadcast %83 : f32 to vector<32x72xf32>
    %87 = arith.mulf %86, %85 : vector<32x72xf32>
    %88 = arith.addf %82, %87 : vector<32x72xf32>
    %c15 = arith.constant 15 : index
    %89 = memref.load %arg0[%c15] : memref<32xf32, #tpu.memory_space<smem>>
    %c15_45 = arith.constant 15 : index
    %c0_46 = arith.constant 0 : index
    %c0_47 = arith.constant 0 : index
    %90 = vector.load %arg1[%c15_45, %c0_46, %c0_47] : memref<32x32x72xf32, #tpu.memory_space<vmem>>, vector<1x32x72xf32>
    %91 = vector.shape_cast %90 : vector<1x32x72xf32> to vector<32x72xf32>
    %92 = vector.broadcast %89 : f32 to vector<32x72xf32>
    %93 = arith.mulf %92, %91 : vector<32x72xf32>
    %94 = arith.addf %88, %93 : vector<32x72xf32>
    %c16 = arith.constant 16 : index
    %95 = memref.load %arg0[%c16] : memref<32xf32, #tpu.memory_space<smem>>
    %c16_48 = arith.constant 16 : index
    %c0_49 = arith.constant 0 : index
    %c0_50 = arith.constant 0 : index
    %96 = vector.load %arg1[%c16_48, %c0_49, %c0_50] : memref<32x32x72xf32, #tpu.memory_space<vmem>>, vector<1x32x72xf32>
    %97 = vector.shape_cast %96 : vector<1x32x72xf32> to vector<32x72xf32>
    %98 = vector.broadcast %95 : f32 to vector<32x72xf32>
    %99 = arith.mulf %98, %97 : vector<32x72xf32>
    %100 = arith.addf %94, %99 : vector<32x72xf32>
    %c17 = arith.constant 17 : index
    %101 = memref.load %arg0[%c17] : memref<32xf32, #tpu.memory_space<smem>>
    %c17_51 = arith.constant 17 : index
    %c0_52 = arith.constant 0 : index
    %c0_53 = arith.constant 0 : index
    %102 = vector.load %arg1[%c17_51, %c0_52, %c0_53] : memref<32x32x72xf32, #tpu.memory_space<vmem>>, vector<1x32x72xf32>
    %103 = vector.shape_cast %102 : vector<1x32x72xf32> to vector<32x72xf32>
    %104 = vector.broadcast %101 : f32 to vector<32x72xf32>
    %105 = arith.mulf %104, %103 : vector<32x72xf32>
    %106 = arith.addf %100, %105 : vector<32x72xf32>
    %c18 = arith.constant 18 : index
    %107 = memref.load %arg0[%c18] : memref<32xf32, #tpu.memory_space<smem>>
    %c18_54 = arith.constant 18 : index
    %c0_55 = arith.constant 0 : index
    %c0_56 = arith.constant 0 : index
    %108 = vector.load %arg1[%c18_54, %c0_55, %c0_56] : memref<32x32x72xf32, #tpu.memory_space<vmem>>, vector<1x32x72xf32>
    %109 = vector.shape_cast %108 : vector<1x32x72xf32> to vector<32x72xf32>
    %110 = vector.broadcast %107 : f32 to vector<32x72xf32>
    %111 = arith.mulf %110, %109 : vector<32x72xf32>
    %112 = arith.addf %106, %111 : vector<32x72xf32>
    %c19 = arith.constant 19 : index
    %113 = memref.load %arg0[%c19] : memref<32xf32, #tpu.memory_space<smem>>
    %c19_57 = arith.constant 19 : index
    %c0_58 = arith.constant 0 : index
    %c0_59 = arith.constant 0 : index
    %114 = vector.load %arg1[%c19_57, %c0_58, %c0_59] : memref<32x32x72xf32, #tpu.memory_space<vmem>>, vector<1x32x72xf32>
    %115 = vector.shape_cast %114 : vector<1x32x72xf32> to vector<32x72xf32>
    %116 = vector.broadcast %113 : f32 to vector<32x72xf32>
    %117 = arith.mulf %116, %115 : vector<32x72xf32>
    %118 = arith.addf %112, %117 : vector<32x72xf32>
    %c20 = arith.constant 20 : index
    %119 = memref.load %arg0[%c20] : memref<32xf32, #tpu.memory_space<smem>>
    %c20_60 = arith.constant 20 : index
    %c0_61 = arith.constant 0 : index
    %c0_62 = arith.constant 0 : index
    %120 = vector.load %arg1[%c20_60, %c0_61, %c0_62] : memref<32x32x72xf32, #tpu.memory_space<vmem>>, vector<1x32x72xf32>
    %121 = vector.shape_cast %120 : vector<1x32x72xf32> to vector<32x72xf32>
    %122 = vector.broadcast %119 : f32 to vector<32x72xf32>
    %123 = arith.mulf %122, %121 : vector<32x72xf32>
    %124 = arith.addf %118, %123 : vector<32x72xf32>
    %c21 = arith.constant 21 : index
    %125 = memref.load %arg0[%c21] : memref<32xf32, #tpu.memory_space<smem>>
    %c21_63 = arith.constant 21 : index
    %c0_64 = arith.constant 0 : index
    %c0_65 = arith.constant 0 : index
    %126 = vector.load %arg1[%c21_63, %c0_64, %c0_65] : memref<32x32x72xf32, #tpu.memory_space<vmem>>, vector<1x32x72xf32>
    %127 = vector.shape_cast %126 : vector<1x32x72xf32> to vector<32x72xf32>
    %128 = vector.broadcast %125 : f32 to vector<32x72xf32>
    %129 = arith.mulf %128, %127 : vector<32x72xf32>
    %130 = arith.addf %124, %129 : vector<32x72xf32>
    %c22 = arith.constant 22 : index
    %131 = memref.load %arg0[%c22] : memref<32xf32, #tpu.memory_space<smem>>
    %c22_66 = arith.constant 22 : index
    %c0_67 = arith.constant 0 : index
    %c0_68 = arith.constant 0 : index
    %132 = vector.load %arg1[%c22_66, %c0_67, %c0_68] : memref<32x32x72xf32, #tpu.memory_space<vmem>>, vector<1x32x72xf32>
    %133 = vector.shape_cast %132 : vector<1x32x72xf32> to vector<32x72xf32>
    %134 = vector.broadcast %131 : f32 to vector<32x72xf32>
    %135 = arith.mulf %134, %133 : vector<32x72xf32>
    %136 = arith.addf %130, %135 : vector<32x72xf32>
    %c23 = arith.constant 23 : index
    %137 = memref.load %arg0[%c23] : memref<32xf32, #tpu.memory_space<smem>>
    %c23_69 = arith.constant 23 : index
    %c0_70 = arith.constant 0 : index
    %c0_71 = arith.constant 0 : index
    %138 = vector.load %arg1[%c23_69, %c0_70, %c0_71] : memref<32x32x72xf32, #tpu.memory_space<vmem>>, vector<1x32x72xf32>
    %139 = vector.shape_cast %138 : vector<1x32x72xf32> to vector<32x72xf32>
    %140 = vector.broadcast %137 : f32 to vector<32x72xf32>
    %141 = arith.mulf %140, %139 : vector<32x72xf32>
    %142 = arith.addf %136, %141 : vector<32x72xf32>
    %c24 = arith.constant 24 : index
    %143 = memref.load %arg0[%c24] : memref<32xf32, #tpu.memory_space<smem>>
    %c24_72 = arith.constant 24 : index
    %c0_73 = arith.constant 0 : index
    %c0_74 = arith.constant 0 : index
    %144 = vector.load %arg1[%c24_72, %c0_73, %c0_74] : memref<32x32x72xf32, #tpu.memory_space<vmem>>, vector<1x32x72xf32>
    %145 = vector.shape_cast %144 : vector<1x32x72xf32> to vector<32x72xf32>
    %146 = vector.broadcast %143 : f32 to vector<32x72xf32>
    %147 = arith.mulf %146, %145 : vector<32x72xf32>
    %148 = arith.addf %142, %147 : vector<32x72xf32>
    %c25 = arith.constant 25 : index
    %149 = memref.load %arg0[%c25] : memref<32xf32, #tpu.memory_space<smem>>
    %c25_75 = arith.constant 25 : index
    %c0_76 = arith.constant 0 : index
    %c0_77 = arith.constant 0 : index
    %150 = vector.load %arg1[%c25_75, %c0_76, %c0_77] : memref<32x32x72xf32, #tpu.memory_space<vmem>>, vector<1x32x72xf32>
    %151 = vector.shape_cast %150 : vector<1x32x72xf32> to vector<32x72xf32>
    %152 = vector.broadcast %149 : f32 to vector<32x72xf32>
    %153 = arith.mulf %152, %151 : vector<32x72xf32>
    %154 = arith.addf %148, %153 : vector<32x72xf32>
    %c26 = arith.constant 26 : index
    %155 = memref.load %arg0[%c26] : memref<32xf32, #tpu.memory_space<smem>>
    %c26_78 = arith.constant 26 : index
    %c0_79 = arith.constant 0 : index
    %c0_80 = arith.constant 0 : index
    %156 = vector.load %arg1[%c26_78, %c0_79, %c0_80] : memref<32x32x72xf32, #tpu.memory_space<vmem>>, vector<1x32x72xf32>
    %157 = vector.shape_cast %156 : vector<1x32x72xf32> to vector<32x72xf32>
    %158 = vector.broadcast %155 : f32 to vector<32x72xf32>
    %159 = arith.mulf %158, %157 : vector<32x72xf32>
    %160 = arith.addf %154, %159 : vector<32x72xf32>
    %c27 = arith.constant 27 : index
    %161 = memref.load %arg0[%c27] : memref<32xf32, #tpu.memory_space<smem>>
    %c27_81 = arith.constant 27 : index
    %c0_82 = arith.constant 0 : index
    %c0_83 = arith.constant 0 : index
    %162 = vector.load %arg1[%c27_81, %c0_82, %c0_83] : memref<32x32x72xf32, #tpu.memory_space<vmem>>, vector<1x32x72xf32>
    %163 = vector.shape_cast %162 : vector<1x32x72xf32> to vector<32x72xf32>
    %164 = vector.broadcast %161 : f32 to vector<32x72xf32>
    %165 = arith.mulf %164, %163 : vector<32x72xf32>
    %166 = arith.addf %160, %165 : vector<32x72xf32>
    %c28 = arith.constant 28 : index
    %167 = memref.load %arg0[%c28] : memref<32xf32, #tpu.memory_space<smem>>
    %c28_84 = arith.constant 28 : index
    %c0_85 = arith.constant 0 : index
    %c0_86 = arith.constant 0 : index
    %168 = vector.load %arg1[%c28_84, %c0_85, %c0_86] : memref<32x32x72xf32, #tpu.memory_space<vmem>>, vector<1x32x72xf32>
    %169 = vector.shape_cast %168 : vector<1x32x72xf32> to vector<32x72xf32>
    %170 = vector.broadcast %167 : f32 to vector<32x72xf32>
    %171 = arith.mulf %170, %169 : vector<32x72xf32>
    %172 = arith.addf %166, %171 : vector<32x72xf32>
    %c29 = arith.constant 29 : index
    %173 = memref.load %arg0[%c29] : memref<32xf32, #tpu.memory_space<smem>>
    %c29_87 = arith.constant 29 : index
    %c0_88 = arith.constant 0 : index
    %c0_89 = arith.constant 0 : index
    %174 = vector.load %arg1[%c29_87, %c0_88, %c0_89] : memref<32x32x72xf32, #tpu.memory_space<vmem>>, vector<1x32x72xf32>
    %175 = vector.shape_cast %174 : vector<1x32x72xf32> to vector<32x72xf32>
    %176 = vector.broadcast %173 : f32 to vector<32x72xf32>
    %177 = arith.mulf %176, %175 : vector<32x72xf32>
    %178 = arith.addf %172, %177 : vector<32x72xf32>
    %c30 = arith.constant 30 : index
    %179 = memref.load %arg0[%c30] : memref<32xf32, #tpu.memory_space<smem>>
    %c30_90 = arith.constant 30 : index
    %c0_91 = arith.constant 0 : index
    %c0_92 = arith.constant 0 : index
    %180 = vector.load %arg1[%c30_90, %c0_91, %c0_92] : memref<32x32x72xf32, #tpu.memory_space<vmem>>, vector<1x32x72xf32>
    %181 = vector.shape_cast %180 : vector<1x32x72xf32> to vector<32x72xf32>
    %182 = vector.broadcast %179 : f32 to vector<32x72xf32>
    %183 = arith.mulf %182, %181 : vector<32x72xf32>
    %184 = arith.addf %178, %183 : vector<32x72xf32>
    %c31 = arith.constant 31 : index
    %185 = memref.load %arg0[%c31] : memref<32xf32, #tpu.memory_space<smem>>
    %c31_93 = arith.constant 31 : index
    %c0_94 = arith.constant 0 : index
    %c0_95 = arith.constant 0 : index
    %186 = vector.load %arg1[%c31_93, %c0_94, %c0_95] : memref<32x32x72xf32, #tpu.memory_space<vmem>>, vector<1x32x72xf32>
    %187 = vector.shape_cast %186 : vector<1x32x72xf32> to vector<32x72xf32>
    %188 = vector.broadcast %185 : f32 to vector<32x72xf32>
    %189 = arith.mulf %188, %187 : vector<32x72xf32>
    %190 = arith.addf %184, %189 : vector<32x72xf32>
    %cst = arith.constant dense<0.000000e+00> : vector<32xf32>
    %191 = vector.multi_reduction <add>, %190, %cst [1] : vector<32x72xf32> to vector<32xf32>
    %192 = vector.shape_cast %191 : vector<32xf32> to vector<32x1xf32>
    %193 = arith.mulf %190, %190 : vector<32x72xf32>
    %cst_96 = arith.constant dense<0.000000e+00> : vector<32xf32>
    %194 = vector.multi_reduction <add>, %193, %cst_96 [1] : vector<32x72xf32> to vector<32xf32>
    %195 = vector.shape_cast %194 : vector<32xf32> to vector<32x1xf32>
    %cst_97 = arith.constant 3.200000e+01 : f32
    %196 = vector.broadcast %cst_97 : f32 to vector<32x1xf32>
    %197 = arith.divf %192, %196 : vector<32x1xf32>
    %cst_98 = arith.constant 3.200000e+01 : f32
    %198 = vector.broadcast %cst_98 : f32 to vector<32x1xf32>
    %199 = arith.divf %195, %198 : vector<32x1xf32>
    %200 = arith.mulf %197, %197 : vector<32x1xf32>
    %201 = arith.subf %199, %200 : vector<32x1xf32>
    %c0_99 = arith.constant 0 : index
    %c0_100 = arith.constant 0 : index
    %202 = vector.load %arg2[%c0_99, %c0_100] : memref<32x1xf32, #tpu.memory_space<vmem>>, vector<32x1xf32>
    %cst_101 = arith.constant 0.000000e+00 : f32
    %203 = vector.broadcast %cst_101 : f32 to vector<32x1xf32>
    %204 = arith.maximumf %201, %203 : vector<32x1xf32>
    %cst_102 = arith.constant 9.99999974E-6 : f32
    %205 = vector.broadcast %cst_102 : f32 to vector<32x1xf32>
    %206 = arith.addf %204, %205 : vector<32x1xf32>
    %207 = math.rsqrt %206 : vector<32x1xf32>
    %208 = arith.mulf %202, %207 : vector<32x1xf32>
    %c0_103 = arith.constant 0 : index
    %c0_104 = arith.constant 0 : index
    %209 = vector.load %arg3[%c0_103, %c0_104] : memref<32x1xf32, #tpu.memory_space<vmem>>, vector<32x1xf32>
    %210 = arith.mulf %197, %208 : vector<32x1xf32>
    %211 = arith.subf %209, %210 : vector<32x1xf32>
    %212 = vector.broadcast %208 : vector<32x1xf32> to vector<32x72xf32>
    %213 = arith.mulf %190, %212 : vector<32x72xf32>
    %214 = vector.broadcast %211 : vector<32x1xf32> to vector<32x72xf32>
    %215 = arith.addf %213, %214 : vector<32x72xf32>
    %cst_105 = arith.constant 0.000000e+00 : f32
    %216 = vector.broadcast %cst_105 : f32 to vector<32x72xf32>
    %217 = arith.maximumf %215, %216 : vector<32x72xf32>
    %c0_106 = arith.constant 0 : index
    %c0_107 = arith.constant 0 : index
    %218 = vector.load %arg4[%c0_106, %c0_107] : memref<1x72xf32, #tpu.memory_space<vmem>>, vector<1x72xf32>
    %219 = vector.broadcast %218 : vector<1x72xf32> to vector<32x72xf32>
    %220 = arith.mulf %217, %219 : vector<32x72xf32>
    %221 = arith.truncf %220 : vector<32x72xf32> to vector<32x72xbf16>
    %222 = vector.extract_strided_slice %221 {offsets = [0, 7], sizes = [32, 58], strides = [1, 1]} : vector<32x72xbf16> to vector<32x58xbf16>
    %223 = vector.extract_strided_slice %221 {offsets = [0, 8], sizes = [32, 58], strides = [1, 1]} : vector<32x72xbf16> to vector<32x58xbf16>
    %224 = vector.extract_strided_slice %221 {offsets = [0, 13], sizes = [32, 58], strides = [1, 1]} : vector<32x72xbf16> to vector<32x58xbf16>
    %225 = vector.extract_strided_slice %221 {offsets = [0, 14], sizes = [32, 58], strides = [1, 1]} : vector<32x72xbf16> to vector<32x58xbf16>
    %226 = tpu.concatenate %222, %223, %222, %224, %222, %225, %224, %223, %222 in 0 : vector<32x58xbf16>, vector<32x58xbf16>, vector<32x58xbf16>, vector<32x58xbf16>, vector<32x58xbf16>, vector<32x58xbf16>, vector<32x58xbf16>, vector<32x58xbf16>, vector<32x58xbf16> -> vector<288x58xbf16>
    %c0_108 = arith.constant 0 : index
    %c0_109 = arith.constant 0 : index
    %227 = vector.load %arg5[%c0_108, %c0_109] : memref<64x288xbf16, #tpu.memory_space<vmem>>, vector<64x288xbf16>
    %cst_110 = arith.constant dense<0.000000e+00> : vector<64x58xf32>
    %228 = tpu.matmul %227, %226, %cst_110 {dimension_numbers = #tpu.dot_dimension_numbers<[1], [0], [0], [1], [0, 0, 1, 1], [], []>} : vector<64x288xbf16>, vector<288x58xbf16>, vector<64x58xf32> -> vector<64x58xf32>
    %c0_111 = arith.constant 0 : index
    %c0_112 = arith.constant 0 : index
    %229 = vector.load %arg6[%c0_111, %c0_112] : memref<64x58xf32, #tpu.memory_space<vmem>>, vector<64x58xf32>
    %230 = arith.mulf %228, %229 : vector<64x58xf32>
    %cst_113 = arith.constant dense<0.000000e+00> : vector<64xf32>
    %231 = vector.multi_reduction <add>, %230, %cst_113 [1] : vector<64x58xf32> to vector<64xf32>
    %232 = vector.shape_cast %231 : vector<64xf32> to vector<64x1xf32>
    %233 = arith.mulf %228, %230 : vector<64x58xf32>
    %cst_114 = arith.constant dense<0.000000e+00> : vector<64xf32>
    %234 = vector.multi_reduction <add>, %233, %cst_114 [1] : vector<64x58xf32> to vector<64xf32>
    %235 = vector.shape_cast %234 : vector<64xf32> to vector<64x1xf32>
    %236 = vector.extract_strided_slice %232 {offsets = [0, 0], sizes = [16, 1], strides = [1, 1]} : vector<64x1xf32> to vector<16x1xf32>
    %237 = vector.extract_strided_slice %232 {offsets = [16, 0], sizes = [16, 1], strides = [1, 1]} : vector<64x1xf32> to vector<16x1xf32>
    %238 = arith.addf %236, %237 : vector<16x1xf32>
    %239 = vector.extract_strided_slice %232 {offsets = [32, 0], sizes = [16, 1], strides = [1, 1]} : vector<64x1xf32> to vector<16x1xf32>
    %240 = arith.addf %238, %239 : vector<16x1xf32>
    %241 = vector.extract_strided_slice %232 {offsets = [48, 0], sizes = [16, 1], strides = [1, 1]} : vector<64x1xf32> to vector<16x1xf32>
    %242 = arith.addf %240, %241 : vector<16x1xf32>
    %243 = vector.extract_strided_slice %235 {offsets = [0, 0], sizes = [16, 1], strides = [1, 1]} : vector<64x1xf32> to vector<16x1xf32>
    %244 = vector.extract_strided_slice %235 {offsets = [16, 0], sizes = [16, 1], strides = [1, 1]} : vector<64x1xf32> to vector<16x1xf32>
    %245 = arith.addf %243, %244 : vector<16x1xf32>
    %246 = vector.extract_strided_slice %235 {offsets = [32, 0], sizes = [16, 1], strides = [1, 1]} : vector<64x1xf32> to vector<16x1xf32>
    %247 = arith.addf %245, %246 : vector<16x1xf32>
    %248 = vector.extract_strided_slice %235 {offsets = [48, 0], sizes = [16, 1], strides = [1, 1]} : vector<64x1xf32> to vector<16x1xf32>
    %249 = arith.addf %247, %248 : vector<16x1xf32>
    %cst_115 = arith.constant 9.800000e+01 : f32
    %250 = vector.broadcast %cst_115 : f32 to vector<16x1xf32>
    %251 = arith.divf %242, %250 : vector<16x1xf32>
    %cst_116 = arith.constant 9.800000e+01 : f32
    %252 = vector.broadcast %cst_116 : f32 to vector<16x1xf32>
    %253 = arith.divf %249, %252 : vector<16x1xf32>
    %254 = arith.mulf %251, %251 : vector<16x1xf32>
    %255 = arith.subf %253, %254 : vector<16x1xf32>
    %c0_117 = arith.constant 0 : index
    %c0_118 = arith.constant 0 : index
    %256 = vector.load %arg8[%c0_117, %c0_118] : memref<16x1xf32, #tpu.memory_space<vmem>>, vector<16x1xf32>
    %cst_119 = arith.constant 0.000000e+00 : f32
    %257 = vector.broadcast %cst_119 : f32 to vector<16x1xf32>
    %258 = arith.maximumf %255, %257 : vector<16x1xf32>
    %cst_120 = arith.constant 9.99999974E-6 : f32
    %259 = vector.broadcast %cst_120 : f32 to vector<16x1xf32>
    %260 = arith.addf %258, %259 : vector<16x1xf32>
    %261 = math.rsqrt %260 : vector<16x1xf32>
    %262 = arith.mulf %256, %261 : vector<16x1xf32>
    %c0_121 = arith.constant 0 : index
    %c0_122 = arith.constant 0 : index
    %263 = vector.load %arg9[%c0_121, %c0_122] : memref<16x1xf32, #tpu.memory_space<vmem>>, vector<16x1xf32>
    %264 = arith.mulf %251, %262 : vector<16x1xf32>
    %265 = arith.subf %263, %264 : vector<16x1xf32>
    %266 = tpu.concatenate %262, %262, %262, %262 in 0 : vector<16x1xf32>, vector<16x1xf32>, vector<16x1xf32>, vector<16x1xf32> -> vector<64x1xf32>
    %267 = tpu.concatenate %265, %265, %265, %265 in 0 : vector<16x1xf32>, vector<16x1xf32>, vector<16x1xf32>, vector<16x1xf32> -> vector<64x1xf32>
    %268 = vector.broadcast %266 : vector<64x1xf32> to vector<64x58xf32>
    %269 = arith.mulf %228, %268 : vector<64x58xf32>
    %270 = vector.broadcast %267 : vector<64x1xf32> to vector<64x58xf32>
    %271 = arith.addf %269, %270 : vector<64x58xf32>
    %cst_123 = arith.constant 0.000000e+00 : f32
    %272 = vector.broadcast %cst_123 : f32 to vector<64x58xf32>
    %273 = arith.maximumf %271, %272 : vector<64x58xf32>
    %274 = vector.extract_strided_slice %273 {offsets = [0, 0], sizes = [16, 58], strides = [1, 1]} : vector<64x58xf32> to vector<16x58xf32>
    %275 = vector.extract_strided_slice %273 {offsets = [16, 0], sizes = [16, 58], strides = [1, 1]} : vector<64x58xf32> to vector<16x58xf32>
    %276 = vector.extract_strided_slice %273 {offsets = [32, 0], sizes = [16, 58], strides = [1, 1]} : vector<64x58xf32> to vector<16x58xf32>
    %277 = vector.extract_strided_slice %273 {offsets = [48, 0], sizes = [16, 58], strides = [1, 1]} : vector<64x58xf32> to vector<16x58xf32>
    %278 = tpu.concatenate %274, %275, %276, %277 in 1 : vector<16x58xf32>, vector<16x58xf32>, vector<16x58xf32>, vector<16x58xf32> -> vector<16x232xf32>
    %279 = arith.truncf %278 : vector<16x232xf32> to vector<16x232xbf16>
    %c0_124 = arith.constant 0 : index
    %c0_125 = arith.constant 0 : index
    %280 = vector.load %arg7[%c0_124, %c0_125] : memref<232x162xbf16, #tpu.memory_space<vmem>>, vector<232x162xbf16>
    %cst_126 = arith.constant dense<0.000000e+00> : vector<16x162xf32>
    %281 = tpu.matmul %279, %280, %cst_126 {dimension_numbers = #tpu.dot_dimension_numbers<[1], [0], [0], [1], [0, 0, 1, 1], [], []>} : vector<16x232xbf16>, vector<232x162xbf16>, vector<16x162xf32> -> vector<16x162xf32>
    %282 = arith.truncf %281 : vector<16x162xf32> to vector<16x162xbf16>
    %283 = vector.extract_strided_slice %282 {offsets = [0, 10], sizes = [16, 142], strides = [1, 1]} : vector<16x162xbf16> to vector<16x142xbf16>
    %284 = vector.extract_strided_slice %282 {offsets = [0, 9], sizes = [16, 142], strides = [1, 1]} : vector<16x162xbf16> to vector<16x142xbf16>
    %285 = vector.extract_strided_slice %282 {offsets = [0, 1], sizes = [16, 142], strides = [1, 1]} : vector<16x162xbf16> to vector<16x142xbf16>
    %286 = vector.extract_strided_slice %282 {offsets = [0, 0], sizes = [16, 142], strides = [1, 1]} : vector<16x162xbf16> to vector<16x142xbf16>
    %287 = vector.extract_strided_slice %282 {offsets = [0, 11], sizes = [16, 142], strides = [1, 1]} : vector<16x162xbf16> to vector<16x142xbf16>
    %288 = vector.extract_strided_slice %282 {offsets = [0, 2], sizes = [16, 142], strides = [1, 1]} : vector<16x162xbf16> to vector<16x142xbf16>
    %289 = vector.extract_strided_slice %282 {offsets = [0, 19], sizes = [16, 142], strides = [1, 1]} : vector<16x162xbf16> to vector<16x142xbf16>
    %290 = vector.extract_strided_slice %282 {offsets = [0, 18], sizes = [16, 142], strides = [1, 1]} : vector<16x162xbf16> to vector<16x142xbf16>
    %291 = vector.extract_strided_slice %282 {offsets = [0, 20], sizes = [16, 142], strides = [1, 1]} : vector<16x162xbf16> to vector<16x142xbf16>
    %292 = tpu.concatenate %283, %284, %285, %286, %287, %283, %288, %285, %289, %290, %283, %284, %291, %289, %287, %283 in 0 : vector<16x142xbf16>, vector<16x142xbf16>, vector<16x142xbf16>, vector<16x142xbf16>, vector<16x142xbf16>, vector<16x142xbf16>, vector<16x142xbf16>, vector<16x142xbf16>, vector<16x142xbf16>, vector<16x142xbf16>, vector<16x142xbf16>, vector<16x142xbf16>, vector<16x142xbf16>, vector<16x142xbf16>, vector<16x142xbf16>, vector<16x142xbf16> -> vector<256x142xbf16>
    %c0_127 = arith.constant 0 : index
    %c0_128 = arith.constant 0 : index
    %293 = vector.load %arg10[%c0_127, %c0_128] : memref<32x256xbf16, #tpu.memory_space<vmem>>, vector<32x256xbf16>
    %cst_129 = arith.constant dense<0.000000e+00> : vector<32x142xf32>
    %294 = tpu.matmul %293, %292, %cst_129 {dimension_numbers = #tpu.dot_dimension_numbers<[1], [0], [0], [1], [0, 0, 1, 1], [], []>} : vector<32x256xbf16>, vector<256x142xbf16>, vector<32x142xf32> -> vector<32x142xf32>
    %c0_130 = arith.constant 0 : index
    %c0_131 = arith.constant 0 : index
    %295 = vector.load %arg11[%c0_130, %c0_131] : memref<32x142xf32, #tpu.memory_space<vmem>>, vector<32x142xf32>
    %296 = arith.mulf %294, %295 : vector<32x142xf32>
    %cst_132 = arith.constant dense<0.000000e+00> : vector<32xf32>
    %297 = vector.multi_reduction <add>, %296, %cst_132 [1] : vector<32x142xf32> to vector<32xf32>
    %298 = vector.shape_cast %297 : vector<32xf32> to vector<32x1xf32>
    %299 = arith.mulf %294, %296 : vector<32x142xf32>
    %cst_133 = arith.constant dense<0.000000e+00> : vector<32xf32>
    %300 = vector.multi_reduction <add>, %299, %cst_133 [1] : vector<32x142xf32> to vector<32xf32>
    %301 = vector.shape_cast %300 : vector<32xf32> to vector<32x1xf32>
    %302 = vector.extract_strided_slice %298 {offsets = [0, 0], sizes = [8, 1], strides = [1, 1]} : vector<32x1xf32> to vector<8x1xf32>
    %303 = vector.extract_strided_slice %298 {offsets = [8, 0], sizes = [8, 1], strides = [1, 1]} : vector<32x1xf32> to vector<8x1xf32>
    %304 = arith.addf %302, %303 : vector<8x1xf32>
    %305 = vector.extract_strided_slice %298 {offsets = [16, 0], sizes = [8, 1], strides = [1, 1]} : vector<32x1xf32> to vector<8x1xf32>
    %306 = arith.addf %304, %305 : vector<8x1xf32>
    %307 = vector.extract_strided_slice %298 {offsets = [24, 0], sizes = [8, 1], strides = [1, 1]} : vector<32x1xf32> to vector<8x1xf32>
    %308 = arith.addf %306, %307 : vector<8x1xf32>
    %309 = vector.extract_strided_slice %301 {offsets = [0, 0], sizes = [8, 1], strides = [1, 1]} : vector<32x1xf32> to vector<8x1xf32>
    %310 = vector.extract_strided_slice %301 {offsets = [8, 0], sizes = [8, 1], strides = [1, 1]} : vector<32x1xf32> to vector<8x1xf32>
    %311 = arith.addf %309, %310 : vector<8x1xf32>
    %312 = vector.extract_strided_slice %301 {offsets = [16, 0], sizes = [8, 1], strides = [1, 1]} : vector<32x1xf32> to vector<8x1xf32>
    %313 = arith.addf %311, %312 : vector<8x1xf32>
    %314 = vector.extract_strided_slice %301 {offsets = [24, 0], sizes = [8, 1], strides = [1, 1]} : vector<32x1xf32> to vector<8x1xf32>
    %315 = arith.addf %313, %314 : vector<8x1xf32>
    %cst_134 = arith.constant 3.920000e+02 : f32
    %316 = vector.broadcast %cst_134 : f32 to vector<8x1xf32>
    %317 = arith.divf %308, %316 : vector<8x1xf32>
    %cst_135 = arith.constant 3.920000e+02 : f32
    %318 = vector.broadcast %cst_135 : f32 to vector<8x1xf32>
    %319 = arith.divf %315, %318 : vector<8x1xf32>
    %320 = arith.mulf %317, %317 : vector<8x1xf32>
    %321 = arith.subf %319, %320 : vector<8x1xf32>
    %c0_136 = arith.constant 0 : index
    %c0_137 = arith.constant 0 : index
    %322 = vector.load %arg13[%c0_136, %c0_137] : memref<8x1xf32, #tpu.memory_space<vmem>>, vector<8x1xf32>
    %cst_138 = arith.constant 0.000000e+00 : f32
    %323 = vector.broadcast %cst_138 : f32 to vector<8x1xf32>
    %324 = arith.maximumf %321, %323 : vector<8x1xf32>
    %cst_139 = arith.constant 9.99999974E-6 : f32
    %325 = vector.broadcast %cst_139 : f32 to vector<8x1xf32>
    %326 = arith.addf %324, %325 : vector<8x1xf32>
    %327 = math.rsqrt %326 : vector<8x1xf32>
    %328 = arith.mulf %322, %327 : vector<8x1xf32>
    %c0_140 = arith.constant 0 : index
    %c0_141 = arith.constant 0 : index
    %329 = vector.load %arg14[%c0_140, %c0_141] : memref<8x1xf32, #tpu.memory_space<vmem>>, vector<8x1xf32>
    %330 = arith.mulf %317, %328 : vector<8x1xf32>
    %331 = arith.subf %329, %330 : vector<8x1xf32>
    %332 = tpu.concatenate %328, %328, %328, %328 in 0 : vector<8x1xf32>, vector<8x1xf32>, vector<8x1xf32>, vector<8x1xf32> -> vector<32x1xf32>
    %333 = tpu.concatenate %331, %331, %331, %331 in 0 : vector<8x1xf32>, vector<8x1xf32>, vector<8x1xf32>, vector<8x1xf32> -> vector<32x1xf32>
    %334 = vector.broadcast %332 : vector<32x1xf32> to vector<32x142xf32>
    %335 = arith.mulf %294, %334 : vector<32x142xf32>
    %336 = vector.broadcast %333 : vector<32x1xf32> to vector<32x142xf32>
    %337 = arith.addf %335, %336 : vector<32x142xf32>
    %cst_142 = arith.constant 0.000000e+00 : f32
    %338 = vector.broadcast %cst_142 : f32 to vector<32x142xf32>
    %339 = arith.maximumf %337, %338 : vector<32x142xf32>
    %340 = vector.extract_strided_slice %339 {offsets = [0, 0], sizes = [8, 142], strides = [1, 1]} : vector<32x142xf32> to vector<8x142xf32>
    %341 = vector.extract_strided_slice %339 {offsets = [8, 0], sizes = [8, 142], strides = [1, 1]} : vector<32x142xf32> to vector<8x142xf32>
    %342 = vector.extract_strided_slice %339 {offsets = [16, 0], sizes = [8, 142], strides = [1, 1]} : vector<32x142xf32> to vector<8x142xf32>
    %343 = vector.extract_strided_slice %339 {offsets = [24, 0], sizes = [8, 142], strides = [1, 1]} : vector<32x142xf32> to vector<8x142xf32>
    %344 = tpu.concatenate %340, %341, %342, %343 in 1 : vector<8x142xf32>, vector<8x142xf32>, vector<8x142xf32>, vector<8x142xf32> -> vector<8x568xf32>
    %345 = arith.truncf %344 : vector<8x568xf32> to vector<8x568xbf16>
    %c0_143 = arith.constant 0 : index
    %c0_144 = arith.constant 0 : index
    %346 = vector.load %arg12[%c0_143, %c0_144] : memref<568x512xbf16, #tpu.memory_space<vmem>>, vector<568x512xbf16>
    %cst_145 = arith.constant dense<0.000000e+00> : vector<8x512xf32>
    %347 = tpu.matmul %345, %346, %cst_145 {dimension_numbers = #tpu.dot_dimension_numbers<[1], [0], [0], [1], [0, 0, 1, 1], [], []>} : vector<8x568xbf16>, vector<568x512xbf16>, vector<8x512xf32> -> vector<8x512xf32>
    %348 = vector.extract_strided_slice %347 {offsets = [0, 17], sizes = [8, 478], strides = [1, 1]} : vector<8x512xf32> to vector<8x478xf32>
    %349 = vector.extract_strided_slice %347 {offsets = [0, 16], sizes = [8, 478], strides = [1, 1]} : vector<8x512xf32> to vector<8x478xf32>
    %350 = vector.extract_strided_slice %347 {offsets = [0, 1], sizes = [8, 478], strides = [1, 1]} : vector<8x512xf32> to vector<8x478xf32>
    %351 = vector.extract_strided_slice %347 {offsets = [0, 0], sizes = [8, 478], strides = [1, 1]} : vector<8x512xf32> to vector<8x478xf32>
    %352 = vector.extract_strided_slice %347 {offsets = [0, 18], sizes = [8, 478], strides = [1, 1]} : vector<8x512xf32> to vector<8x478xf32>
    %353 = vector.extract_strided_slice %347 {offsets = [0, 2], sizes = [8, 478], strides = [1, 1]} : vector<8x512xf32> to vector<8x478xf32>
    %354 = vector.extract_strided_slice %347 {offsets = [0, 33], sizes = [8, 478], strides = [1, 1]} : vector<8x512xf32> to vector<8x478xf32>
    %355 = vector.extract_strided_slice %347 {offsets = [0, 32], sizes = [8, 478], strides = [1, 1]} : vector<8x512xf32> to vector<8x478xf32>
    %356 = vector.extract_strided_slice %347 {offsets = [0, 34], sizes = [8, 478], strides = [1, 1]} : vector<8x512xf32> to vector<8x478xf32>
    %357 = tpu.concatenate %348, %349, %350, %351, %352, %348, %353, %350, %354, %355, %348, %349, %356, %354, %352, %348 in 0 : vector<8x478xf32>, vector<8x478xf32>, vector<8x478xf32>, vector<8x478xf32>, vector<8x478xf32>, vector<8x478xf32>, vector<8x478xf32>, vector<8x478xf32>, vector<8x478xf32>, vector<8x478xf32>, vector<8x478xf32>, vector<8x478xf32>, vector<8x478xf32>, vector<8x478xf32>, vector<8x478xf32>, vector<8x478xf32> -> vector<128x478xf32>
    %358 = arith.truncf %357 : vector<128x478xf32> to vector<128x478xbf16>
    %c0_146 = arith.constant 0 : index
    %c0_147 = arith.constant 0 : index
    %359 = vector.load %arg15[%c0_146, %c0_147] : memref<12x128xbf16, #tpu.memory_space<vmem>>, vector<12x128xbf16>
    %cst_148 = arith.constant dense<0.000000e+00> : vector<12x478xf32>
    %360 = tpu.matmul %359, %358, %cst_148 {dimension_numbers = #tpu.dot_dimension_numbers<[1], [0], [0], [1], [0, 0, 1, 1], [], []>} : vector<12x128xbf16>, vector<128x478xbf16>, vector<12x478xf32> -> vector<12x478xf32>
    %361 = math.tanh %360 : vector<12x478xf32>
    %c0_149 = arith.constant 0 : index
    %c0_150 = arith.constant 0 : index
    %362 = vector.load %arg16[%c0_149, %c0_150] : memref<12x512xf32, #tpu.memory_space<vmem>>, vector<12x478xf32>
    tpu.vector_store %arg16[%c0_149, %c0_150], %361 {strides = array<i32>} : memref<12x512xf32, #tpu.memory_space<vmem>>, vector<12x478xf32>,
    return
  }
}

</mosaic_0001>

<bundles_post_ra>
// kernel: forward.1
= control target key start
LH: loop header
LB: loop body
LE: loop exit
PB: predicated region body
PF: predicated region fallthrough
CT: control target
= control target key end

     0   :  { %s5018_s0 = inlined_call_operand.vmem [shape: f32[32], index: 0, kind: input, shape index: {}]   ;;  %s5019_s1 = inlined_call_operand.hbm [shape: f32[32,32,72], index: 1, kind: input, shape index: {}]   ;;  %s5020_s2 = inlined_call_operand.vmem [shape: f32[32,1], index: 2, kind: input, shape index: {}]   ;;  %s5021_s3 = inlined_call_operand.vmem [shape: f32[32,1], index: 3, kind: input, shape index: {}]   ;;  %s5022_s4 = inlined_call_operand.vmem [shape: f32[1,72], index: 4, kind: input, shape index: {}]   ;;  %s5023_s5 = inlined_call_operand.vmem [shape: bf16[64,288], index: 5, kind: input, shape index: {}]   ;;  %s5024_s6 = inlined_call_operand.vmem [shape: f32[64,58], index: 6, kind: input, shape index: {}]   ;;  %s5025_s7 = inlined_call_operand.vmem [shape: bf16[232,162], index: 7, kind: input, shape index: {}]   ;;  %s5026_s8 = inlined_call_operand.vmem [shape: f32[16,1], index: 8, kind: input, shape index: {}]   ;;  %s5027_s9 = inlined_call_operand.vmem [shape: f32[16,1], index: 9, kind: input, shape index: {}]   ;;  %s5028_s10 = inlined_call_operand.vmem [shape: bf16[32,256], index: 10, kind: input, shape index: {}]   ;;  %s5029_s11 = inlined_call_operand.vmem [shape: f32[32,142], index: 11, kind: input, shape index: {}]   ;;  %s5030_s12 = inlined_call_operand.hbm [shape: bf16[568,512], index: 12, kind: input, shape index: {}]   ;;  %s5031_s13 = inlined_call_operand.vmem [shape: f32[8,1], index: 13, kind: input, shape index: {}]   ;;  %s5032_s14 = inlined_call_operand.vmem [shape: f32[8,1], index: 14, kind: input, shape index: {}]   ;;  %s5033_s15 = inlined_call_operand.vmem [shape: bf16[12,128], index: 15, kind: input, shape index: {}]   ;;  %s5034_s16 = inlined_call_operand.vmem [shape: f32[12,512], index: 16, kind: output, shape index: {}]  }
   0x1   :  { %5037 = sst [smem:[#allocation12_spill]] %s5018_s0 }
   0x2   :  { %21 = vsyncpa [#allocation4], 0 }
   0x3   :  { %22 = vsyncpa [#allocation3], 0  ;;  %s5038_s23 = sld [smem:[#allocation12_spill]] }
   0x9   :  { %s30_s24 = sshll.u32 %s5038_s23, 4  ;;  %s31_s24 = int_to_ptr.vmem [resolvable:$true] %s30_s24 }
   0xa   :  { %23 = vsyncpa [#allocation7], 0  ;;  %s3966_s25 = scalar_lea.vmem %s31_s24, 16  ;;  %p3971_p1 = scmp.lt.s32.totalorder %s31_s24, %s31_s24 }
   0xb   :  { %p3967_p0 = scmp.ne.s32.totalorder %s31_s24, %s3966_s25  ;;  %p3972_p2 = scmp.lt.s32.totalorder %s3966_s25, %s3966_s25 }
   0xd   :  { %p3973_p3 = por %p3972_p2, %p3971_p1 }
   0xf   :  { %p3974_p4 = pnand %p3973_p3, %p3967_p0 }
  0x11   :  { %3977 = shalt.err (!%p3974_p4)
}
  0x12   :  { %s4028_s26 = smov [#allocation2]   ;;  %s4029_s27 = smov [#allocation5]  }
  0x13   :  { %33 = dma.vmem_to_smem %s31_s24, 16, %s4028_s26, [#allocation4]  }
  0x14   :  { %s39_s28 = sshll.u32 %s4029_s27, 4  ;;  %s3978_s0 = scalar_lea.hbm %s5019_s1, 16384  ;;  %s40_s28 = int_to_ptr.vmem [resolvable:$true] %s39_s28 }
  0x15   :  { %p3979_p5 = scmp.ne.s32.totalorder %s5019_s1, %s3978_s0  ;;  %p3982_p6 = scmp.lt.u32.totalorder %s3978_s0, %s5019_s1 }
  0x17   :  { %p3984_p7 = pnand %p3982_p6, %p3979_p5 }
  0x19   :  { %3987 = shalt.err (!%p3984_p7)
}
  0x1a   :  { %s3988_s21 = scalar_lea.vmem %s40_s28, 16384  ;;  %p3993_p9 = scmp.lt.s32.totalorder %s40_s28, %s40_s28 }
  0x1b   :  { %p3989_p8 = scmp.ne.s32.totalorder %s40_s28, %s3988_s21  ;;  %p3994_p10 = scmp.lt.s32.totalorder %s3988_s21, %s3988_s21 }
  0x1d   :  { %p3995_p11 = por %p3994_p10, %p3993_p9 }
  0x1f   :  { %p3996_p12 = pnand %p3995_p11, %p3989_p8 }
  0x21   :  { %3999 = shalt.err (!%p3996_p12)
}
  0x22   :  { %s4030_s22 = smov 128   ;;  %s4031_s23 = smov 8  }
  0x23   :  { %45 = dma.hbm_to_vmem [thread:$0]  %s5019_s1, 16384, %s40_s28, [#allocation3], %s4030_s22, %s4030_s22, %s4031_s23  }
  0x24   :  { %s4032_s26 = smov [#allocation6]   ;;  %s4000_s0 = scalar_lea.hbm %s5030_s12, 18176 }
  0x25   :  { %s71_s27 = sshll.u32 %s4032_s26, 4  ;;  %p4001_p13 = scmp.ne.s32.totalorder %s5030_s12, %s4000_s0  ;;  %s72_s27 = int_to_ptr.vmem [resolvable:$true] %s71_s27 }
  0x26   :  { %p4004_p0 = scmp.lt.u32.totalorder %s4000_s0, %s5030_s12 }
  0x28   :  { %p4006_p1 = pnand %p4004_p0, %p4001_p13 }
  0x2a   :  { %4009 = shalt.err (!%p4006_p1)
}
  0x2b   :  { %s4010_s21 = scalar_lea.vmem %s72_s27, 18176  ;;  %p4015_p3 = scmp.lt.s32.totalorder %s72_s27, %s72_s27 }
  0x2c   :  { %p4011_p2 = scmp.ne.s32.totalorder %s72_s27, %s4010_s21  ;;  %p4016_p4 = scmp.lt.s32.totalorder %s4010_s21, %s4010_s21 }
  0x2e   :  { %p4017_p5 = por %p4016_p4, %p4015_p3 }
  0x30   :  { %p4018_p6 = pnand %p4017_p5, %p4011_p2 }
  0x32   :  { %4021 = shalt.err (!%p4018_p6)
}
  0x33   :  { %s4033_s1 = smov 256   ;;  %s4034_s28 = smov 16  }
  0x34   :  { %77 = dma.hbm_to_vmem [thread:$0]  %s5030_s12, 18176, %s72_s27, [#allocation7], %s4033_s1, %s4033_s1, %s4034_s28  }
  0x35   :  { %4022 = dma.done.wait [#allocation4], 16  }
  0x36   :  { %4023 = vsyncadd [#allocation4], 4294967280 }
  0x37   :  { %4024 = dma.done.wait [#allocation3], 16384  }
  0x38   :  { %4025 = vsyncadd [#allocation3], 4294950912 }
  0x39   :  { %4026 = dma.done.wait [#allocation7], 18176  }
  0x3a   :  { %4027 = vsyncadd [#allocation7], 4294949120 }
  0x3b   :  { %93 = sfence }
  0x3c   :  { %s95_s25 = sld [smem:[#allocation2]]  ;;  %s3220_s26 = sld [smem:[#allocation2 + $0x1]]  ;;  %v99_v0 = vld [vmem:[#allocation5 + $0x18] sm:$0xff]  ;;  %v96_v39 = vld [vmem:[#allocation5] sm:$0xff]  ;;  %vm570_vm0 = vcmask 588800   ;;  %vm823_vm1 = vcmask 261120  }
  0x3d   :  { %s3221_s29 = sld [smem:[#allocation2 + $0x2]]  ;;  %s3222_s30 = sld [smem:[#allocation2 + $0x3]]  ;;  %v110_v1 = vld [vmem:[#allocation5 + $0x38] sm:$0xff]  ;;  %v107_v40 = vld [vmem:[#allocation5 + $0x20] sm:$0xff]  ;;  %vm982_vm2 = vcmask 474112   ;;  %vm1332_vm3 = vcmask 1043456  }
  0x3e   :  { %s3223_s0 = sld [smem:[#allocation2 + $0x4]]  ;;  %s3224_s17 = sld [smem:[#allocation2 + $0x5]]  ;;  %v125_v2 = vld [vmem:[#allocation5 + $0x58] sm:$0xff]  ;;  %v122_v43 = vld [vmem:[#allocation5 + $0x40] sm:$0xff]  ;;  %vm1146_vm4 = vcmask 949248   ;;  %vm1149_vm5 = vcmask 375808  }
  0x3f   :  { %s3225_s18 = sld [smem:[#allocation2 + $0x6]]  ;;  %v140_v5 = vld [vmem:[#allocation5 + $0x78] sm:$0xff]  ;;  %s3226_s12 = sld [smem:[#allocation2 + $0x7]]  ;;  %v137_v46 = vld [vmem:[#allocation5 + $0x60] sm:$0xff]  ;;  %vm1328_vm6 = vcmask 850944   ;;  %vm1390_vm7 = vcmask 7168  }
  0x40   :  { %v155_v11 = vld [vmem:[#allocation5 + $0x98] sm:$0xff]  ;;  %s3227_s27 = sld [smem:[#allocation2 + $0x8]]  ;;  %s3228_s19 = sld [smem:[#allocation2 + $0x9]]  ;;  %v152_v54 = vld [vmem:[#allocation5 + $0x80] sm:$0xff]  ;;  %vm1396_vm8 = vcmask 72704   ;;  %vm1402_vm9 = vcmask 80896  }
  0x41   :  { %v170_v15 = vld [vmem:[#allocation5 + $0xb8] sm:$0xff]  ;;  %s3229_s20 = sld [smem:[#allocation2 + $0xa]]  ;;  %s3230_s21 = sld [smem:[#allocation2 + $0xb]]  ;;  %v167_v61 = vld [vmem:[#allocation5 + $0xa0] sm:$0xff]  ;;  %vm1408_vm10 = vcmask 1039360   ;;  %vm1414_vm11 = vcmask 64512  }
  0x42   :  { %v4170_v3 = vstv %s95_s25  ;;  %v4172_v4 = vstv %s3220_s26  ;;  %v185_v19 = vld [vmem:[#allocation5 + $0xd8] sm:$0xff]  ;;  %s3231_s1 = sld [smem:[#allocation2 + $0xc]]  ;;  %s3232_s22 = sld [smem:[#allocation2 + $0xd]]  ;;  %vm1420_vm12 = vcmask 973824   ;;  %vm1426_vm13 = vcmask 982016  }
  0x43   :  { %v104_v6 = vmul.f32 %v4170_v3, %v99_v0  ;;  %v115_v7 = vmul.f32 %v4172_v4, %v110_v1  ;;  %v4176_v8 = vstv %s3221_s29  ;;  %v4178_v9 = vstv %s3222_s30  ;;  %v200_v23 = vld [vmem:[#allocation5 + $0xf8] sm:$0xff]  ;;  %s4201_s24 = sld [smem:[#allocation2 + $0xe]]  ;;  %s4206_s25 = sld [smem:[#allocation2 + $0xf]] }
  0x44   :  { %v130_v10 = vmul.f32 %v4176_v8, %v125_v2  ;;  %v4181_v12 = vstv %s3223_s0  ;;  %v145_v14 = vmul.f32 %v4178_v9, %v140_v5  ;;  %v4184_v16 = vstv %s3224_s17  ;;  %v215_v27 = vld [vmem:[#allocation5 + $0x118] sm:$0xff]  ;;  %s4208_s26 = sld [smem:[#allocation2 + $0x10]]  ;;  %s4213_s29 = sld [smem:[#allocation2 + $0x11]] }
  0x45   :  { %v119_v13 = vadd.f32 %v115_v7, %v104_v6  ;;  %v160_v18 = vmul.f32 %v4181_v12, %v155_v11  ;;  %v4187_v20 = vstv %s3225_s18  ;;  %v175_v22 = vmul.f32 %v4184_v16, %v170_v15  ;;  %v230_v31 = vld [vmem:[#allocation5 + $0x138] sm:$0xff]  ;;  %s4218_s30 = sld [smem:[#allocation2 + $0x12]]  ;;  %s4223_s0 = sld [smem:[#allocation2 + $0x13]]  ;;  %v182_v6 = vld [vmem:[#allocation5 + $0xc0] sm:$0xff] }
  0x46   :  { %v4190_v24 = vstv %s3226_s12  ;;  %v190_v26 = vmul.f32 %v4187_v20, %v185_v19  ;;  %v4193_v28 = vstv %s3227_s27  ;;  %v4196_v32 = vstv %s3228_s19  ;;  %v245_v35 = vld [vmem:[#allocation5 + $0x158] sm:$0xff]  ;;  %s4225_s17 = sld [smem:[#allocation2 + $0x14]]  ;;  %s4234_s18 = sld [smem:[#allocation2 + $0x15]]  ;;  %v197_v19 = vld [vmem:[#allocation5 + $0xe0] sm:$0xff] }
  0x47   :  { %v134_v17 = vadd.f32 %v130_v10, %v119_v13  ;;  %v205_v30 = vmul.f32 %v4190_v24, %v200_v23  ;;  %v220_v34 = vmul.f32 %v4193_v28, %v215_v27  ;;  %v4199_v36 = vstv %s3229_s20  ;;  %v260_v41 = vld [vmem:[#allocation5 + $0x178] sm:$0xff]  ;;  %s4242_s12 = sld [smem:[#allocation2 + $0x16]]  ;;  %s4249_s27 = sld [smem:[#allocation2 + $0x17]]  ;;  %v108_v27 = vld [vmem:[#allocation5 + $0x28] sm:$0xff] }
  0x48   :  { %v235_v38 = vmul.f32 %v4196_v32, %v230_v31  ;;  %v4204_v42 = vstv %s3230_s21  ;;  %v250_v45 = vmul.f32 %v4199_v36, %v245_v35  ;;  %v275_v47 = vld [vmem:[#allocation5 + $0x198] sm:$0xff]  ;;  %v4211_v48 = vstv %s3231_s1  ;;  %v212_v35 = vld [vmem:[#allocation5 + $0x100] sm:$0xff]  ;;  %s4263_s19 = sld [smem:[#allocation2 + $0x18]]  ;;  %s4265_s20 = sld [smem:[#allocation2 + $0x19]] }
  0x49   :  { %v149_v21 = vadd.f32 %v145_v14, %v134_v17  ;;  %v101_v49 = vmul.f32 %v4170_v3, %v96_v39  ;;  %v112_v50 = vmul.f32 %v4172_v4, %v107_v40  ;;  %v265_v52 = vmul.f32 %v4204_v42, %v260_v41  ;;  %v290_v55 = vld [vmem:[#allocation5 + $0x1b8] sm:$0xff]  ;;  %s4269_s21 = sld [smem:[#allocation2 + $0x1a]]  ;;  %s4274_s1 = sld [smem:[#allocation2 + $0x1b]] }
  0x4a   :  { %v127_v53 = vmul.f32 %v4176_v8, %v122_v43  ;;  %v4221_v56 = vstv %s3232_s22  ;;  %v142_v58 = vmul.f32 %v4178_v9, %v137_v46  ;;  %v280_v60 = vmul.f32 %v4211_v48, %v275_v47  ;;  %v305_v62 = vld [vmem:[#allocation5 + $0x1d8] sm:$0xff]  ;;  %v138_v43 = vld [vmem:[#allocation5 + $0x68] sm:$0xff]  ;;  %v227_v47 = vld [vmem:[#allocation5 + $0x120] sm:$0xff]  ;;  %s4308_s22 = sld [smem:[#allocation2 + $0x1c]] }
  0x4b   :  { %v164_v25 = vadd.f32 %v160_v18, %v149_v21  ;;  %v116_v57 = vadd.f32 %v112_v50, %v101_v49  ;;  %v4230_v63 = vstv %s4201_s24  ;;  %v157_v1 = vmul.f32 %v4181_v12, %v152_v54  ;;  %v320_v7 = vld [vmem:[#allocation5 + $0x1f8] sm:$0xff]  ;;  %s4319_s24 = sld [smem:[#allocation2 + $0x1d]] }
  0x4c   :  { %v295_v5 = vmul.f32 %v4221_v56, %v290_v55  ;;  %v4237_v10 = vstv %s4206_s25  ;;  %v335_v11 = vld [vmem:[#allocation5 + $0x218] sm:$0xff]  ;;  %v4240_v13 = vstv %s4208_s26  ;;  %v172_v15 = vmul.f32 %v4184_v16, %v167_v61  ;;  %v242_v61 = vld [vmem:[#allocation5 + $0x140] sm:$0xff]  ;;  %s4329_s25 = sld [smem:[#allocation2 + $0x1e]]  ;;  %s4352_s26 = sld [smem:[#allocation2 + $0x1f]] }
  0x4d   :  { %v179_v29 = vadd.f32 %v175_v22, %v164_v25  ;;  %v131_v0 = vadd.f32 %v127_v53, %v116_v57  ;;  %v310_v18 = vmul.f32 %v4230_v63, %v305_v62  ;;  %v350_v21 = vld [vmem:[#allocation5 + $0x238] sm:$0xff]  ;;  %v4247_v22 = vstv %s4213_s29  ;;  %v153_v57 = vld [vmem:[#allocation5 + $0x88] sm:$0xff] }
  0x4e   :  { %v187_v25 = vmul.f32 %v4187_v20, %v182_v6  ;;  %v340_v31 = vmul.f32 %v4240_v13, %v335_v11  ;;  %v4261_v39 = vstv %s4225_s17  ;;  %v202_v41 = vmul.f32 %v4190_v24, %v197_v19  ;;  %v380_v46 = vld [vmem:[#allocation5 + $0x278] sm:$0xff]  ;;  %v168_v11 = vld [vmem:[#allocation5 + $0xa8] sm:$0xff]  ;;  %s4052_s17 = smov 15  }
  0x4f   :  { %v194_v33 = vadd.f32 %v190_v26, %v179_v29  ;;  %v146_v14 = vadd.f32 %v142_v58, %v131_v0  ;;  %v97_v26 = vld [vmem:[#allocation5 + $0x8] sm:$0xff]  ;;  %v113_v50 = vmul.f32 %v4172_v4, %v108_v27  ;;  %v217_v54 = vmul.f32 %v4193_v28, %v212_v35 }
  0x50   :  { %v102_v49 = vmul.f32 %v4170_v3, %v97_v26  ;;  %v143_v0 = vmul.f32 %v4178_v9, %v138_v43  ;;  %v158_v19 = vmul.f32 %v4181_v12, %v153_v57  ;;  %v247_v26 = vmul.f32 %v4199_v36, %v242_v61  ;;  %v183_v27 = vld [vmem:[#allocation5 + $0xc8] sm:$0xff] }
  0x51   :  { %v209_v37 = vadd.f32 %v205_v30, %v194_v33  ;;  %v161_v23 = vadd.f32 %v157_v1, %v146_v14  ;;  %v325_v30 = vmul.f32 %v4237_v10, %v320_v7  ;;  %v365_v33 = vld [vmem:[#allocation5 + $0x258] sm:$0xff]  ;;  %v232_v7 = vmul.f32 %v4196_v32, %v227_v47  ;;  %v198_v47 = vld [vmem:[#allocation5 + $0xe8] sm:$0xff] }
  0x52   :  { %v117_v62 = vadd.f32 %v113_v50, %v102_v49  ;;  %v4302_v43 = vstv %s4265_s20  ;;  %v485_v50 = vld [vmem:[#allocation5 + $0x358] sm:$0xff]  ;;  %vm1432_vm14 = vcmask 965632   ;;  %vm1585_vm15 = vcmask 113664  }
  0x53   :  { %v224_v44 = vadd.f32 %v220_v34, %v209_v37  ;;  %v4255_v34 = vstv %s4218_s30  ;;  %v123_v37 = vld [vmem:[#allocation5 + $0x48] sm:$0xff]  ;;  %v176_v40 = vadd.f32 %v172_v15, %v161_v23  ;;  %v4291_v23 = vstv %s4249_s27  ;;  %s4055_s27 = smov 111  }
  0x54   :  { %v128_v55 = vmul.f32 %v4176_v8, %v123_v37  ;;  %v173_v37 = vmul.f32 %v4184_v16, %v168_v11  ;;  %v98_v11 = vld [vmem:[#allocation5 + $0x10] sm:$0xff] }
  0x55   :  { %v239_v51 = vadd.f32 %v235_v38, %v224_v44  ;;  %v4258_v38 = vstv %s4223_s0  ;;  %v191_v53 = vadd.f32 %v187_v25, %v176_v40  ;;  %v455_v40 = vld [vmem:[#allocation5 + $0x318] sm:$0xff]  ;;  %s4037_s0 = smov 121  }
  0x56   :  { %v385_v1 = vmul.f32 %v4258_v38, %v380_v46 }
  0x57   :  { %v254_v59 = vadd.f32 %v250_v45, %v239_v51  ;;  %v355_v45 = vmul.f32 %v4247_v22, %v350_v21  ;;  %v370_v51 = vmul.f32 %v4255_v34, %v365_v33  ;;  %v206_v6 = vadd.f32 %v202_v41, %v191_v53  ;;  %v272_v33 = vld [vmem:[#allocation5 + $0x180] sm:$0xff] }
  0x58   :  { %v4299_v41 = vstv %s4263_s19  ;;  %v287_v53 = vld [vmem:[#allocation5 + $0x1a0] sm:$0xff]  ;;  %v277_v61 = vmul.f32 %v4211_v48, %v272_v33 }
  0x59   :  { %v269_v2 = vadd.f32 %v265_v52, %v254_v59  ;;  %v395_v52 = vld [vmem:[#allocation5 + $0x298] sm:$0xff]  ;;  %v221_v25 = vadd.f32 %v217_v54, %v206_v6 }
  0x5a   :  { %v410_v59 = vld [vmem:[#allocation5 + $0x2b8] sm:$0xff]  ;;  %v400_v15 = vmul.f32 %v4261_v39, %v395_v52  ;;  %v4306_v52 = vstv %s4269_s21 }
  0x5b   :  { %v284_v17 = vadd.f32 %v280_v60, %v269_v2  ;;  %v4279_v60 = vstv %s4234_s18  ;;  %v425_v2 = vld [vmem:[#allocation5 + $0x2d8] sm:$0xff]  ;;  %5039 = vst [vmem:[#allocation11_spill] sm:$0xff] %v4306_v52  ;;  %s4053_s18 = smov 112  }
  0x5c   :  { %v415_v21 = vmul.f32 %v4279_v60, %v410_v59 }
  0x5d   :  { %v299_v29 = vadd.f32 %v295_v5, %v284_v17  ;;  %v4284_v5 = vstv %s4242_s12  ;;  %v257_v17 = vld [vmem:[#allocation5 + $0x160] sm:$0xff]  ;;  %s4054_s12 = smov 113  }
  0x5e   :  { %v262_v46 = vmul.f32 %v4204_v42, %v257_v17  ;;  %v124_v17 = vld [vmem:[#allocation5 + $0x50] sm:$0xff] }
  0x5f   :  { %v314_v44 = vadd.f32 %v310_v18, %v299_v29  ;;  %v132_v18 = vadd.f32 %v128_v55, %v117_v62  ;;  %v188_v55 = vmul.f32 %v4187_v20, %v183_v27  ;;  %v302_v62 = vld [vmem:[#allocation5 + $0x1c0] sm:$0xff] }
  0x60   :  { %v317_v27 = vld [vmem:[#allocation5 + $0x1e0] sm:$0xff]  ;;  %v307_v33 = vmul.f32 %v4230_v63, %v302_v62 }
  0x61   :  { %v329_v58 = vadd.f32 %v325_v30, %v314_v44  ;;  %v4295_v30 = vmul.f32 %v4284_v5, %v425_v2  ;;  %v147_v35 = vadd.f32 %v143_v0, %v132_v18  ;;  %v236_v44 = vadd.f32 %v232_v7, %v221_v25  ;;  %v213_v0 = vld [vmem:[#allocation5 + $0x108] sm:$0xff]  ;;  %v500_v25 = vld [vmem:[#allocation5 + $0x378] sm:$0xff]  ;;  %v347_v62 = vld [vmem:[#allocation5 + $0x220] sm:$0xff] }
  0x62   :  { %v4317_v2 = vmul.f32 %v4299_v41, %v455_v40  ;;  %v203_v7 = vmul.f32 %v4190_v24, %v198_v47  ;;  %v218_v40 = vmul.f32 %v4193_v28, %v213_v0  ;;  %v139_v47 = vld [vmem:[#allocation5 + $0x70] sm:$0xff] }
  0x63   :  { %v344_v14 = vadd.f32 %v340_v31, %v329_v58  ;;  %v440_v31 = vld [vmem:[#allocation5 + $0x2f8] sm:$0xff]  ;;  %v162_v54 = vadd.f32 %v158_v19, %v147_v35  ;;  %v4313_v58 = vstv %s4274_s1  ;;  %v251_v59 = vadd.f32 %v247_v26, %v236_v44  ;;  %v332_v35 = vld [vmem:[#allocation5 + $0x200] sm:$0xff]  ;;  %v243_v44 = vld [vmem:[#allocation5 + $0x148] sm:$0xff]  ;;  %s4040_s1 = smov 58  }
  0x64   :  { %v445_v57 = vmul.f32 %v4291_v23, %v440_v31  ;;  %v4326_v19 = vmul.f32 %v4306_v52, %v485_v50  ;;  %v258_v50 = vld [vmem:[#allocation5 + $0x168] sm:$0xff] }
  0x65   :  { %v359_v29 = vadd.f32 %v355_v45, %v344_v14  ;;  %v470_v45 = vld [vmem:[#allocation5 + $0x338] sm:$0xff]  ;;  %v177_v6 = vadd.f32 %v173_v37, %v162_v54  ;;  %v109_v14 = vld [vmem:[#allocation5 + $0x30] sm:$0xff]  ;;  %v266_v26 = vadd.f32 %v262_v46, %v251_v59  ;;  %v103_v46 = vmul.f32 %v4170_v3, %v98_v11 }
  0x66   :  { %v4323_v18 = vmul.f32 %v4302_v43, %v470_v45  ;;  %v4337_v59 = vmul.f32 %v4313_v58, %v500_v25  ;;  %v144_v3 = vmul.f32 %v4178_v9, %v139_v47  ;;  %v4350_v9 = vstv %s4319_s24  ;;  %s4043_s24 = smov 9  }
  0x67   :  { %v374_v49 = vadd.f32 %v370_v51, %v359_v29  ;;  %v228_v29 = vld [vmem:[#allocation5 + $0x128] sm:$0xff]  ;;  %v192_v37 = vadd.f32 %v188_v55, %v177_v6  ;;  %v281_v45 = vadd.f32 %v277_v61, %v266_v26  ;;  %v322_v61 = vmul.f32 %v4237_v10, %v317_v27 }
  0x68   :  { %v233_v0 = vmul.f32 %v4196_v32, %v228_v29  ;;  %v273_v26 = vld [vmem:[#allocation5 + $0x188] sm:$0xff] }
  0x69   :  { %v389_v51 = vadd.f32 %v385_v1, %v374_v49  ;;  %v292_v1 = vmul.f32 %v4221_v56, %v287_v53  ;;  %v154_v49 = vld [vmem:[#allocation5 + $0x90] sm:$0xff]  ;;  %v114_v53 = vmul.f32 %v4172_v4, %v109_v14  ;;  %v207_v55 = vadd.f32 %v203_v7, %v192_v37  ;;  %v288_v29 = vld [vmem:[#allocation5 + $0x1a8] sm:$0xff] }
  0x6a   :  { %v248_v14 = vmul.f32 %v4199_v36, %v243_v44  ;;  %v184_v7 = vld [vmem:[#allocation5 + $0xd0] sm:$0xff] }
  0x6b   :  { %v404_v31 = vadd.f32 %v400_v15, %v389_v51  ;;  %v129_v15 = vmul.f32 %v4176_v8, %v124_v17  ;;  %v169_v51 = vld [vmem:[#allocation5 + $0xb0] sm:$0xff]  ;;  %v296_v6 = vadd.f32 %v292_v1, %v281_v45  ;;  %v118_v52 = vadd.f32 %v114_v53, %v103_v46  ;;  %v515_v17 = vld [vmem:[#allocation5 + $0x398] sm:$0xff] }
  0x6c   :  { %v4344_v8 = vstv %s4308_s22  ;;  %v222_v11 = vadd.f32 %v218_v40, %v207_v55  ;;  %v337_v1 = vmul.f32 %v4240_v13, %v332_v35  ;;  %v263_v40 = vmul.f32 %v4204_v42, %v258_v50  ;;  %v199_v44 = vld [vmem:[#allocation5 + $0xf0] sm:$0xff]  ;;  %v530_v45 = vld [vmem:[#allocation5 + $0x3b8] sm:$0xff]  ;;  %v303_v35 = vld [vmem:[#allocation5 + $0x1c8] sm:$0xff]  ;;  %s4041_s22 = smov 46  }
  0x6d   :  { %v419_v54 = vadd.f32 %v415_v21, %v404_v31  ;;  %v362_v21 = vld [vmem:[#allocation5 + $0x240] sm:$0xff]  ;;  %v311_v25 = vadd.f32 %v307_v33, %v296_v6  ;;  %v133_v27 = vadd.f32 %v129_v15, %v118_v52  ;;  %v159_v31 = vmul.f32 %v4181_v12, %v154_v49  ;;  %v214_v55 = vld [vmem:[#allocation5 + $0x110] sm:$0xff]  ;;  %v318_v6 = vld [vmem:[#allocation5 + $0x1e8] sm:$0xff] }
  0x6e   :  { %v237_v47 = vadd.f32 %v233_v0, %v222_v11  ;;  %v352_v33 = vmul.f32 %v4247_v22, %v347_v62  ;;  %v174_v52 = vmul.f32 %v4184_v16, %v169_v51  ;;  %v392_v49 = vld [vmem:[#allocation5 + $0x280] sm:$0xff]  ;;  %v367_v50 = vmul.f32 %v4255_v34, %v362_v21  ;;  %v229_v11 = vld [vmem:[#allocation5 + $0x130] sm:$0xff] }
  0x6f   :  { %v434_v4 = vadd.f32 %v4295_v30, %v419_v54  ;;  %v377_v30 = vld [vmem:[#allocation5 + $0x260] sm:$0xff]  ;;  %v326_v46 = vadd.f32 %v322_v61, %v311_v25  ;;  %v148_v53 = vadd.f32 %v144_v3, %v133_v27  ;;  %v278_v54 = vmul.f32 %v4211_v48, %v273_v26 }
  0x70   :  { %v252_v15 = vadd.f32 %v248_v14, %v237_v47  ;;  %v189_v62 = vmul.f32 %v4187_v20, %v184_v7  ;;  %v520_v16 = vmul.f32 %v4344_v8, %v515_v17  ;;  %v407_v51 = vld [vmem:[#allocation5 + $0x2a0] sm:$0xff]  ;;  %v545_v14 = vld [vmem:[#allocation5 + $0x3d8] sm:$0xff]  ;;  %v382_v26 = vmul.f32 %v4258_v38, %v377_v30 }
  0x71   :  { %v449_v37 = vadd.f32 %v445_v57, %v434_v4  ;;  %v4359_v57 = vstv %s4329_s25  ;;  %v341_v0 = vadd.f32 %v337_v1, %v326_v46  ;;  %v163_v61 = vadd.f32 %v159_v31, %v148_v53  ;;  %v333_v1 = vld [vmem:[#allocation5 + $0x208] sm:$0xff]  ;;  %v422_v7 = vld [vmem:[#allocation5 + $0x2c0] sm:$0xff]  ;;  %s4044_s25 = smov 10  }
  0x72   :  { %v293_v4 = vmul.f32 %v4221_v56, %v288_v29  ;;  %v204_v27 = vmul.f32 %v4190_v24, %v199_v44  ;;  %v308_v31 = vmul.f32 %v4230_v63, %v303_v35  ;;  %v560_v29 = vld [vmem:[#allocation5 + $0x3f8] sm:$0xff]  ;;  %v348_v46 = vld [vmem:[#allocation5 + $0x228] sm:$0xff]  ;;  %v4376_v24 = vstv %s4352_s26  ;;  %s4047_s26 = smov 118  }
  0x73   :  { %v464_v12 = vadd.f32 %v4317_v2, %v449_v37  ;;  %v267_v2 = vadd.f32 %v263_v40, %v252_v15  ;;  %v356_v25 = vadd.f32 %v352_v33, %v341_v0  ;;  %v178_v21 = vadd.f32 %v174_v52, %v163_v61  ;;  %v244_v37 = vld [vmem:[#allocation5 + $0x150] sm:$0xff]  ;;  %v363_v15 = vld [vmem:[#allocation5 + $0x248] sm:$0xff] }
  0x74   :  { %v397_v40 = vmul.f32 %v4261_v39, %v392_v49  ;;  %v219_v33 = vmul.f32 %v4193_v28, %v214_v55  ;;  %v259_v52 = vld [vmem:[#allocation5 + $0x170] sm:$0xff]  ;;  %v412_v35 = vmul.f32 %v4279_v60, %v407_v51  ;;  %v234_v49 = vmul.f32 %v4196_v32, %v229_v11  ;;  %v452_v28 = vld [vmem:[#allocation5 + $0x300] sm:$0xff] }
  0x75   :  { %v479_v3 = vadd.f32 %v4323_v18, %v464_v12  ;;  %v535_v18 = vmul.f32 %v4350_v9, %v530_v45  ;;  %v282_v17 = vadd.f32 %v278_v54, %v267_v2  ;;  %v371_v47 = vadd.f32 %v367_v50, %v356_v25  ;;  %v274_v61 = vld [vmem:[#allocation5 + $0x190] sm:$0xff] }
  0x76   :  { %v193_v30 = vadd.f32 %v189_v62, %v178_v21  ;;  %v323_v45 = vmul.f32 %v4237_v10, %v318_v6  ;;  %v550_v50 = vmul.f32 %v4359_v57, %v545_v14  ;;  %v378_v6 = vld [vmem:[#allocation5 + $0x268] sm:$0xff]  ;;  %v565_v25 = vmul.f32 %v4376_v24, %v560_v29  ;;  %v289_v11 = vld [vmem:[#allocation5 + $0x1b0] sm:$0xff] }
  0x77   :  { %v494_v20 = vadd.f32 %v4326_v19, %v479_v3  ;;  %v437_v19 = vld [vmem:[#allocation5 + $0x2e0] sm:$0xff]  ;;  %v297_v44 = vadd.f32 %v293_v4, %v282_v17  ;;  %v386_v12 = vadd.f32 %v382_v26, %v371_v47  ;;  %v427_v3 = vmul.f32 %v4284_v5, %v422_v7  ;;  %v408_v47 = vld [vmem:[#allocation5 + $0x2a8] sm:$0xff] }
  0x78   :  { %v208_v54 = vadd.f32 %v204_v27, %v193_v30  ;;  %v249_v4 = vmul.f32 %v4199_v36, %v244_v37  ;;  %v467_v26 = vld [vmem:[#allocation5 + $0x320] sm:$0xff]  ;;  %v442_v21 = vmul.f32 %v4291_v23, %v437_v19  ;;  %v368_v36 = vmul.f32 %v4255_v34, %v363_v15  ;;  %v319_v19 = vld [vmem:[#allocation5 + $0x1f0] sm:$0xff] }
  0x79   :  { %v509_v53 = vadd.f32 %v4337_v59, %v494_v20  ;;  %v312_v55 = vadd.f32 %v308_v31, %v297_v44  ;;  %v338_v59 = vmul.f32 %v4240_v13, %v333_v1  ;;  %v401_v62 = vadd.f32 %v397_v40, %v386_v12  ;;  %v393_v1 = vld [vmem:[#allocation5 + $0x288] sm:$0xff]  ;;  %v482_v17 = vld [vmem:[#allocation5 + $0x340] sm:$0xff] }
  0x7a   :  { %v223_v2 = vadd.f32 %v219_v33, %v208_v54  ;;  %v264_v20 = vmul.f32 %v4204_v42, %v259_v52  ;;  %v457_v29 = vmul.f32 %v4299_v41, %v452_v28  ;;  %v497_v33 = vld [vmem:[#allocation5 + $0x360] sm:$0xff]  ;;  %v383_v42 = vmul.f32 %v4258_v38, %v378_v6  ;;  %v423_v52 = vld [vmem:[#allocation5 + $0x2c8] sm:$0xff]  ;;  %v5040_v28 = vld [vmem:[#allocation11_spill] sm:$0xff] }
  0x7b   :  { %v524_v0 = vadd.f32 %v520_v16, %v509_v53  ;;  %v327_v32 = vadd.f32 %v323_v45, %v312_v55  ;;  %v353_v16 = vmul.f32 %v4247_v22, %v348_v46  ;;  %v416_v14 = vadd.f32 %v412_v35, %v401_v62  ;;  %v512_v54 = vld [vmem:[#allocation5 + $0x380] sm:$0xff] }
  0x7c   :  { %v238_v27 = vadd.f32 %v234_v49, %v223_v2  ;;  %v279_v46 = vmul.f32 %v4211_v48, %v274_v61  ;;  %v472_v45 = vmul.f32 %v4302_v43, %v467_v26  ;;  %v294_v35 = vmul.f32 %v4221_v56, %v289_v11  ;;  %v349_v2 = vld [vmem:[#allocation5 + $0x230] sm:$0xff] }
  0x7d   :  { %v539_v51 = vadd.f32 %v535_v18, %v524_v0  ;;  %v342_v31 = vadd.f32 %v338_v59, %v327_v32  ;;  %v304_v18 = vld [vmem:[#allocation5 + $0x1d0] sm:$0xff]  ;;  %v431_v37 = vadd.f32 %v427_v3, %v416_v14  ;;  %v398_v48 = vmul.f32 %v4261_v39, %v393_v1  ;;  %v438_v59 = vld [vmem:[#allocation5 + $0x2e8] sm:$0xff]  ;;  %v527_v3 = vld [vmem:[#allocation5 + $0x3a0] sm:$0xff] }
  0x7e   :  { %v253_v40 = vadd.f32 %v249_v4, %v238_v27  ;;  %v334_v0 = vld [vmem:[#allocation5 + $0x210] sm:$0xff]  ;;  %v487_v55 = vmul.f32 %v5040_v28, %v482_v17  ;;  %v309_v62 = vmul.f32 %v4230_v63, %v304_v18  ;;  %v413_v56 = vmul.f32 %v4279_v60, %v408_v47  ;;  %v468_v27 = vld [vmem:[#allocation5 + $0x328] sm:$0xff]  ;;  %v557_v17 = vld [vmem:[#allocation5 + $0x3e0] sm:$0xff] }
  0x7f   :  { %v554_v7 = vadd.f32 %v550_v50, %v539_v51  ;;  %v357_v53 = vadd.f32 %v353_v16, %v342_v31  ;;  %v446_v44 = vadd.f32 %v442_v21, %v431_v37  ;;  %v502_v51 = vmul.f32 %v4313_v58, %v497_v33  ;;  %v542_v16 = vld [vmem:[#allocation5 + $0x3c0] sm:$0xff]  ;;  %v364_v21 = vld [vmem:[#allocation5 + $0x250] sm:$0xff] }
  0x80   :  { %v268_v12 = vadd.f32 %v264_v20, %v253_v40  ;;  %v324_v32 = vmul.f32 %v4237_v10, %v319_v19  ;;  %v428_v14 = vmul.f32 %v4284_v5, %v423_v52  ;;  %v517_v63 = vmul.f32 %v4344_v8, %v512_v54  ;;  %v379_v18 = vld [vmem:[#allocation5 + $0x270] sm:$0xff] }
  0x81   :  { %v4392_v30 = vadd.f32 %v565_v25, %v554_v7  ;;  %v372_v49 = vadd.f32 %v368_v36, %v357_v53  ;;  %v461_v50 = vadd.f32 %v457_v29, %v446_v44  ;;  %v453_v25 = vld [vmem:[#allocation5 + $0x308] sm:$0xff]  ;;  %v339_v7 = vmul.f32 %v4240_v13, %v334_v0  ;;  %v394_v53 = vld [vmem:[#allocation5 + $0x290] sm:$0xff] }
  0x82   :  { %v283_v61 = vadd.f32 %v279_v46, %v268_v12  ;;  %v443_v36 = vmul.f32 %v4291_v23, %v438_v59  ;;  %v532_v10 = vmul.f32 %v4350_v9, %v527_v3  ;;  %v483_v29 = vld [vmem:[#allocation5 + $0x348] sm:$0xff]  ;;  %v354_v40 = vmul.f32 %v4247_v22, %v349_v2 }
  0x83   :  { %v580_v15 = vsel %vm570_vm0, %v4392_v30, 0.0  ;;  %v387_v6 = vadd.f32 %v383_v42, %v372_v49  ;;  %v476_v4 = vadd.f32 %v472_v45, %v461_v50  ;;  %v458_v33 = vmul.f32 %v4299_v41, %v453_v25  ;;  %v498_v13 = vld [vmem:[#allocation5 + $0x368] sm:$0xff] }
  0x84   :  { %581 = vadd.xlane.f32.xlu1 %v580_v15  ;;  %v298_v26 = vadd.f32 %v294_v35, %v283_v61  ;;  %v547_v19 = vmul.f32 %v4359_v57, %v542_v16  ;;  %v369_v45 = vmul.f32 %v4255_v34, %v364_v21  ;;  %v473_v12 = vmul.f32 %v4302_v43, %v468_v27  ;;  %v409_v35 = vld [vmem:[#allocation5 + $0x2b0] sm:$0xff]  ;;  %v513_v49 = vld [vmem:[#allocation5 + $0x388] sm:$0xff] }
  0x85   :  { %v402_v11 = vadd.f32 %v398_v48, %v387_v6  ;;  %v491_v1 = vadd.f32 %v487_v55, %v476_v4  ;;  %v562_v54 = vmul.f32 %v4376_v24, %v557_v17  ;;  %v384_v48 = vmul.f32 %v4258_v38, %v379_v18  ;;  %v424_v55 = vld [vmem:[#allocation5 + $0x2d0] sm:$0xff]  ;;  %v528_v61 = vld [vmem:[#allocation5 + $0x3a8] sm:$0xff] }
  0x86   :  { %v313_v20 = vadd.f32 %v309_v62, %v298_v26  ;;  %v488_v50 = vmul.f32 %v5040_v28, %v483_v29  ;;  %v399_v34 = vmul.f32 %v4261_v39, %v394_v53  ;;  %v503_v6 = vmul.f32 %v4313_v58, %v498_v13  ;;  %v543_v4 = vld [vmem:[#allocation5 + $0x3c8] sm:$0xff]  ;;  %v469_v27 = vld [vmem:[#allocation5 + $0x330] sm:$0xff] }
  0x87   :  { %v417_v31 = vadd.f32 %v413_v56, %v402_v11  ;;  %v506_v37 = vadd.f32 %v502_v51, %v491_v1  ;;  %v439_v56 = vld [vmem:[#allocation5 + $0x2f0] sm:$0xff]  ;;  %v414_v25 = vmul.f32 %v4279_v60, %v409_v35  ;;  %v518_v26 = vmul.f32 %v4344_v8, %v513_v49  ;;  %v558_v11 = vld [vmem:[#allocation5 + $0x3e8] sm:$0xff] }
  0x88   :  { %v328_v47 = vadd.f32 %v324_v32, %v313_v20  ;;  %v454_v32 = vld [vmem:[#allocation5 + $0x310] sm:$0xff]  ;;  %v429_v21 = vmul.f32 %v4284_v5, %v424_v55  ;;  %v563_v5 = vmul.f32 %v4376_v24, %v558_v11 }
  0x89   :  { %v432_v46 = vadd.f32 %v428_v14, %v417_v31  ;;  %v521_v42 = vadd.f32 %v517_v63, %v506_v37  ;;  %v533_v63 = vmul.f32 %v4350_v9, %v528_v61  ;;  %v548_v31 = vmul.f32 %v4359_v57, %v543_v4  ;;  %v499_v29 = vld [vmem:[#allocation5 + $0x370] sm:$0xff] }
  0x8a   :  { %v343_v44 = vadd.f32 %v339_v7, %v328_v47  ;;  %v444_v7 = vmul.f32 %v4291_v23, %v439_v56  ;;  %v459_v37 = vmul.f32 %v4299_v41, %v454_v32 }
  0x8b   :  { %v447_v52 = vadd.f32 %v443_v36, %v432_v46  ;;  %v536_v15 = vadd.f32 %v532_v10, %v521_v42  ;;  %v484_v36 = vld [vmem:[#allocation5 + $0x350] sm:$0xff] }
  0x8c   :  { %v358_v22 = vadd.f32 %v354_v40, %v343_v44  ;;  %v474_v40 = vmul.f32 %v4302_v43, %v469_v27  ;;  %v489_v23 = vmul.f32 %v5040_v28, %v484_v36  ;;  %v504_v44 = vmul.f32 %v4313_v58, %v499_v29  ;;  %v617_v29 = vld [vmem:[%s5020_s2 + $0x8] sm:$0xff] }
  0x8d   :  { %v462_v0 = vadd.f32 %v458_v33, %v447_v52  ;;  %v551_v59 = vadd.f32 %v547_v19, %v536_v15  ;;  %v514_v33 = vld [vmem:[#allocation5 + $0x390] sm:$0xff]  ;;  %v586_v43 = vmul.f32 %v4392_v30, %v4392_v30 }
  0x8e   :  { %v373_v62 = vadd.f32 %v369_v45, %v358_v22  ;;  %v529_v19 = vld [vmem:[#allocation5 + $0x3b0] sm:$0xff]  ;;  %v519_v28 = vmul.f32 %v4344_v8, %v514_v33 }
  0x8f   :  { %v477_v3 = vadd.f32 %v473_v12, %v462_v0  ;;  %v4420_v2 = vadd.f32 %v562_v54, %v551_v59  ;;  %v544_v52 = vld [vmem:[#allocation5 + $0x3d0] sm:$0xff]  ;;  %v534_v58 = vmul.f32 %v4350_v9, %v529_v19  ;;  %v596_v49 = vsel %vm570_vm0, %v586_v43, 0.0 }
  0x90   :  { %v388_v51 = vadd.f32 %v384_v48, %v373_v62  ;;  %v559_v15 = vld [vmem:[#allocation5 + $0x3f0] sm:$0xff]  ;;  %v549_v48 = vmul.f32 %v4359_v57, %v544_v52  ;;  %v4035_v62 = vmov 0   ;;  %v619_v52 = vld [vmem:[%s5020_s2 + $0x18] sm:$0xff] }
  0x91   :  { %v492_v38 = vadd.f32 %v488_v50, %v477_v3  ;;  %v571_v16 = vsel %vm570_vm0, %v4420_v2, 0.0  ;;  %v583_v39 = vmul.f32 %v4420_v2, %v4420_v2  ;;  %v564_v50 = vmul.f32 %v4376_v24, %v559_v15  ;;  %3553 = vset.pattern.permute.xlu0 %v4035_v62  ;;  %3554 = vset.pattern.permute.xlu1 %v4035_v62 }
  0x92   :  { %v403_v14 = vadd.f32 %v399_v34, %v388_v51  ;;  %572 = vadd.xlane.f32.xlu0 %v571_v16 }
  0x93   :  { %v507_v1 = vadd.f32 %v503_v6, %v492_v38  ;;  %v587_v60 = vsel %vm570_vm0, %v583_v39, 0.0 }
  0x94   :  { %v418_v20 = vadd.f32 %v414_v25, %v403_v14  ;;  %588 = vadd.xlane.f32.xlu1 %v587_v60 }
  0x95   :  { %v522_v17 = vadd.f32 %v518_v26, %v507_v1 }
  0x96   :  { %v433_v18 = vadd.f32 %v429_v21, %v418_v20  ;;  %v616_v21 = vld [vmem:[%s5020_s2] sm:$0xff] }
  0x97   :  { %v537_v10 = vadd.f32 %v533_v63, %v522_v17 }
  0x98   :  { %v448_v47 = vadd.f32 %v444_v7, %v433_v18 }
  0x99   :  { %v552_v46 = vadd.f32 %v548_v31, %v537_v10 }
  0x9a   :  { %v463_v53 = vadd.f32 %v459_v37, %v448_v47 }
  0x9b   :  { %v4437_v42 = vadd.f32 %v563_v5, %v552_v46 }
  0x9c   :  { %v478_v13 = vadd.f32 %v474_v40, %v463_v53 }
  0x9d   :  { %v574_v41 = vsel %vm570_vm0, %v4437_v42, 0.0  ;;  %v584_v45 = vmul.f32 %v4437_v42, %v4437_v42 }
  0x9e   :  { %575 = vadd.xlane.f32.xlu0 %v574_v41  ;;  %v493_v12 = vadd.f32 %v489_v23, %v478_v13  ;;  %v618_v13 = vld [vmem:[%s5020_s2 + $0x10] sm:$0xff]  ;;  %s4046_s2 = smov 120  }
  0x9f   :  { %v590_v35 = vsel %vm570_vm0, %v584_v45, 0.0 }
  0xa0   :  { %591 = vadd.xlane.f32.xlu1 %v590_v35  ;;  %v508_v54 = vadd.f32 %v504_v44, %v493_v12 }
  0xa2   :  { %v523_v22 = vadd.f32 %v519_v28, %v508_v54  ;;  %v636_v28 = vld [vmem:[%s5021_s3] sm:$0xff]  ;;  %v637_v54 = vld [vmem:[%s5021_s3 + $0x8] sm:$0xff] }
  0xa4   :  { %v538_v0 = vadd.f32 %v534_v58, %v523_v22  ;;  %597 = vadd.xlane.f32.xlu1 %v596_v49  ;;  %v638_v22 = vld [vmem:[%s5021_s3 + $0x10] sm:$0xff] }
  0xa6   :  { %v553_v55 = vadd.f32 %v549_v48, %v538_v0 }
  0xa8   :  { %v4452_v59 = vadd.f32 %v564_v50, %v553_v55  ;;  %v639_v50 = vld [vmem:[%s5021_s3 + $0x18] sm:$0xff]  ;;  %s4036_s3 = smov 127  }
  0xaa   :  { %v577_v8 = vsel %vm570_vm0, %v4452_v59, 0.0  ;;  %v585_v61 = vmul.f32 %v4452_v59, %v4452_v59 }
  0xab   :  { %578 = vadd.xlane.f32.xlu0 %v577_v8 }
  0xac   :  { %v593_v9 = vsel %vm570_vm0, %v585_v61, 0.0  ;;  %vm1694_vm0 = vcmask 228352  }
  0xaf   :  { %594 = vadd.xlane.f32.xlu0 %v593_v9 }
 0x111   :  { %v582_v57 = vpop.xlane.xlu1 %581 }
 0x112   :  { %v603_v60 = vmul.f32 0.03125, %v582_v57 }
 0x114   :  { %v611_v31 = vmul.f32 %v603_v60, %v603_v60 }
 0x11f   :  { %v573_v24 = vpop.xlane.xlu0 %572 }
 0x120   :  { %v600_v34 = vmul.f32 0.03125, %v573_v24 }
 0x121   :  { %v589_v3 = vpop.xlane.xlu1 %588 }
 0x122   :  { %v608_v6 = vmul.f32 %v600_v34, %v600_v34  ;;  %v604_v56 = vmul.f32 0.03125, %v589_v3 }
 0x124   :  { %v612_v4 = vsub.f32 %v604_v56, %v608_v6 }
 0x126   :  { %v620_v51 = vmax.f32 %v612_v4, 0.0 }
 0x128   :  { %v624_v25 = vadd.f32 1e-05, %v620_v51 }
 0x12a   :  { %3936 = vrsqrt.f32 %v624_v25  ;;  %v3251_v25 = vld [vmem:[%s5022_s4] ss:$0 sm:$0xff]  ;;  %s4038_s4 = smov 122  }
 0x12b   :  { %v576_v38 = vpop.xlane.xlu0 %575 }
 0x12c   :  { %v601_v26 = vmul.f32 0.03125, %v576_v38 }
 0x12d   :  { %v592_v32 = vpop.xlane.xlu1 %591 }
 0x12e   :  { %v609_v16 = vmul.f32 %v601_v26, %v601_v26  ;;  %v605_v39 = vmul.f32 0.03125, %v592_v32 }
 0x130   :  { %v613_v11 = vsub.f32 %v605_v39, %v609_v16 }
 0x131   :  { %v598_v63 = vpop.xlane.xlu1 %597 }
 0x132   :  { %v621_v14 = vmax.f32 %v613_v11, 0.0  ;;  %v607_v7 = vmul.f32 0.03125, %v598_v63 }
 0x134   :  { %v625_v1 = vadd.f32 1e-05, %v621_v14  ;;  %v3937_v27 = vpop.eup %3936  ;;  %v615_v18 = vsub.f32 %v607_v7, %v611_v31 }
 0x135   :  { %v632_v20 = vmul.f32 %v3937_v27, %v616_v21 }
 0x136   :  { %3938 = vrsqrt.f32 %v625_v1  ;;  %v623_v47 = vmax.f32 %v615_v18, 0.0  ;;  %v3655_v18 = vld [vmem:[%s5023_s5 + $0x8] ss:$12 sps:$4 sm:$0xff]  }
 0x137   :  { %650 = vperm.xlu0 %3553, %v632_v20   ;;  %v640_v12 = vmul.f32 %v632_v20, %v600_v34  ;;  %3503 = vmatprep.mubr.msk.bf16.mxu1 %vm823_vm1, %v3655_v18 }
 0x138   :  { %v579_v17 = vpop.xlane.xlu0 %578  ;;  %v627_v23 = vadd.f32 1e-05, %v623_v47 }
 0x139   :  { %v602_v36 = vmul.f32 0.03125, %v579_v17  ;;  %v644_v35 = vsub.f32 %v636_v28, %v640_v12 }
 0x13b   :  { %v610_v10 = vmul.f32 %v602_v36, %v602_v36 }
 0x13c   :  { %v595_v37 = vpop.xlane.xlu0 %594 }
 0x13d   :  { %v606_v5 = vmul.f32 0.03125, %v595_v37  ;;  %v3658_v37 = vld [vmem:[%s5023_s5 + $0x4] ss:$12 sps:$4 sm:$0xff]  }
 0x13e   :  { %868 = vmatprep.mubr.bf16.mxu0 %v3658_v37 }
 0x13f   :  { %v614_v40 = vsub.f32 %v606_v5, %v610_v10  ;;  %v3659_v10 = vld [vmem:[%s5023_s5 + $0x20] ss:$12 sps:$4 sm:$0xff]   ;;  %v3663_v5 = vld [vmem:[%s5023_s5 + $0x38] ss:$12 sps:$4 sm:$0xff]  }
 0x140   :  { %v3939_v46 = vpop.eup %3938 }
 0x141   :  { %v622_v33 = vmax.f32 %v614_v40, 0.0  ;;  %v633_v53 = vmul.f32 %v3939_v46, %v617_v29  ;;  %v3666_v29 = vld [vmem:[%s5023_s5 + $0x50] ss:$12 sps:$4 sm:$0xff]  }
 0x143   :  { %v626_v19 = vadd.f32 1e-05, %v622_v33  ;;  %655 = vperm.xlu1 %3554, %v633_v53   ;;  %v641_v15 = vmul.f32 %v633_v53, %v601_v26 }
 0x145   :  { %3940 = vrsqrt.f32 %v626_v19  ;;  %v645_v58 = vsub.f32 %v637_v54, %v641_v15  ;;  %v3656_v19 = vld [vmem:[%s5023_s5] ss:$12 sps:$4 sm:$0xff]  }
 0x146   :  { %3942 = vrsqrt.f32 %v627_v23 }
 0x14f   :  { %v3941_v44 = vpop.eup %3940 }
 0x150   :  { %v634_v41 = vmul.f32 %v3941_v44, %v618_v13  ;;  %v3943_v45 = vpop.eup %3942  ;;  %v3660_v13 = vld [vmem:[%s5023_s5 + $0x1c] ss:$12 sps:$4 sm:$0xff]   ;;  %v3662_v44 = vld [vmem:[%s5023_s5 + $0x18] ss:$12 sps:$4 sm:$0xff]  }
 0x151   :  { %v635_v43 = vmul.f32 %v3943_v45, %v619_v52  ;;  %v3667_v45 = vld [vmem:[%s5023_s5 + $0x30] ss:$12 sps:$4 sm:$0xff]   ;;  %v3668_v52 = vld [vmem:[%s5023_s5 + $0x4c] ss:$12 sps:$4 sm:$0xff]  }
 0x152   :  { %660 = vperm.xlu1 %3554, %v634_v41   ;;  %v642_v49 = vmul.f32 %v634_v41, %v602_v36  ;;  %v3664_v41 = vld [vmem:[%s5023_s5 + $0x34] ss:$12 sps:$4 sm:$0xff]  }
 0x153   :  { %v643_v0 = vmul.f32 %v635_v43, %v603_v60 }
 0x154   :  { %v646_v48 = vsub.f32 %v638_v22, %v642_v49 }
 0x155   :  { %v647_v55 = vsub.f32 %v639_v50, %v643_v0 }
 0x156   :  { %665 = vperm.xlu1 %3554, %v635_v43   ;;  %v3670_v43 = vld [vmem:[%s5023_s5 + $0x48] ss:$12 sps:$4 sm:$0xff]   ;;  %s4042_s5 = smov 1  }
 0x15a   :  { %674 = vperm.xlu1 %3554, %v644_v35  }
 0x15e   :  { %679 = vperm.xlu1 %3554, %v645_v58  }
 0x162   :  { %684 = vperm.xlu1 %3554, %v646_v48  }
 0x166   :  { %689 = vperm.xlu1 %3554, %v647_v55  }
 0x1b6   :  { %v651_v9 = vpop.permute.xlu0 %650 }
 0x1b7   :  { %v668_v24 = vmul.f32 %v651_v9, %v4420_v2 }
 0x1c2   :  { %v656_v8 = vpop.permute.xlu1 %655 }
 0x1c3   :  { %v669_v6 = vmul.f32 %v656_v8, %v4437_v42 }
 0x1d1   :  { %v661_v61 = vpop.permute.xlu1 %660 }
 0x1d2   :  { %v670_v38 = vmul.f32 %v661_v61, %v4452_v59  ;;  %v966_v61 = vld [vmem:[%s5024_s6] sm:$0xff] }
 0x1d5   :  { %v666_v57 = vpop.permute.xlu1 %665 }
 0x1d6   :  { %v671_v2 = vmul.f32 %v666_v57, %v4392_v30 }
 0x1d9   :  { %v675_v34 = vpop.permute.xlu1 %674 }
 0x1da   :  { %v692_v3 = vadd.f32 %v675_v34, %v668_v24  ;;  %v967_v24 = vld [vmem:[%s5024_s6 + $0x8] sm:$0xff] }
 0x1dc   :  { %v696_v4 = vmax.f32 %v692_v3, 0.0 }
 0x1dd   :  { %v680_v56 = vpop.permute.xlu1 %679 }
 0x1de   :  { %v693_v51 = vadd.f32 %v680_v56, %v669_v6  ;;  %v707_v16 = vmul.f32 %v3251_v25, %v696_v4 }
 0x1e0   :  { %v697_v26 = vmax.f32 %v693_v51, 0.0 }
 0x1e1   :  { %v685_v32 = vpop.permute.xlu1 %684 }
 0x1e2   :  { %v708_v39 = vmul.f32 %v3251_v25, %v697_v26  ;;  %v694_v11 = vadd.f32 %v685_v32, %v670_v38 }
 0x1e4   :  { %v711_v14 = vpack.c.bf16 %v708_v39, %v707_v16  ;;  %v698_v1 = vmax.f32 %v694_v11, 0.0  ;;  %v968_v11 = vld [vmem:[%s5024_s6 + $0x10] sm:$0xff] }
 0x1e5   :  { %v690_v21 = vpop.permute.xlu1 %689 }
 0x1e6   :  { %v695_v42 = vadd.f32 %v690_v21, %v671_v2  ;;  %715 = vrot.lane.b32.xlu0 %v711_v14, %s4036_s3  ;;  %723 = vrot.lane.b32.xlu1 %v711_v14, %s4037_s0  ;;  %v709_v27 = vmul.f32 %v3251_v25, %v698_v1  ;;  %v969_v1 = vld [vmem:[%s5024_s6 + $0x18] sm:$0xff] }
 0x1e8   :  { %v699_v63 = vmax.f32 %v695_v42, 0.0 }
 0x1ea   :  { %v710_v59 = vmul.f32 %v3251_v25, %v699_v63 }
 0x1ec   :  { %v712_v60 = vpack.c.bf16 %v710_v59, %v709_v27 }
 0x1ee   :  { %717 = vrot.lane.b32.xlu0 %v712_v60, %s4036_s3  ;;  %725 = vrot.lane.b32.xlu1 %v712_v60, %s4037_s0 }
 0x1f2   :  { %721 = vrot.lane.b32.xlu0 %v712_v60, %s4038_s4  ;;  %719 = vrot.lane.b32.xlu1 %v711_v14, %s4038_s4  ;;  %s4051_s4 = smov 17  }
 0x258   :  { %v716_v30 = vpop.permute.xlu0 %715  ;;  %v724_v20 = vpop.permute.xlu1 %723 }
 0x259   :  { %803 = vrot.lane.b32.xlu0 %v716_v30, %s4037_s0  ;;  %3453 = vmatprep.subr.bf16.mxu0 %v724_v20 }
 0x25a   :  { %3499 = vmatprep.subr.bf16.mxu1 %v724_v20  ;;  %811 = vrot.lane.b32.xlu1 %v724_v20, %s4037_s0 }
 0x25b   :  { %3454 = vmatpush3.bf16.msra.mxu0 %v724_v20  ;;  %3500 = vmatpush3.bf16.msra.mxu1 %v724_v20 }
 0x260   :  { %v718_v7 = vpop.permute.xlu0 %717  ;;  %v726_v17 = vpop.permute.xlu1 %725 }
 0x261   :  { %805 = vrot.lane.b32.xlu0 %v718_v7, %s4037_s0  ;;  %3455 = vmatprep.subr.bf16.mxu0 %v726_v17 }
 0x262   :  { %3501 = vmatprep.subr.bf16.mxu1 %v726_v17  ;;  %813 = vrot.lane.b32.xlu1 %v726_v17, %s4037_s0 }
 0x263   :  { %3456 = vmatpush3.bf16.msra.mxu0 %v726_v17  ;;  %3502 = vmatpush3.bf16.msra.mxu1 %v726_v17 }
 0x264   :  { %v722_v31 = vpop.permute.xlu0 %721  ;;  %v720_v36 = vpop.permute.xlu1 %719 }
 0x265   :  { %809 = vrot.lane.b32.xlu0 %v722_v31, %s4037_s0 }
 0x266   :  { %807 = vrot.lane.b32.xlu1 %v720_v36, %s4037_s0  ;;  %3504 = vmatmul.mubr.msk.bf16.vlgmr.msra.gmra.mrb[0].mxu1 %vm823_vm1, %v3659_v10  ;;  %v970_v10 = vld [vmem:[%s5024_s6 + $0x20] sm:$0xff] }
 0x267   :  { %3507 = vmatprep.mubr.msk.bf16.mxu1 %vm823_vm1, %v3663_v5 }
 0x26e   :  { %3508 = vmatmul.mubr.msk.bf16.gmra.mrb[4].mxu1 %vm823_vm1, %v3666_v29  ;;  %vm1704_vm1 = vcmask 343040  }
 0x2cb   :  { %v804_v47 = vpop.permute.xlu0 %803 }
 0x2cc   :  { %v812_v40 = vpop.permute.xlu1 %811 }
 0x2cd   :  { %3457 = vmatprep.subr.bf16.mxu0 %v812_v40 }
 0x2ce   :  { %3458 = vmatpush3.bf16.msra.mxu0 %v804_v47 }
 0x2d3   :  { %v806_v46 = vpop.permute.xlu0 %805 }
 0x2d4   :  { %v814_v33 = vpop.permute.xlu1 %813 }
 0x2d5   :  { %3459 = vmatprep.subr.bf16.mxu0 %v814_v33 }
 0x2d6   :  { %3460 = vmatpush3.bf16.msra.mxu0 %v806_v46 }
 0x2d7   :  { %v810_v23 = vpop.permute.xlu0 %809 }
 0x2d8   :  { %v808_v53 = vpop.permute.xlu1 %807 }
 0x2d9   :  { %3461 = vmatprep.subr.bf16.mxu0 %v808_v53 }
 0x2da   :  { %3462 = vmatpush3.bf16.msra.mxu0 %v724_v20 }
 0x2db   :  { %3463 = vmatprep.subr.bf16.mxu0 %v810_v23 }
 0x2de   :  { %3464 = vmatpush3.bf16.msra.mxu0 %v726_v17 }
 0x2df   :  { %3465 = vmatprep.subr.bf16.mxu0 %v804_v47  ;;  %v971_v47 = vld [vmem:[%s5024_s6 + $0x28] sm:$0xff] }
 0x2e2   :  { %3466 = vmatpush3.bf16.msra.mxu0 %v808_v53 }
 0x2e3   :  { %3467 = vmatprep.subr.bf16.mxu0 %v806_v46 }
 0x2e6   :  { %3468 = vmatpush3.bf16.msra.mxu0 %v810_v23 }
 0x2e9   :  { %869 = vmatmul.mubr.bf16.vlgmr.msra.gmra.mrb[0].mxu0 %v3656_v19 }
 0x2ea   :  { %876 = vmatprep.mubr.bf16.mxu0 %v3660_v13 }
 0x2f1   :  { %877 = vmatmul.mubr.bf16.gmra.mrb[4].mxu0 %v3662_v44 }
 0x2f2   :  { %884 = vmatprep.mubr.bf16.mxu0 %v3664_v41 }
 0x2f9   :  { %885 = vmatmul.mubr.bf16.gmra.mrb[8].mxu0 %v3667_v45 }
 0x2fa   :  { %892 = vmatprep.mubr.bf16.mxu0 %v3668_v52 }
 0x301   :  { %893 = vmatmul.mubr.bf16.gmra.mrb[12].mxu0 %v3670_v43 }
 0x339   :  { %v3505_v12 = vpop.f32.mrb[0].mxu1 }
 0x33a   :  { %v935_v28 = vpop.f32.mrb[1].mxu1 }
 0x33b   :  { %v3506_v35 = vpop.f32.mrb[2].mxu1 }
 0x33c   :  { %v938_v15 = vpop.f32.mrb[3].mxu1 }
 0x341   :  { %v4538_v54 = vpop.f32.mrb[4].mxu1 }
 0x342   :  { %v951_v58 = vpop.f32.mrb[5].mxu1 }
 0x343   :  { %v4540_v49 = vpop.f32.mrb[6].mxu1 }
 0x344   :  { %v954_v22 = vpop.f32.mrb[7].mxu1 }
 0x3bc   :  { %v3469_v48 = vpop.f32.mrb[0].mxu0 }
 0x3bd   :  { %v3470_v0 = vpop.f32.mrb[1].mxu0 }
 0x3be   :  { %v3471_v50 = vadd.f32 %v3470_v0, %v3469_v48  ;;  %v3472_v55 = vpop.f32.mrb[2].mxu0 }
 0x3bf   :  { %v3473_v8 = vpop.f32.mrb[3].mxu0 }
 0x3c0   :  { %v4545_v9 = vadd.f32 %v3471_v50, %v935_v28  ;;  %v3474_v57 = vadd.f32 %v3473_v8, %v3472_v55 }
 0x3c2   :  { %v4550_v34 = vadd.f32 %v3474_v57, %v938_v15  ;;  %v974_v3 = vmul.f32 %v966_v61, %v4545_v9 }
 0x3c4   :  { %v3475_v6 = vpop.f32.mrb[4].mxu0  ;;  %v983_v56 = vsel %vm982_vm2, %v974_v3, 0.0  ;;  %v975_v4 = vmul.f32 %v967_v24, %v4550_v34  ;;  %v1007_v16 = vmul.f32 %v974_v3, %v4545_v9 }
 0x3c5   :  { %v3476_v51 = vpop.f32.mrb[5].mxu0  ;;  %984 = vadd.xlane.f32.xlu1 %v983_v56 }
 0x3c6   :  { %v3477_v25 = vadd.f32 %v3476_v51, %v3475_v6  ;;  %v3478_v38 = vpop.f32.mrb[6].mxu0  ;;  %v986_v26 = vsel %vm982_vm2, %v975_v4, 0.0  ;;  %v1008_v32 = vmul.f32 %v975_v4, %v4550_v34  ;;  %v1015_v63 = vsel %vm982_vm2, %v1007_v16, 0.0 }
 0x3c7   :  { %v3479_v39 = vpop.f32.mrb[7].mxu0  ;;  %987 = vadd.xlane.f32.xlu0 %v986_v26 }
 0x3c8   :  { %v4561_v2 = vadd.f32 %v3505_v12, %v3477_v25  ;;  %v3480_v14 = vadd.f32 %v3479_v39, %v3478_v38  ;;  %v1018_v21 = vsel %vm982_vm2, %v1008_v32, 0.0 }
 0x3c9   :  { %1019 = vadd.xlane.f32.xlu1 %v1018_v21 }
 0x3ca   :  { %v4567_v42 = vadd.f32 %v3506_v35, %v3480_v14  ;;  %v976_v27 = vmul.f32 %v968_v11, %v4561_v2  ;;  %v972_v35 = vld [vmem:[%s5024_s6 + $0x30] sm:$0xff] }
 0x3cb   :  { %1016 = vadd.xlane.f32.xlu0 %v1015_v63 }
 0x3cc   :  { %v3481_v59 = vpop.f32.mrb[8].mxu0  ;;  %v977_v60 = vmul.f32 %v969_v1, %v4567_v42  ;;  %v989_v20 = vsel %vm982_vm2, %v976_v27, 0.0  ;;  %v1009_v36 = vmul.f32 %v976_v27, %v4561_v2 }
 0x3cd   :  { %v3482_v30 = vpop.f32.mrb[9].mxu0 }
 0x3ce   :  { %v3483_v7 = vadd.f32 %v3482_v30, %v3481_v59  ;;  %v3484_v17 = vpop.f32.mrb[10].mxu0  ;;  %v992_v31 = vsel %vm982_vm2, %v977_v60, 0.0  ;;  %v1010_v18 = vmul.f32 %v977_v60, %v4567_v42  ;;  %v1021_v46 = vsel %vm982_vm2, %v1009_v36, 0.0 }
 0x3cf   :  { %v3485_v37 = vpop.f32.mrb[11].mxu0  ;;  %990 = vadd.xlane.f32.xlu0 %v989_v20  ;;  %993 = vadd.xlane.f32.xlu1 %v992_v31 }
 0x3d0   :  { %v4579_v5 = vadd.f32 %v3483_v7, %v951_v58  ;;  %v3486_v29 = vadd.f32 %v3485_v37, %v3484_v17  ;;  %v1024_v33 = vsel %vm982_vm2, %v1010_v18, 0.0 }
 0x3d2   :  { %v4584_v40 = vadd.f32 %v3486_v29, %v954_v22  ;;  %v978_v53 = vmul.f32 %v970_v10, %v4579_v5  ;;  %v973_v22 = vld [vmem:[%s5024_s6 + $0x38] sm:$0xff] }
 0x3d3   :  { %1022 = vadd.xlane.f32.xlu0 %v1021_v46  ;;  %1025 = vadd.xlane.f32.xlu1 %v1024_v33 }
 0x3d4   :  { %v3487_v23 = vpop.f32.mrb[12].mxu0  ;;  %v979_v19 = vmul.f32 %v971_v47, %v4584_v40  ;;  %v995_v44 = vsel %vm982_vm2, %v978_v53, 0.0  ;;  %v1011_v43 = vmul.f32 %v978_v53, %v4579_v5 }
 0x3d5   :  { %v3488_v13 = vpop.f32.mrb[13].mxu0 }
 0x3d6   :  { %v3489_v41 = vadd.f32 %v3488_v13, %v3487_v23  ;;  %v3490_v45 = vpop.f32.mrb[14].mxu0  ;;  %v998_v52 = vsel %vm982_vm2, %v979_v19, 0.0  ;;  %v1012_v12 = vmul.f32 %v979_v19, %v4584_v40  ;;  %v1027_v0 = vsel %vm982_vm2, %v1011_v43, 0.0 }
 0x3d7   :  { %v3491_v28 = vpop.f32.mrb[15].mxu0  ;;  %996 = vadd.xlane.f32.xlu0 %v995_v44  ;;  %999 = vadd.xlane.f32.xlu1 %v998_v52 }
 0x3d8   :  { %v4598_v15 = vadd.f32 %v4538_v54, %v3489_v41  ;;  %v3492_v58 = vadd.f32 %v3491_v28, %v3490_v45  ;;  %v1030_v50 = vsel %vm982_vm2, %v1012_v12, 0.0  ;;  %v1060_v12 = vld [vmem:[%s5026_s8] sm:$0xff]  ;;  %v1061_v28 = vld [vmem:[%s5026_s8 + $0x8] sm:$0xff]  ;;  %s4045_s8 = smov 119  }
 0x3da   :  { %v4604_v48 = vadd.f32 %v4540_v49, %v3492_v58  ;;  %v980_v55 = vmul.f32 %v972_v35, %v4598_v15 }
 0x3db   :  { %1028 = vadd.xlane.f32.xlu0 %v1027_v0  ;;  %1031 = vadd.xlane.f32.xlu1 %v1030_v50  ;;  %v1070_v50 = vld [vmem:[%s5027_s9] sm:$0xff] }
 0x3dc   :  { %v981_v8 = vmul.f32 %v973_v22, %v4604_v48  ;;  %v1001_v54 = vsel %vm982_vm2, %v980_v55, 0.0  ;;  %v1013_v57 = vmul.f32 %v980_v55, %v4598_v15 }
 0x3de   :  { %v1004_v61 = vsel %vm982_vm2, %v981_v8, 0.0  ;;  %v1014_v24 = vmul.f32 %v981_v8, %v4604_v48  ;;  %v1033_v49 = vsel %vm982_vm2, %v1013_v57, 0.0  ;;  %v1071_v8 = vld [vmem:[%s5027_s9 + $0x8] sm:$0xff]  ;;  %s4050_s9 = smov 28  }
 0x3df   :  { %1002 = vadd.xlane.f32.xlu0 %v1001_v54  ;;  %1005 = vadd.xlane.f32.xlu1 %v1004_v61 }
 0x3e0   :  { %v1036_v3 = vsel %vm982_vm2, %v1014_v24, 0.0  ;;  %v3671_v24 = vld [vmem:[%s5025_s7] ss:$8 sps:$4 sm:$0xff]  }
 0x3e3   :  { %1034 = vadd.xlane.f32.xlu0 %v1033_v49  ;;  %1037 = vadd.xlane.f32.xlu1 %v1036_v3  ;;  %v3673_v49 = vld [vmem:[%s5025_s7 + $0x4] ss:$8 sps:$4 sm:$0xff]   ;;  %v3676_v3 = vld [vmem:[%s5025_s7 + $0x14] ss:$8 sps:$4 sm:$0xff]  }
 0x3e4   :  { %1339 = vmatprep.subr.bf16.mxu1 %v3673_v49 }
 0x3e5   :  { %1340 = vmatpush1.bf16.msra.mxu1 %v3671_v24 }
 0x3e6   :  { %1341 = vmatprep.subr.bf16.mxu1 %v3676_v3 }
 0x452   :  { %v985_v6 = vpop.xlane.xlu1 %984 }
 0x454   :  { %v988_v56 = vpop.xlane.xlu0 %987 }
 0x456   :  { %v1020_v4 = vpop.xlane.xlu1 %1019 }
 0x458   :  { %v1017_v51 = vpop.xlane.xlu0 %1016 }
 0x45c   :  { %v991_v25 = vpop.xlane.xlu0 %990  ;;  %v994_v38 = vpop.xlane.xlu1 %993 }
 0x45d   :  { %v1039_v21 = vadd.f32 %v991_v25, %v985_v6  ;;  %v1040_v1 = vadd.f32 %v994_v38, %v988_v56  ;;  %v3674_v6 = vld [vmem:[%s5025_s7 + $0x10] ss:$8 sps:$4 sm:$0xff]   ;;  %v3679_v56 = vld [vmem:[%s5025_s7 + $0x24] ss:$8 sps:$4 sm:$0xff]  }
 0x45e   :  { %1342 = vmatpush1.bf16.msra.mxu1 %v3674_v6  ;;  %v3680_v25 = vld [vmem:[%s5025_s7 + $0x30] ss:$8 sps:$4 sm:$0xff]   ;;  %v3685_v38 = vld [vmem:[%s5025_s7 + $0x44] ss:$8 sps:$4 sm:$0xff]  }
 0x45f   :  { %1343 = vmatprep.subr.bf16.mxu1 %v3679_v56 }
 0x460   :  { %v1023_v26 = vpop.xlane.xlu0 %1022  ;;  %v1026_v32 = vpop.xlane.xlu1 %1025 }
 0x461   :  { %v1045_v30 = vadd.f32 %v1023_v26, %v1017_v51  ;;  %v1046_v20 = vadd.f32 %v1026_v32, %v1020_v4  ;;  %v3677_v4 = vld [vmem:[%s5025_s7 + $0x20] ss:$8 sps:$4 sm:$0xff]   ;;  %v3682_v51 = vld [vmem:[%s5025_s7 + $0x34] ss:$8 sps:$4 sm:$0xff]  }
 0x462   :  { %1344 = vmatpush1.bf16.msra.mxu1 %v3677_v4  ;;  %v3683_v26 = vld [vmem:[%s5025_s7 + $0x40] ss:$8 sps:$4 sm:$0xff]   ;;  %v3688_v32 = vld [vmem:[%s5025_s7 + $0x54] ss:$8 sps:$4 sm:$0xff]  }
 0x463   :  { %1345 = vmatprep.subr.bf16.mxu1 %v3682_v51 }
 0x464   :  { %v997_v16 = vpop.xlane.xlu0 %996  ;;  %v1000_v39 = vpop.xlane.xlu1 %999 }
 0x465   :  { %v1041_v63 = vadd.f32 %v1039_v21, %v997_v16  ;;  %v1042_v27 = vadd.f32 %v1040_v1, %v1000_v39  ;;  %v3686_v16 = vld [vmem:[%s5025_s7 + $0x50] ss:$8 sps:$4 sm:$0xff]   ;;  %v3691_v39 = vld [vmem:[%s5025_s7 + $0x64] ss:$8 sps:$4 sm:$0xff]  }
 0x466   :  { %1346 = vmatpush1.bf16.msra.mxu1 %v3680_v25  ;;  %v3692_v21 = vld [vmem:[%s5025_s7 + $0x70] ss:$8 sps:$4 sm:$0xff]   ;;  %v3697_v1 = vld [vmem:[%s5025_s7 + $0x84] ss:$8 sps:$4 sm:$0xff]  }
 0x467   :  { %1347 = vmatprep.subr.bf16.mxu1 %v3685_v38 }
 0x468   :  { %v1029_v11 = vpop.xlane.xlu0 %1028  ;;  %v1032_v14 = vpop.xlane.xlu1 %1031 }
 0x469   :  { %v1047_v31 = vadd.f32 %v1045_v30, %v1029_v11  ;;  %v1048_v36 = vadd.f32 %v1046_v20, %v1032_v14  ;;  %v3689_v11 = vld [vmem:[%s5025_s7 + $0x60] ss:$8 sps:$4 sm:$0xff]   ;;  %v3694_v14 = vld [vmem:[%s5025_s7 + $0x74] ss:$8 sps:$4 sm:$0xff]  }
 0x46a   :  { %1348 = vmatpush1.bf16.msra.mxu1 %v3683_v26  ;;  %v3701_v30 = vld [vmem:[%s5025_s7 + $0xa0] ss:$8 sps:$4 sm:$0xff]   ;;  %v3706_v20 = vld [vmem:[%s5025_s7 + $0xb4] ss:$8 sps:$4 sm:$0xff]  }
 0x46b   :  { %1349 = vmatprep.subr.bf16.mxu1 %v3688_v32 }
 0x46c   :  { %v1003_v59 = vpop.xlane.xlu0 %1002  ;;  %v1006_v60 = vpop.xlane.xlu1 %1005 }
 0x46d   :  { %v1043_v7 = vadd.f32 %v1041_v63, %v1003_v59  ;;  %v1044_v17 = vadd.f32 %v1042_v27, %v1006_v60  ;;  %v3695_v63 = vld [vmem:[%s5025_s7 + $0x80] ss:$8 sps:$4 sm:$0xff]   ;;  %v3700_v27 = vld [vmem:[%s5025_s7 + $0x94] ss:$8 sps:$4 sm:$0xff]   ;;  %v3698_v59 = vld [vmem:[%s5025_s7 + $0x90] ss:$8 sps:$4 sm:$0xff]  }
 0x46e   :  { %1350 = vmatpush1.bf16.msra.mxu1 %v3686_v16  ;;  %v3703_v60 = vld [vmem:[%s5025_s7 + $0xa4] ss:$8 sps:$4 sm:$0xff]  }
 0x46f   :  { %v1052_v18 = vmul.f32 0.010204081, %v1043_v7  ;;  %v1053_v37 = vmul.f32 0.010204081, %v1044_v17  ;;  %1351 = vmatprep.subr.bf16.mxu1 %v3691_v39  ;;  %v3704_v7 = vld [vmem:[%s5025_s7 + $0xb0] ss:$8 sps:$4 sm:$0xff]  }
 0x470   :  { %v1035_v10 = vpop.xlane.xlu0 %1034  ;;  %v1038_v29 = vpop.xlane.xlu1 %1037  ;;  %v3709_v17 = vld [vmem:[%s5025_s7 + $0xc4] ss:$8 sps:$4 sm:$0xff]  }
 0x471   :  { %v1049_v47 = vadd.f32 %v1047_v31, %v1035_v10  ;;  %v1050_v46 = vadd.f32 %v1048_v36, %v1038_v29  ;;  %v1056_v33 = vmul.f32 %v1052_v18, %v1052_v18  ;;  %v1057_v53 = vmul.f32 %v1053_v37, %v1053_v37  ;;  %v3707_v31 = vld [vmem:[%s5025_s7 + $0xc0] ss:$8 sps:$4 sm:$0xff]   ;;  %v3710_v10 = vld [vmem:[%s5025_s7 + $0xd0] ss:$8 sps:$4 sm:$0xff]  }
 0x472   :  { %1352 = vmatpush1.bf16.msra.mxu1 %v3689_v11  ;;  %v1182_v29 = vld [vmem:[%s5025_s7 + $0xe0] sm:$0xff] }
 0x473   :  { %v1054_v23 = vmul.f32 0.010204081, %v1049_v47  ;;  %v1055_v19 = vmul.f32 0.010204081, %v1050_v46  ;;  %1353 = vmatprep.subr.bf16.mxu1 %v3694_v14 }
 0x475   :  { %v1058_v13 = vsub.f32 %v1054_v23, %v1056_v33  ;;  %v1059_v44 = vsub.f32 %v1055_v19, %v1057_v53  ;;  %v3297_v53 = vcombine.high %v1182_v29, %v1182_v29 }
 0x476   :  { %1354 = vmatpush1.bf16.msra.mxu1 %v3692_v21 }
 0x477   :  { %v1062_v41 = vmax.f32 %v1058_v13, 0.0  ;;  %v1063_v45 = vmax.f32 %v1059_v44, 0.0  ;;  %1355 = vmatprep.subr.bf16.mxu1 %v3697_v1 }
 0x479   :  { %v1064_v52 = vadd.f32 1e-05, %v1062_v41  ;;  %v1065_v43 = vadd.f32 1e-05, %v1063_v45 }
 0x47a   :  { %1356 = vmatpush1.bf16.msra.mxu1 %v3695_v63 }
 0x47b   :  { %3944 = vrsqrt.f32 %v1064_v52  ;;  %1357 = vmatprep.subr.bf16.mxu1 %v3700_v27 }
 0x47c   :  { %3946 = vrsqrt.f32 %v1065_v43  ;;  %v3296_v43 = vcombine.low %v1182_v29, %v1182_v29 }
 0x47e   :  { %1358 = vmatpush1.bf16.msra.mxu1 %v3698_v59 }
 0x47f   :  { %1359 = vmatprep.subr.bf16.mxu1 %v3703_v60 }
 0x482   :  { %1360 = vmatpush1.bf16.msra.mxu1 %v3701_v30 }
 0x483   :  { %1361 = vmatprep.subr.bf16.mxu1 %v3706_v20 }
 0x485   :  { %v3945_v35 = vpop.eup %3944 }
 0x486   :  { %v3947_v58 = vpop.eup %3946  ;;  %v1068_v22 = vmul.f32 %v3945_v35, %v1060_v12  ;;  %1362 = vmatpush1.bf16.msra.mxu1 %v3704_v7 }
 0x487   :  { %v1069_v0 = vmul.f32 %v3947_v58, %v1061_v28  ;;  %1363 = vmatprep.subr.bf16.mxu1 %v3709_v17 }
 0x488   :  { %1078 = vperm.xlu0 %3553, %v1068_v22   ;;  %v1072_v55 = vmul.f32 %v1068_v22, %v1052_v18  ;;  %v3712_v18 = vld [vmem:[%s5025_s7 + $0xd4] ss:$8 sps:$4 sm:$0xff]   ;;  %s4039_s7 = smov 116  }
 0x489   :  { %1083 = vperm.xlu1 %3554, %v1069_v0   ;;  %v1073_v54 = vmul.f32 %v1069_v0, %v1053_v37 }
 0x48a   :  { %v1074_v61 = vsub.f32 %v1070_v50, %v1072_v55  ;;  %1364 = vmatpush1.bf16.msra.mxu1 %v3707_v31 }
 0x48b   :  { %v1075_v57 = vsub.f32 %v1071_v8, %v1073_v54  ;;  %1365 = vmatprep.subr.bf16.mxu1 %v3712_v18 }
 0x48d   :  { %1096 = vperm.xlu1 %3554, %v1074_v61   ;;  %1101 = vperm.xlu0 %3553, %v1075_v57  }
 0x48e   :  { %1366 = vmatpush1.bf16.msra.mxu1 %v3710_v10 }
 0x48f   :  { %3298 = vmatprep.subr.msk.bf16.mxu1 %vm1332_vm3, %v3297_v53 }
 0x507   :  { %v1079_v36 = vpop.permute.xlu0 %1078 }
 0x508   :  { %v1084_v37 = vpop.permute.xlu1 %1083  ;;  %v1088_v47 = vmul.f32 %v1079_v36, %v4561_v2  ;;  %v1090_v46 = vmul.f32 %v1079_v36, %v4579_v5  ;;  %v1092_v33 = vmul.f32 %v1079_v36, %v4598_v15  ;;  %v1086_v8 = vmul.f32 %v1079_v36, %v4545_v9 }
 0x509   :  { %v1089_v23 = vmul.f32 %v1084_v37, %v4567_v42  ;;  %v1091_v19 = vmul.f32 %v1084_v37, %v4584_v40  ;;  %v1093_v13 = vmul.f32 %v1084_v37, %v4604_v48  ;;  %v1334_v40 = vsel %vm1332_vm3, %v3296_v43, 0 }
 0x50a   :  { %1368 = vmatpush1.bf16.msra.mxu1 %v1334_v40  ;;  %v1087_v54 = vmul.f32 %v1084_v37, %v4550_v34 }
 0x50c   :  { %v1097_v44 = vpop.permute.xlu1 %1096  ;;  %v1102_v41 = vpop.permute.xlu0 %1101 }
 0x50d   :  { %v1106_v45 = vadd.f32 %v1097_v44, %v1088_v47  ;;  %v1108_v52 = vadd.f32 %v1097_v44, %v1090_v46  ;;  %v1110_v2 = vadd.f32 %v1097_v44, %v1092_v33  ;;  %v1107_v12 = vadd.f32 %v1102_v41, %v1089_v23 }
 0x50e   :  { %v1109_v5 = vadd.f32 %v1102_v41, %v1091_v19  ;;  %v1111_v28 = vadd.f32 %v1102_v41, %v1093_v13  ;;  %v1104_v61 = vadd.f32 %v1097_v44, %v1086_v8  ;;  %v1105_v57 = vadd.f32 %v1102_v41, %v1087_v54 }
 0x50f   :  { %v1116_v15 = vmax.f32 %v1108_v52, 0.0  ;;  %v1114_v35 = vmax.f32 %v1106_v45, 0.0  ;;  %v1115_v42 = vmax.f32 %v1107_v12, 0.0  ;;  %v1118_v0 = vmax.f32 %v1110_v2, 0.0 }
 0x510   :  { %v1117_v58 = vmax.f32 %v1109_v5, 0.0  ;;  %v1119_v50 = vmax.f32 %v1111_v28, 0.0  ;;  %v1112_v24 = vmax.f32 %v1104_v61, 0.0  ;;  %v1113_v49 = vmax.f32 %v1105_v57, 0.0 }
 0x511   :  { %v3555_v48 = vpack.i.bf16 %v1115_v42, %v1114_v35 }
 0x512   :  { %v3560_v22 = vpack.i.bf16 %v1117_v58, %v1116_v15  ;;  %v3565_v55 = vpack.i.bf16 %v1119_v50, %v1118_v0  ;;  %v3717_v15 = vld [vmem:[%s5028_s10 + $0x4] ss:$8 sps:$4 sm:$0xff]  }
 0x513   :  { %3556 = vrot.lane.b32.xlu1 %v3555_v48, %s4040_s1  ;;  %1548 = vmatprep.mubr.bf16.mxu0 %v3717_v15 }
 0x514   :  { %3561 = vrot.lane.b32.xlu0 %v3560_v22, %s4039_s7 }
 0x517   :  { %3566 = vrot.lane.b32.xlu1 %v3565_v55, %s4041_s22 }
 0x585   :  { %v3557_v6 = vpop.permute.xlu1 %3556 }
 0x586   :  { %v3562_v3 = vpop.permute.xlu0 %3561  ;;  %v3559_v51 = vunpack.i.h.bf16 %v3557_v6  ;;  %v3558_v25 = vunpack.i.l.bf16 %v3557_v6 }
 0x587   :  { %v3564_v56 = vunpack.i.h.bf16 %v3562_v3  ;;  %v3563_v4 = vunpack.i.l.bf16 %v3562_v3 }
 0x588   :  { %v1144_v38 = vsel %vm982_vm2, %v1112_v24, %v3558_v25  ;;  %v1145_v26 = vsel %vm982_vm2, %v1113_v49, %v3559_v51  ;;  %vm2568_vm2 = vcmask 457728  }
 0x589   :  { %v1147_v32 = vsel %vm1146_vm4, %v1144_v38, %v3563_v4  ;;  %v1148_v16 = vsel %vm1146_vm4, %v1145_v26, %v3564_v56  ;;  %v3567_v9 = vpop.permute.xlu1 %3566  ;;  %vm2858_vm4 = vcmask 130048  }
 0x58a   :  { %v1152_v34 = vpack.c.bf16 %v1148_v16, %v1147_v32  ;;  %v3569_v39 = vunpack.i.h.bf16 %v3567_v9  ;;  %v3568_v11 = vunpack.i.l.bf16 %v3567_v9  ;;  %v3715_v16 = vld [vmem:[%s5028_s10] ss:$8 sps:$4 sm:$0xff]   ;;  %v3718_v9 = vld [vmem:[%s5028_s10 + $0x14] ss:$8 sps:$4 sm:$0xff]  }
 0x58c   :  { %v1151_v14 = vsel %vm1149_vm5, %v3564_v56, %v3569_v39  ;;  %v1150_v21 = vsel %vm1149_vm5, %v3563_v4, %v3568_v11  ;;  %v1569_v39 = vld [vmem:[%s5029_s11] sm:$0xff]  ;;  %v1570_v11 = vld [vmem:[%s5029_s11 + $0x8] sm:$0xff]  ;;  %vm2906_vm5 = vcmask 121856  }
 0x58d   :  { %v1153_v1 = vpack.c.bf16 %v1151_v14, %v1150_v21  ;;  %v1571_v21 = vld [vmem:[%s5029_s11 + $0x10] sm:$0xff] }
 0x58f   :  { %3299 = vmatprep.mubr.msk.bf16.mxu1 %vm1328_vm6, %v1153_v1  ;;  %vm2938_vm6 = vcmask 924672  }
 0x590   :  { %1372 = vmatmul.mubr.bf16.vlgmr.msra.gmra.mrb[8].mxu1 %v1152_v34  ;;  %v3720_v34 = vld [vmem:[%s5028_s10 + $0x10] ss:$8 sps:$4 sm:$0xff]  }
 0x663   :  { %v1373_v63 = vpop.f32.mrb[8].mxu1 }
 0x664   :  { %v1375_v27 = vpop.f32.mrb[9].mxu1 }
 0x665   :  { %v1377_v59 = vpop.f32.mrb[10].mxu1 }
 0x666   :  { %v1382_v60 = vpack.c.bf16 %v1377_v59, %v1373_v63  ;;  %v1379_v30 = vpop.f32.mrb[11].mxu1  ;;  %v1572_v63 = vld [vmem:[%s5029_s11 + $0x18] sm:$0xff] }
 0x667   :  { %v1383_v20 = vpack.c.bf16 %v1379_v30, %v1375_v27 }
 0x668   :  { %1386 = vrot.lane.b32.xlu0 %v1382_v60, %s4042_s5 }
 0x669   :  { %1388 = vrot.lane.b32.xlu1 %v1383_v20, %s4042_s5 }
 0x66c   :  { %1392 = vrot.lane.b32.xlu0 %v1382_v60, %s4043_s24 }
 0x66d   :  { %1394 = vrot.lane.b32.xlu1 %v1383_v20, %s4043_s24 }
 0x670   :  { %1398 = vrot.lane.b32.xlu0 %v1382_v60, %s4044_s25 }
 0x671   :  { %1400 = vrot.lane.b32.xlu1 %v1383_v20, %s4044_s25 }
 0x674   :  { %1404 = vrot.lane.b32.xlu0 %v1382_v60, %s4036_s3 }
 0x675   :  { %1406 = vrot.lane.b32.xlu1 %v1383_v20, %s4036_s3 }
 0x678   :  { %1410 = vrot.lane.b32.xlu0 %v1382_v60, %s4031_s23 }
 0x679   :  { %1412 = vrot.lane.b32.xlu1 %v1383_v20, %s4031_s23 }
 0x67c   :  { %1416 = vrot.lane.b32.xlu0 %v1382_v60, %s4045_s8 }
 0x67d   :  { %1418 = vrot.lane.b32.xlu1 %v1383_v20, %s4045_s8 }
 0x680   :  { %1422 = vrot.lane.b32.xlu0 %v1382_v60, %s4046_s2 }
 0x681   :  { %1424 = vrot.lane.b32.xlu1 %v1383_v20, %s4046_s2 }
 0x684   :  { %1428 = vrot.lane.b32.xlu0 %v1382_v60, %s4047_s26 }
 0x685   :  { %1430 = vrot.lane.b32.xlu1 %v1383_v20, %s4047_s26 }
 0x6da   :  { %v1387_v7 = vpop.permute.xlu0 %1386 }
 0x6db   :  { %1458 = vrot.lane.b32.xlu0 %v1387_v7, %s4047_s26  ;;  %v1389_v17 = vpop.permute.xlu1 %1388 }
 0x6dc   :  { %v1391_v31 = vsel %vm1390_vm7, %v1387_v7, %v1389_v17 }
 0x6dd   :  { %1460 = vrot.lane.b32.xlu1 %v1391_v31, %s4047_s26 }
 0x6de   :  { %v1393_v36 = vpop.permute.xlu0 %1392 }
 0x6df   :  { %1462 = vrot.lane.b32.xlu0 %v1393_v36, %s4047_s26  ;;  %v1395_v18 = vpop.permute.xlu1 %1394 }
 0x6e0   :  { %v1397_v37 = vsel %vm1396_vm8, %v1393_v36, %v1395_v18  ;;  %vm2954_vm8 = vcmask 908288  }
 0x6e1   :  { %1464 = vrot.lane.b32.xlu1 %v1397_v37, %s4047_s26 }
 0x6e2   :  { %v1399_v10 = vpop.permute.xlu0 %1398 }
 0x6e3   :  { %1466 = vrot.lane.b32.xlu0 %v1399_v10, %s4047_s26  ;;  %v1401_v29 = vpop.permute.xlu1 %1400 }
 0x6e4   :  { %v1403_v47 = vsel %vm1402_vm9, %v1399_v10, %v1401_v29  ;;  %vm3206_vm9 = vcmask 769024  }
 0x6e5   :  { %1468 = vrot.lane.b32.xlu1 %v1403_v47, %s4047_s26  ;;  %v1573_v47 = vld [vmem:[%s5029_s11 + $0x20] sm:$0xff] }
 0x6e6   :  { %v1405_v46 = vpop.permute.xlu0 %1404 }
 0x6e7   :  { %v1407_v33 = vpop.permute.xlu1 %1406 }
 0x6e8   :  { %v1409_v53 = vsel %vm1408_vm10, %v1405_v46, %v1407_v33 }
 0x6e9   :  { %1470 = vrot.lane.b32.xlu0 %v1409_v53, %s4047_s26  ;;  %1472 = vrot.lane.b32.xlu1 %v1407_v33, %s4047_s26  ;;  %v1574_v33 = vld [vmem:[%s5029_s11 + $0x28] sm:$0xff] }
 0x6ea   :  { %v1411_v23 = vpop.permute.xlu0 %1410 }
 0x6eb   :  { %v1413_v19 = vpop.permute.xlu1 %1412 }
 0x6ec   :  { %v1415_v13 = vsel %vm1414_vm11, %v1411_v23, %v1413_v19 }
 0x6ed   :  { %1474 = vrot.lane.b32.xlu0 %v1411_v23, %s4047_s26  ;;  %1476 = vrot.lane.b32.xlu1 %v1415_v13, %s4047_s26 }
 0x6ee   :  { %v1417_v44 = vpop.permute.xlu0 %1416 }
 0x6ef   :  { %v1419_v41 = vpop.permute.xlu1 %1418 }
 0x6f0   :  { %v1421_v45 = vsel %vm1420_vm12, %v1417_v44, %v1419_v41  ;;  %v1575_v44 = vld [vmem:[%s5029_s11 + $0x30] sm:$0xff] }
 0x6f1   :  { %1478 = vrot.lane.b32.xlu0 %v1421_v45, %s4047_s26  ;;  %1480 = vrot.lane.b32.xlu1 %v1419_v41, %s4047_s26  ;;  %v1576_v45 = vld [vmem:[%s5029_s11 + $0x38] sm:$0xff] }
 0x6f2   :  { %v1423_v52 = vpop.permute.xlu0 %1422 }
 0x6f3   :  { %v1425_v43 = vpop.permute.xlu1 %1424 }
 0x6f4   :  { %v1427_v2 = vsel %vm1426_vm13, %v1423_v52, %v1425_v43 }
 0x6f5   :  { %1482 = vrot.lane.b32.xlu0 %v1427_v2, %s4047_s26  ;;  %1484 = vrot.lane.b32.xlu1 %v1425_v43, %s4047_s26 }
 0x6f6   :  { %v1429_v12 = vpop.permute.xlu0 %1428 }
 0x6f7   :  { %v1431_v5 = vpop.permute.xlu1 %1430 }
 0x6f8   :  { %1516 = vmatprep.subr.bf16.mxu0 %v1431_v5  ;;  %v1433_v28 = vsel %vm1432_vm14, %v1429_v12, %v1431_v5 }
 0x6f9   :  { %1486 = vrot.lane.b32.xlu0 %v1433_v28, %s4047_s26  ;;  %1517 = vmatpush1.bf16.msra.mxu0 %v1433_v28 }
 0x6fa   :  { %1488 = vrot.lane.b32.xlu1 %v1431_v5, %s4047_s26 }
 0x74d   :  { %v1459_v35 = vpop.permute.xlu0 %1458 }
 0x74f   :  { %v1461_v58 = vpop.permute.xlu1 %1460 }
 0x750   :  { %1518 = vmatprep.subr.bf16.mxu0 %v1461_v58  ;;  %v1490_v42 = vsel %vm1432_vm14, %v1459_v35, %v1461_v58 }
 0x751   :  { %v1463_v40 = vpop.permute.xlu0 %1462  ;;  %1519 = vmatpush1.bf16.msra.mxu0 %v1490_v42 }
 0x753   :  { %v1465_v22 = vpop.permute.xlu1 %1464 }
 0x754   :  { %1520 = vmatprep.subr.bf16.mxu0 %v1465_v22  ;;  %v1491_v48 = vsel %vm1432_vm14, %v1463_v40, %v1465_v22 }
 0x755   :  { %1521 = vmatpush1.bf16.msra.mxu0 %v1491_v48  ;;  %v1467_v0 = vpop.permute.xlu0 %1466 }
 0x757   :  { %v1469_v50 = vpop.permute.xlu1 %1468 }
 0x758   :  { %v1492_v55 = vsel %vm1432_vm14, %v1467_v0, %v1469_v50  ;;  %1522 = vmatprep.subr.bf16.mxu0 %v1469_v50 }
 0x759   :  { %1523 = vmatpush1.bf16.msra.mxu0 %v1492_v55 }
 0x75b   :  { %v1471_v8 = vpop.permute.xlu0 %1470  ;;  %v1473_v54 = vpop.permute.xlu1 %1472 }
 0x75c   :  { %1524 = vmatprep.subr.bf16.mxu0 %v1473_v54  ;;  %v1493_v61 = vsel %vm1432_vm14, %v1471_v8, %v1473_v54 }
 0x75d   :  { %1525 = vmatpush1.bf16.msra.mxu0 %v1493_v61 }
 0x75e   :  { %1526 = vmatprep.subr.bf16.mxu0 %v1431_v5 }
 0x75f   :  { %v1475_v57 = vpop.permute.xlu0 %1474  ;;  %v1477_v24 = vpop.permute.xlu1 %1476 }
 0x760   :  { %v1494_v49 = vsel %vm1432_vm14, %v1475_v57, %v1477_v24 }
 0x761   :  { %1527 = vmatpush1.bf16.msra.mxu0 %v1433_v28 }
 0x762   :  { %1528 = vmatprep.subr.bf16.mxu0 %v1477_v24 }
 0x763   :  { %v1479_v3 = vpop.permute.xlu0 %1478  ;;  %v1481_v6 = vpop.permute.xlu1 %1480 }
 0x764   :  { %v1495_v56 = vsel %vm1432_vm14, %v1479_v3, %v1481_v6 }
 0x765   :  { %1529 = vmatpush1.bf16.msra.mxu0 %v1494_v49 }
 0x766   :  { %1530 = vmatprep.subr.bf16.mxu0 %v1465_v22 }
 0x767   :  { %v1483_v4 = vpop.permute.xlu0 %1482  ;;  %v1485_v51 = vpop.permute.xlu1 %1484 }
 0x768   :  { %v1496_v25 = vsel %vm1432_vm14, %v1483_v4, %v1485_v51 }
 0x769   :  { %1531 = vmatpush1.bf16.msra.mxu0 %v1491_v48 }
 0x76a   :  { %1532 = vmatprep.subr.bf16.mxu0 %v1481_v6 }
 0x76b   :  { %v1487_v38 = vpop.permute.xlu0 %1486 }
 0x76c   :  { %v1489_v26 = vpop.permute.xlu1 %1488 }
 0x76d   :  { %1533 = vmatpush1.bf16.msra.mxu0 %v1495_v56  ;;  %v1497_v32 = vsel %vm1432_vm14, %v1487_v38, %v1489_v26 }
 0x76e   :  { %1534 = vmatprep.subr.bf16.mxu0 %v1485_v51 }
 0x771   :  { %1535 = vmatpush1.bf16.msra.mxu0 %v1496_v25 }
 0x772   :  { %1536 = vmatprep.subr.bf16.mxu0 %v1431_v5 }
 0x775   :  { %1537 = vmatpush1.bf16.msra.mxu0 %v1433_v28 }
 0x776   :  { %1538 = vmatprep.subr.bf16.mxu0 %v1461_v58 }
 0x779   :  { %1539 = vmatpush1.bf16.msra.mxu0 %v1490_v42 }
 0x77a   :  { %1540 = vmatprep.subr.bf16.mxu0 %v1489_v26 }
 0x77d   :  { %1541 = vmatpush1.bf16.msra.mxu0 %v1497_v32 }
 0x77e   :  { %1542 = vmatprep.subr.bf16.mxu0 %v1481_v6 }
 0x781   :  { %1543 = vmatpush1.bf16.msra.mxu0 %v1495_v56 }
 0x782   :  { %1544 = vmatprep.subr.bf16.mxu0 %v1473_v54 }
 0x785   :  { %1545 = vmatpush1.bf16.msra.mxu0 %v1493_v61 }
 0x786   :  { %1546 = vmatprep.subr.bf16.mxu0 %v1431_v5 }
 0x789   :  { %1547 = vmatpush1.bf16.msra.mxu0 %v1433_v28 }
 0x78c   :  { %1549 = vmatmul.mubr.bf16.vlgmr.msra.gmra.mrb[16].mxu0 %v3715_v16 }
 0x78d   :  { %1558 = vmatprep.mubr.bf16.mxu0 %v3718_v9 }
 0x794   :  { %1559 = vmatmul.mubr.bf16.gmra.mrb[20].mxu0 %v3720_v34 }
 0x85f   :  { %v4780_v14 = vpop.f32.mrb[16].mxu0 }
 0x860   :  { %v4785_v1 = vpop.f32.mrb[17].mxu0  ;;  %v1577_v27 = vmul.f32 %v1569_v39, %v4780_v14 }
 0x861   :  { %v1578_v59 = vmul.f32 %v1570_v11, %v4785_v1  ;;  %v4792_v60 = vpop.f32.mrb[18].mxu0 }
 0x862   :  { %v4794_v30 = vpop.f32.mrb[19].mxu0  ;;  %v1579_v20 = vmul.f32 %v1571_v21, %v4792_v60  ;;  %v1602_v18 = vmul.f32 %v1577_v27, %v4780_v14 }
 0x863   :  { %v1603_v7 = vmul.f32 %v1578_v59, %v4785_v1  ;;  %v1580_v17 = vmul.f32 %v1572_v63, %v4794_v30  ;;  %v1586_v31 = vsel %vm1585_vm15, %v1578_v59, 0.0  ;;  %v1637_v59 = vld [vmem:[%s5031_s13] sm:$0xff]  ;;  %s4048_s13 = smov 14  }
 0x864   :  { %v1587_v36 = vadd.f32 %v1586_v31, %v1577_v27  ;;  %v1604_v23 = vmul.f32 %v1579_v20, %v4792_v60 }
 0x865   :  { %v1605_v37 = vmul.f32 %v1580_v17, %v4794_v30  ;;  %v1590_v10 = vsel %vm1585_vm15, %v1580_v17, 0.0  ;;  %v1610_v29 = vsel %vm1585_vm15, %v1603_v7, 0.0  ;;  %v1642_v17 = vld [vmem:[%s5032_s14] sm:$0xff]  ;;  %s4049_s14 = smov 42  }
 0x866   :  { %1588 = vadd.xlane.f32.xlu0 %v1587_v36  ;;  %v1591_v46 = vadd.f32 %v1590_v10, %v1579_v20  ;;  %v1611_v53 = vadd.f32 %v1610_v29, %v1602_v18  ;;  %v3721_v18 = vld [vmem:[#allocation6] ss:$16 sps:$4 sm:$0xff]   ;;  %v3724_v10 = vld [vmem:[#allocation6 + $0x8] ss:$16 sps:$4 sm:$0xff]   ;;  %v3726_v29 = vld [vmem:[#allocation6 + $0xc] ss:$16 sps:$4 sm:$0xff]  }
 0x867   :  { %v4811_v19 = vpop.f32.mrb[20].mxu0  ;;  %v1614_v13 = vsel %vm1585_vm15, %v1605_v37, 0.0  ;;  %v3723_v37 = vld [vmem:[#allocation6 + $0x4] ss:$16 sps:$4 sm:$0xff]   ;;  %2707 = vmatprep.subr.bf16.mxu0 %v3726_v29  ;;  %v3805_v29 = vld [vmem:[#allocation6 + $0x1c0] ss:$16 sps:$4 sm:$0xff]  }
 0x868   :  { %1592 = vadd.xlane.f32.xlu1 %v1591_v46  ;;  %v4817_v41 = vpop.f32.mrb[21].mxu0  ;;  %v1615_v52 = vadd.f32 %v1614_v13, %v1604_v23  ;;  %v1581_v43 = vmul.f32 %v1573_v47, %v4811_v19  ;;  %v3729_v47 = vld [vmem:[#allocation6 + $0x24] ss:$16 sps:$4 sm:$0xff]   ;;  %2584 = vmatprep.subr.bf16.mxu1 %v3723_v37  ;;  %v3732_v46 = vld [vmem:[#allocation6 + $0x2c] ss:$16 sps:$4 sm:$0xff]  }
 0x869   :  { %v1582_v2 = vmul.f32 %v1574_v33, %v4817_v41  ;;  %v4824_v12 = vpop.f32.mrb[22].mxu0  ;;  %2585 = vmatpush1.bf16.msra.mxu1 %v3721_v18  ;;  %v3727_v33 = vld [vmem:[#allocation6 + $0x20] ss:$16 sps:$4 sm:$0xff]   ;;  %2708 = vmatpush1.bf16.msra.mxu0 %v3724_v10  ;;  %v3735_v23 = vld [vmem:[#allocation6 + $0x44] ss:$16 sps:$4 sm:$0xff]  }
 0x86a   :  { %1612 = vadd.xlane.f32.xlu0 %v1611_v53  ;;  %v4826_v5 = vpop.f32.mrb[23].mxu0  ;;  %v1583_v28 = vmul.f32 %v1575_v44, %v4824_v12  ;;  %v1606_v40 = vmul.f32 %v1581_v43, %v4811_v19  ;;  %2586 = vmatprep.subr.bf16.mxu1 %v3729_v47  ;;  %v3730_v53 = vld [vmem:[#allocation6 + $0x28] ss:$16 sps:$4 sm:$0xff]   ;;  %v3738_v13 = vld [vmem:[#allocation6 + $0x4c] ss:$16 sps:$4 sm:$0xff]  }
 0x86b   :  { %v1607_v15 = vmul.f32 %v1582_v2, %v4817_v41  ;;  %v1584_v35 = vmul.f32 %v1576_v45, %v4826_v5  ;;  %v1594_v58 = vsel %vm1585_vm15, %v1582_v2, 0.0  ;;  %2709 = vmatprep.subr.bf16.mxu0 %v3732_v46  ;;  %v3733_v44 = vld [vmem:[#allocation6 + $0x40] ss:$16 sps:$4 sm:$0xff]   ;;  %v3736_v45 = vld [vmem:[#allocation6 + $0x48] ss:$16 sps:$4 sm:$0xff]  }
 0x86c   :  { %1616 = vadd.xlane.f32.xlu1 %v1615_v52  ;;  %v1595_v42 = vadd.f32 %v1594_v58, %v1581_v43  ;;  %v1608_v8 = vmul.f32 %v1583_v28, %v4824_v12  ;;  %v3741_v52 = vld [vmem:[#allocation6 + $0x64] ss:$16 sps:$4 sm:$0xff]   ;;  %v3744_v43 = vld [vmem:[#allocation6 + $0x6c] ss:$16 sps:$4 sm:$0xff]   ;;  %v3739_v2 = vld [vmem:[#allocation6 + $0x60] ss:$16 sps:$4 sm:$0xff]  }
 0x86d   :  { %v1609_v22 = vmul.f32 %v1584_v35, %v4826_v5  ;;  %v1618_v48 = vsel %vm1585_vm15, %v1607_v15, 0.0  ;;  %v1598_v0 = vsel %vm1585_vm15, %v1584_v35, 0.0  ;;  %2587 = vmatpush1.bf16.msra.mxu1 %v3727_v33  ;;  %2710 = vmatpush1.bf16.msra.mxu0 %v3730_v53  ;;  %v3747_v15 = vld [vmem:[#allocation6 + $0x84] ss:$16 sps:$4 sm:$0xff]   ;;  %v3750_v35 = vld [vmem:[#allocation6 + $0x8c] ss:$16 sps:$4 sm:$0xff]  }
 0x86e   :  { %1596 = vadd.xlane.f32.xlu0 %v1595_v42  ;;  %v1619_v50 = vadd.f32 %v1618_v48, %v1606_v40  ;;  %v1599_v55 = vadd.f32 %v1598_v0, %v1583_v28  ;;  %2588 = vmatprep.subr.bf16.mxu1 %v3735_v23  ;;  %v3742_v28 = vld [vmem:[#allocation6 + $0x68] ss:$16 sps:$4 sm:$0xff]   ;;  %v3745_v58 = vld [vmem:[#allocation6 + $0x80] ss:$16 sps:$4 sm:$0xff]   ;;  %v3753_v40 = vld [vmem:[#allocation6 + $0xa4] ss:$16 sps:$4 sm:$0xff]  }
 0x86f   :  { %v1622_v54 = vsel %vm1585_vm15, %v1609_v22, 0.0  ;;  %2711 = vmatprep.subr.bf16.mxu0 %v3738_v13  ;;  %v3748_v42 = vld [vmem:[#allocation6 + $0x88] ss:$16 sps:$4 sm:$0xff]   ;;  %v3756_v22 = vld [vmem:[#allocation6 + $0xac] ss:$16 sps:$4 sm:$0xff]  }
 0x870   :  { %1620 = vadd.xlane.f32.xlu1 %v1619_v50  ;;  %v1623_v61 = vadd.f32 %v1622_v54, %v1608_v8  ;;  %v3751_v48 = vld [vmem:[#allocation6 + $0xa0] ss:$16 sps:$4 sm:$0xff]   ;;  %v3754_v0 = vld [vmem:[#allocation6 + $0xa8] ss:$16 sps:$4 sm:$0xff]   ;;  %v3759_v50 = vld [vmem:[#allocation6 + $0xc4] ss:$16 sps:$4 sm:$0xff]  }
 0x871   :  { %2589 = vmatpush1.bf16.msra.mxu1 %v3733_v44  ;;  %2712 = vmatpush1.bf16.msra.mxu0 %v3736_v45  ;;  %v3757_v8 = vld [vmem:[#allocation6 + $0xc0] ss:$16 sps:$4 sm:$0xff]   ;;  %v3760_v54 = vld [vmem:[#allocation6 + $0xc8] ss:$16 sps:$4 sm:$0xff]   ;;  %v3807_v37 = vld [vmem:[#allocation6 + $0x1c4] ss:$16 sps:$4 sm:$0xff]  }
 0x872   :  { %1600 = vadd.xlane.f32.xlu0 %v1599_v55  ;;  %2590 = vmatprep.subr.bf16.mxu1 %v3741_v52  ;;  %v3762_v55 = vld [vmem:[#allocation6 + $0xcc] ss:$16 sps:$4 sm:$0xff]   ;;  %v3802_v18 = vld [vmem:[#allocation6 + $0x1a8] ss:$16 sps:$4 sm:$0xff]   ;;  %v3813_v46 = vld [vmem:[#allocation6 + $0x1e4] ss:$16 sps:$4 sm:$0xff]  }
 0x873   :  { %2713 = vmatprep.subr.bf16.mxu0 %v3744_v43  ;;  %v3810_v10 = vld [vmem:[#allocation6 + $0x1cc] ss:$16 sps:$4 sm:$0xff]   ;;  %v3808_v47 = vld [vmem:[#allocation6 + $0x1c8] ss:$16 sps:$4 sm:$0xff]   ;;  %v3811_v53 = vld [vmem:[#allocation6 + $0x1e0] ss:$16 sps:$4 sm:$0xff]  }
 0x874   :  { %v3816_v33 = vld [vmem:[#allocation6 + $0x1ec] ss:$16 sps:$4 sm:$0xff]   ;;  %v3814_v23 = vld [vmem:[#allocation6 + $0x1e8] ss:$16 sps:$4 sm:$0xff]   ;;  %v3819_v13 = vld [vmem:[#allocation6 + $0x204] ss:$16 sps:$4 sm:$0xff]  }
 0x875   :  { %2591 = vmatpush1.bf16.msra.mxu1 %v3739_v2  ;;  %2714 = vmatpush1.bf16.msra.mxu0 %v3742_v28  ;;  %v3822_v44 = vld [vmem:[#allocation6 + $0x20c] ss:$16 sps:$4 sm:$0xff]  }
 0x876   :  { %1624 = vadd.xlane.f32.xlu0 %v1623_v61  ;;  %2592 = vmatprep.subr.bf16.mxu1 %v3747_v15  ;;  %v3765_v61 = vld [vmem:[#allocation6 + $0xe4] ss:$16 sps:$4 sm:$0xff]  }
 0x877   :  { %2715 = vmatprep.subr.bf16.mxu0 %v3750_v35 }
 0x879   :  { %2593 = vmatpush1.bf16.msra.mxu1 %v3745_v58  ;;  %2716 = vmatpush1.bf16.msra.mxu0 %v3748_v42 }
 0x87a   :  { %2594 = vmatprep.subr.bf16.mxu1 %v3753_v40  ;;  %2717 = vmatprep.subr.bf16.mxu0 %v3756_v22 }
 0x87d   :  { %2595 = vmatpush1.bf16.msra.mxu1 %v3751_v48  ;;  %2718 = vmatpush1.bf16.msra.mxu0 %v3754_v0 }
 0x87e   :  { %2596 = vmatprep.subr.bf16.mxu1 %v3759_v50  ;;  %2719 = vmatprep.subr.bf16.mxu0 %v3762_v55 }
 0x881   :  { %2597 = vmatpush1.bf16.msra.mxu1 %v3757_v8  ;;  %2720 = vmatpush1.bf16.msra.mxu0 %v3760_v54 }
 0x882   :  { %2598 = vmatprep.subr.bf16.mxu1 %v3765_v61 }
 0x8f3   :  { %v1589_v57 = vpop.xlane.xlu0 %1588 }
 0x8f5   :  { %v1593_v24 = vpop.xlane.xlu1 %1592 }
 0x8f6   :  { %v1626_v56 = vadd.f32 %v1593_v24, %v1589_v57  ;;  %v3768_v57 = vld [vmem:[#allocation6 + $0xec] ss:$16 sps:$4 sm:$0xff]   ;;  %v3763_v24 = vld [vmem:[#allocation6 + $0xe0] ss:$16 sps:$4 sm:$0xff]  }
 0x8f7   :  { %v1613_v49 = vpop.xlane.xlu0 %1612  ;;  %2721 = vmatprep.subr.bf16.mxu0 %v3768_v57  ;;  %2599 = vmatpush1.bf16.msra.mxu1 %v3763_v24 }
 0x8f9   :  { %v1617_v3 = vpop.xlane.xlu1 %1616 }
 0x8fa   :  { %v1629_v38 = vadd.f32 %v1617_v3, %v1613_v49  ;;  %v3766_v49 = vld [vmem:[#allocation6 + $0xe8] ss:$16 sps:$4 sm:$0xff]   ;;  %v3771_v3 = vld [vmem:[#allocation6 + $0x104] ss:$16 sps:$4 sm:$0xff]  }
 0x8fb   :  { %v1597_v6 = vpop.xlane.xlu0 %1596  ;;  %2722 = vmatpush1.bf16.msra.mxu0 %v3766_v49  ;;  %2600 = vmatprep.subr.bf16.mxu1 %v3771_v3 }
 0x8fc   :  { %v1627_v4 = vadd.f32 %v1626_v56, %v1597_v6  ;;  %v3774_v6 = vld [vmem:[#allocation6 + $0x10c] ss:$16 sps:$4 sm:$0xff]   ;;  %v3769_v56 = vld [vmem:[#allocation6 + $0x100] ss:$16 sps:$4 sm:$0xff]  }
 0x8fd   :  { %v1621_v51 = vpop.xlane.xlu1 %1620  ;;  %2723 = vmatprep.subr.bf16.mxu0 %v3774_v6  ;;  %2601 = vmatpush1.bf16.msra.mxu1 %v3769_v56 }
 0x8fe   :  { %v1630_v32 = vadd.f32 %v1629_v38, %v1621_v51  ;;  %v3777_v51 = vld [vmem:[#allocation6 + $0x124] ss:$16 sps:$4 sm:$0xff]   ;;  %v3775_v38 = vld [vmem:[#allocation6 + $0x120] ss:$16 sps:$4 sm:$0xff]  }
 0x8ff   :  { %v1601_v25 = vpop.xlane.xlu0 %1600  ;;  %2602 = vmatprep.subr.bf16.mxu1 %v3777_v51  ;;  %v3820_v51 = vld [vmem:[#allocation6 + $0x208] ss:$16 sps:$4 sm:$0xff]  }
 0x900   :  { %v1628_v26 = vadd.f32 %v1627_v4, %v1601_v25  ;;  %v3772_v4 = vld [vmem:[#allocation6 + $0x108] ss:$16 sps:$4 sm:$0xff]   ;;  %v3780_v25 = vld [vmem:[#allocation6 + $0x12c] ss:$16 sps:$4 sm:$0xff]  }
 0x901   :  { %2724 = vmatpush1.bf16.msra.mxu0 %v3772_v4  ;;  %2603 = vmatpush1.bf16.msra.mxu1 %v3775_v38  ;;  %v3817_v4 = vld [vmem:[#allocation6 + $0x200] ss:$16 sps:$4 sm:$0xff]   ;;  %v3825_v38 = vld [vmem:[#allocation6 + $0x224] ss:$16 sps:$4 sm:$0xff]  }
 0x902   :  { %v1633_v16 = vmul.f32 0.0025510204, %v1628_v26  ;;  %v3778_v26 = vld [vmem:[#allocation6 + $0x128] ss:$16 sps:$4 sm:$0xff]   ;;  %2725 = vmatprep.subr.bf16.mxu0 %v3780_v25 }
 0x903   :  { %v1625_v9 = vpop.xlane.xlu0 %1624 }
 0x904   :  { %v1631_v34 = vadd.f32 %v1630_v32, %v1625_v9  ;;  %v1635_v39 = vmul.f32 %v1633_v16, %v1633_v16  ;;  %v3783_v32 = vld [vmem:[#allocation6 + $0x144] ss:$16 sps:$4 sm:$0xff]   ;;  %v3781_v9 = vld [vmem:[#allocation6 + $0x140] ss:$16 sps:$4 sm:$0xff]  }
 0x905   :  { %2726 = vmatpush1.bf16.msra.mxu0 %v3778_v26  ;;  %2604 = vmatprep.subr.bf16.mxu1 %v3783_v32  ;;  %v3828_v26 = vld [vmem:[#allocation6 + $0x22c] ss:$16 sps:$4 sm:$0xff]  }
 0x906   :  { %v1634_v11 = vmul.f32 0.0025510204, %v1631_v34  ;;  %v3784_v34 = vld [vmem:[#allocation6 + $0x148] ss:$16 sps:$4 sm:$0xff]   ;;  %2605 = vmatpush1.bf16.msra.mxu1 %v3781_v9 }
 0x907   :  { %v3826_v9 = vld [vmem:[#allocation6 + $0x228] ss:$16 sps:$4 sm:$0xff]  }
 0x908   :  { %v1636_v21 = vsub.f32 %v1634_v11, %v1635_v39  ;;  %v3789_v39 = vld [vmem:[#allocation6 + $0x164] ss:$16 sps:$4 sm:$0xff]   ;;  %v3792_v11 = vld [vmem:[#allocation6 + $0x16c] ss:$16 sps:$4 sm:$0xff]  }
 0x909   :  { %2606 = vmatprep.subr.bf16.mxu1 %v3789_v39  ;;  %v3831_v39 = vld [vmem:[#allocation6 + $0x244] ss:$16 sps:$4 sm:$0xff]  }
 0x90a   :  { %v1638_v63 = vmax.f32 %v1636_v21, 0.0  ;;  %v3787_v21 = vld [vmem:[#allocation6 + $0x160] ss:$16 sps:$4 sm:$0xff]  }
 0x90b   :  { %2607 = vmatpush1.bf16.msra.mxu1 %v3787_v21 }
 0x90c   :  { %v1639_v27 = vadd.f32 1e-05, %v1638_v63  ;;  %v3790_v63 = vld [vmem:[#allocation6 + $0x168] ss:$16 sps:$4 sm:$0xff]  }
 0x90e   :  { %3948 = vrsqrt.f32 %v1639_v27  ;;  %v3795_v27 = vld [vmem:[#allocation6 + $0x184] ss:$16 sps:$4 sm:$0xff]  }
 0x90f   :  { %2608 = vmatprep.subr.bf16.mxu1 %v3795_v27 }
 0x918   :  { %v3949_v20 = vpop.eup %3948 }
 0x919   :  { %v1641_v7 = vmul.f32 %v3949_v20, %v1637_v59  ;;  %v3798_v59 = vld [vmem:[#allocation6 + $0x18c] ss:$16 sps:$4 sm:$0xff]   ;;  %v3793_v20 = vld [vmem:[#allocation6 + $0x180] ss:$16 sps:$4 sm:$0xff]  }
 0x91a   :  { %2609 = vmatpush1.bf16.msra.mxu1 %v3793_v20  ;;  %v3832_v20 = vld [vmem:[#allocation6 + $0x248] ss:$16 sps:$4 sm:$0xff]  }
 0x91b   :  { %1647 = vperm.xlu1 %3554, %v1641_v7   ;;  %v1643_v31 = vmul.f32 %v1641_v7, %v1633_v16  ;;  %v3786_v16 = vld [vmem:[#allocation6 + $0x14c] ss:$16 sps:$4 sm:$0xff]   ;;  %v3796_v7 = vld [vmem:[#allocation6 + $0x188] ss:$16 sps:$4 sm:$0xff]  }
 0x91c   :  { %2727 = vmatprep.subr.bf16.mxu0 %v3786_v16  ;;  %v3823_v16 = vld [vmem:[#allocation6 + $0x220] ss:$16 sps:$4 sm:$0xff]  }
 0x91d   :  { %v1644_v36 = vsub.f32 %v1642_v17, %v1643_v31  ;;  %2728 = vmatpush1.bf16.msra.mxu0 %v3784_v34  ;;  %v3801_v17 = vld [vmem:[#allocation6 + $0x1a4] ss:$16 sps:$4 sm:$0xff]   ;;  %v3804_v31 = vld [vmem:[#allocation6 + $0x1ac] ss:$16 sps:$4 sm:$0xff]  }
 0x91e   :  { %2729 = vmatprep.subr.bf16.mxu0 %v3792_v11  ;;  %2610 = vmatprep.subr.bf16.mxu1 %v3801_v17  ;;  %v3834_v11 = vld [vmem:[#allocation6 + $0x24c] ss:$16 sps:$4 sm:$0xff]  }
 0x91f   :  { %1660 = vperm.xlu0 %3553, %v1644_v36   ;;  %v3799_v36 = vld [vmem:[#allocation6 + $0x1a0] ss:$16 sps:$4 sm:$0xff]   ;;  %v3840_v17 = vld [vmem:[#allocation6 + $0x26c] ss:$16 sps:$4 sm:$0xff]  }
 0x920   :  { %2611 = vmatpush1.bf16.msra.mxu1 %v3799_v36  ;;  %v3838_v36 = vld [vmem:[#allocation6 + $0x268] ss:$16 sps:$4 sm:$0xff]  }
 0x921   :  { %2730 = vmatpush1.bf16.msra.mxu0 %v3790_v63  ;;  %2612 = vmatprep.subr.bf16.mxu1 %v3807_v37  ;;  %v3846_v37 = vld [vmem:[#allocation6 + $0x28c] ss:$16 sps:$4 sm:$0xff]  }
 0x922   :  { %2731 = vmatprep.subr.bf16.mxu0 %v3798_v59  ;;  %v3829_v59 = vld [vmem:[#allocation6 + $0x240] ss:$16 sps:$4 sm:$0xff]  }
 0x924   :  { %2613 = vmatpush1.bf16.msra.mxu1 %v3805_v29  ;;  %v3844_v29 = vld [vmem:[#allocation6 + $0x288] ss:$16 sps:$4 sm:$0xff]  }
 0x925   :  { %2732 = vmatpush1.bf16.msra.mxu0 %v3796_v7  ;;  %2614 = vmatprep.subr.bf16.mxu1 %v3813_v46  ;;  %v3837_v7 = vld [vmem:[#allocation6 + $0x264] ss:$16 sps:$4 sm:$0xff]   ;;  %v3852_v46 = vld [vmem:[#allocation6 + $0x2ac] ss:$16 sps:$4 sm:$0xff]  }
 0x926   :  { %2733 = vmatprep.subr.bf16.mxu0 %v3804_v31  ;;  %v3835_v31 = vld [vmem:[#allocation6 + $0x260] ss:$16 sps:$4 sm:$0xff]  }
 0x928   :  { %2615 = vmatpush1.bf16.msra.mxu1 %v3811_v53  ;;  %v3850_v53 = vld [vmem:[#allocation6 + $0x2a8] ss:$16 sps:$4 sm:$0xff]  }
 0x929   :  { %2734 = vmatpush1.bf16.msra.mxu0 %v3802_v18  ;;  %2625 = vmatprep.subr.bf16.mxu1 %v3819_v13  ;;  %v3843_v18 = vld [vmem:[#allocation6 + $0x284] ss:$16 sps:$4 sm:$0xff]   ;;  %v3858_v13 = vld [vmem:[#allocation6 + $0x2cc] ss:$16 sps:$4 sm:$0xff]  }
 0x92a   :  { %2735 = vmatprep.subr.bf16.mxu0 %v3810_v10  ;;  %v3841_v10 = vld [vmem:[#allocation6 + $0x280] ss:$16 sps:$4 sm:$0xff]  }
 0x92d   :  { %2736 = vmatpush1.bf16.msra.mxu0 %v3808_v47  ;;  %v3849_v47 = vld [vmem:[#allocation6 + $0x2a4] ss:$16 sps:$4 sm:$0xff]  }
 0x92e   :  { %2737 = vmatprep.subr.bf16.mxu0 %v3816_v33  ;;  %v3847_v33 = vld [vmem:[#allocation6 + $0x2a0] ss:$16 sps:$4 sm:$0xff]  }
 0x931   :  { %2738 = vmatpush1.bf16.msra.mxu0 %v3814_v23  ;;  %v3855_v23 = vld [vmem:[#allocation6 + $0x2c4] ss:$16 sps:$4 sm:$0xff]  }
 0x932   :  { %2748 = vmatprep.subr.bf16.mxu0 %v3822_v44  ;;  %v3853_v44 = vld [vmem:[#allocation6 + $0x2c0] ss:$16 sps:$4 sm:$0xff]  }
 0x99a   :  { %v1648_v45 = vpop.permute.xlu1 %1647 }
 0x99b   :  { %v1653_v52 = vmul.f32 %v1648_v45, %v4794_v30  ;;  %v1652_v43 = vmul.f32 %v1648_v45, %v4792_v60  ;;  %v1654_v2 = vmul.f32 %v1648_v45, %v4811_v19  ;;  %v1655_v15 = vmul.f32 %v1648_v45, %v4817_v41 }
 0x99c   :  { %v1657_v42 = vmul.f32 %v1648_v45, %v4826_v5  ;;  %v1656_v60 = vmul.f32 %v1648_v45, %v4824_v12  ;;  %v1651_v5 = vmul.f32 %v1648_v45, %v4785_v1  ;;  %v1650_v61 = vmul.f32 %v1648_v45, %v4780_v14  ;;  %v3856_v45 = vld [vmem:[#allocation6 + $0x2c8] ss:$16 sps:$4 sm:$0xff]  }
 0x99e   :  { %v1661_v28 = vpop.permute.xlu0 %1660 }
 0x99f   :  { %v1666_v35 = vadd.f32 %v1661_v28, %v1653_v52  ;;  %v1665_v58 = vadd.f32 %v1661_v28, %v1652_v43  ;;  %v1667_v40 = vadd.f32 %v1661_v28, %v1654_v2  ;;  %v1668_v22 = vadd.f32 %v1661_v28, %v1655_v15  ;;  %v3861_v52 = vld [vmem:[#allocation6 + $0x2e4] ss:$16 sps:$4 sm:$0xff]   ;;  %v3864_v43 = vld [vmem:[#allocation6 + $0x2ec] ss:$16 sps:$4 sm:$0xff]   ;;  %v3859_v2 = vld [vmem:[#allocation6 + $0x2e0] ss:$16 sps:$4 sm:$0xff]  }
 0x9a0   :  { %v1670_v50 = vadd.f32 %v1661_v28, %v1657_v42  ;;  %v1669_v54 = vadd.f32 %v1661_v28, %v1656_v60  ;;  %v1664_v57 = vadd.f32 %v1661_v28, %v1651_v5  ;;  %v1663_v24 = vadd.f32 %v1661_v28, %v1650_v61  ;;  %v3862_v28 = vld [vmem:[#allocation6 + $0x2e8] ss:$16 sps:$4 sm:$0xff]   ;;  %v3867_v15 = vld [vmem:[#allocation6 + $0x304] ss:$16 sps:$4 sm:$0xff]   ;;  %v3894_v61 = vld [vmem:[#allocation6 + $0x38c] ss:$16 sps:$4 sm:$0xff]  }
 0x9a1   :  { %v1674_v48 = vmax.f32 %v1666_v35, 0.0  ;;  %v1673_v0 = vmax.f32 %v1665_v58, 0.0  ;;  %v1675_v55 = vmax.f32 %v1667_v40, 0.0  ;;  %v1676_v8 = vmax.f32 %v1668_v22, 0.0  ;;  %v3870_v35 = vld [vmem:[#allocation6 + $0x30c] ss:$16 sps:$4 sm:$0xff]  }
 0x9a2   :  { %v1678_v19 = vmax.f32 %v1670_v50, 0.0  ;;  %v1677_v41 = vmax.f32 %v1669_v54, 0.0  ;;  %v1672_v49 = vmax.f32 %v1664_v57, 0.0  ;;  %v1671_v3 = vmax.f32 %v1663_v24, 0.0  ;;  %v3865_v58 = vld [vmem:[#allocation6 + $0x300] ss:$16 sps:$4 sm:$0xff]  }
 0x9a3   :  { %1683 = vrot.lane.b32.xlu0 %v1674_v48, %s4048_s13  ;;  %1681 = vrot.lane.b32.xlu1 %v1673_v0, %s4048_s13  ;;  %v3570_v30 = vpack.i.bf16 %v1676_v8, %v1675_v55  ;;  %v3868_v42 = vld [vmem:[#allocation6 + $0x308] ss:$16 sps:$4 sm:$0xff]   ;;  %v3873_v40 = vld [vmem:[#allocation6 + $0x324] ss:$16 sps:$4 sm:$0xff]   ;;  %v3876_v22 = vld [vmem:[#allocation6 + $0x32c] ss:$16 sps:$4 sm:$0xff]  }
 0x9a4   :  { %v1711_v25 = vpack.c.bf16 %v1671_v3, %v1671_v3  ;;  %v3871_v48 = vld [vmem:[#allocation6 + $0x320] ss:$16 sps:$4 sm:$0xff]   ;;  %v3874_v0 = vld [vmem:[#allocation6 + $0x328] ss:$16 sps:$4 sm:$0xff]   ;;  %v3879_v50 = vld [vmem:[#allocation6 + $0x344] ss:$16 sps:$4 sm:$0xff]  }
 0x9a5   :  { %v3882_v55 = vld [vmem:[#allocation6 + $0x34c] ss:$16 sps:$4 sm:$0xff]   ;;  %v3877_v8 = vld [vmem:[#allocation6 + $0x340] ss:$16 sps:$4 sm:$0xff]   ;;  %v3880_v60 = vld [vmem:[#allocation6 + $0x348] ss:$16 sps:$4 sm:$0xff]  }
 0x9a6   :  { %v3883_v54 = vld [vmem:[#allocation6 + $0x360] ss:$16 sps:$4 sm:$0xff]   ;;  %v3891_v5 = vld [vmem:[#allocation6 + $0x384] ss:$16 sps:$4 sm:$0xff]   ;;  %v3892_v24 = vld [vmem:[#allocation6 + $0x388] ss:$16 sps:$4 sm:$0xff]  }
 0x9a7   :  { %1702 = vrot.lane.b32.xlu0 %v1678_v19, %s4049_s14  ;;  %3571 = vrot.lane.b32.xlu1 %v3570_v30, %s4050_s9  ;;  %v3885_v30 = vld [vmem:[#allocation6 + $0x364] ss:$16 sps:$4 sm:$0xff]   ;;  %v3888_v19 = vld [vmem:[#allocation6 + $0x36c] ss:$16 sps:$4 sm:$0xff]   ;;  %v3889_v57 = vld [vmem:[#allocation6 + $0x380] ss:$16 sps:$4 sm:$0xff]  }
 0x9a8   :  { %v3900_v3 = vld [vmem:[#allocation6 + $0x3ac] ss:$16 sps:$4 sm:$0xff]  }
 0x9ab   :  { %1700 = vrot.lane.b32.xlu1 %v1677_v41, %s4049_s14  ;;  %v3886_v41 = vld [vmem:[#allocation6 + $0x368] ss:$16 sps:$4 sm:$0xff]  }
 0xa15   :  { %v4852_v6 = vpop.permute.xlu1 %1681 }
 0xa16   :  { %v1708_v12 = vsel %vm1585_vm15, %v1672_v49, %v4852_v6  ;;  %v3897_v49 = vld [vmem:[#allocation6 + $0x3a4] ss:$16 sps:$4 sm:$0xff]  }
 0xa17   :  { %v1712_v56 = vpack.c.bf16 %v1708_v12, %v1708_v12  ;;  %v3895_v12 = vld [vmem:[#allocation6 + $0x3a0] ss:$16 sps:$4 sm:$0xff]  }
 0xa19   :  { %v4856_v32 = vpop.permute.xlu1 %3571  ;;  %2616 = vmatprep.mubr.bf16.mxu1 %v1712_v56  ;;  %2739 = vmatprep.mubr.bf16.mxu0 %v1712_v56  ;;  %v3898_v56 = vld [vmem:[#allocation6 + $0x3a8] ss:$16 sps:$4 sm:$0xff]  }
 0xa1a   :  { %v3574_v14 = vunpack.i.h.bf16 %v4856_v32  ;;  %v3573_v1 = vunpack.i.l.bf16 %v4856_v32  ;;  %2617 = vmatmul.mubr.bf16.vlgmr.msra.gmra.mrb[12].mxu1 %v1711_v25  ;;  %2740 = vmatmul.mubr.bf16.vlgmr.msra.gmra.mrb[24].mxu0 %v1711_v25  ;;  %v3901_v25 = vld [vmem:[#allocation6 + $0x3c0] ss:$16 sps:$4 sm:$0xff]  }
 0xa1b   :  { %2626 = vmatpush1.bf16.msra.mxu1 %v3817_v4  ;;  %2749 = vmatpush1.bf16.msra.mxu0 %v3820_v51  ;;  %v3903_v4 = vld [vmem:[#allocation6 + $0x3c4] ss:$16 sps:$4 sm:$0xff]   ;;  %v3906_v51 = vld [vmem:[#allocation6 + $0x3cc] ss:$16 sps:$4 sm:$0xff]   ;;  %v3919_v32 = vld [vmem:[#allocation6 + $0x440] ss:$16 sps:$4 sm:$0xff]  }
 0xa1c   :  { %v1695_v34 = vsel %vm1694_vm0, %v3573_v1, %v3574_v14  ;;  %2627 = vmatprep.subr.bf16.mxu1 %v3825_v38  ;;  %2750 = vmatprep.subr.bf16.mxu0 %v3828_v26  ;;  %v3904_v38 = vld [vmem:[#allocation6 + $0x3c8] ss:$16 sps:$4 sm:$0xff]   ;;  %v3909_v26 = vld [vmem:[#allocation6 + $0x3e4] ss:$16 sps:$4 sm:$0xff]   ;;  %v3912_v14 = vld [vmem:[#allocation6 + $0x3ec] ss:$16 sps:$4 sm:$0xff]  }
 0xa1d   :  { %v4863_v21 = vpop.permute.xlu1 %1700 }
 0xa1e   :  { %v1710_v63 = vsel %vm1704_vm1, %v1695_v34, %v4863_v21  ;;  %v3910_v34 = vld [vmem:[#allocation6 + $0x3e8] ss:$16 sps:$4 sm:$0xff]  }
 0xa1f   :  { %v1714_v27 = vpack.c.bf16 %v1710_v63, %v1710_v63  ;;  %2628 = vmatpush1.bf16.msra.mxu1 %v3823_v16  ;;  %2751 = vmatpush1.bf16.msra.mxu0 %v3826_v9  ;;  %v1684_v16 = vpop.permute.xlu0 %1683  ;;  %v3907_v9 = vld [vmem:[#allocation6 + $0x3e0] ss:$16 sps:$4 sm:$0xff]  }
 0xa20   :  { %2629 = vmatprep.subr.bf16.mxu1 %v3831_v39  ;;  %2752 = vmatprep.subr.bf16.mxu0 %v3834_v11  ;;  %v1685_v39 = vsel %vm1585_vm15, %v4852_v6, %v1684_v16  ;;  %v3915_v11 = vld [vmem:[#allocation6 + $0x404] ss:$16 sps:$4 sm:$0xff]  }
 0xa21   :  { %2657 = vmatprep.mubr.bf16.mxu1 %v1714_v27  ;;  %2780 = vmatprep.mubr.bf16.mxu0 %v1714_v27  ;;  %v1709_v63 = vsel %vm1694_vm0, %v1685_v39, %v3573_v1  ;;  %v3913_v27 = vld [vmem:[#allocation6 + $0x400] ss:$16 sps:$4 sm:$0xff]   ;;  %v3921_v6 = vld [vmem:[#allocation6 + $0x444] ss:$16 sps:$4 sm:$0xff]  }
 0xa23   :  { %2630 = vmatpush1.bf16.msra.mxu1 %v3829_v59  ;;  %2753 = vmatpush1.bf16.msra.mxu0 %v3832_v20  ;;  %v1713_v59 = vpack.c.bf16 %v1709_v63, %v1709_v63  ;;  %v3918_v20 = vld [vmem:[#allocation6 + $0x424] ss:$16 sps:$4 sm:$0xff]  }
 0xa24   :  { %2631 = vmatprep.subr.bf16.mxu1 %v3837_v7  ;;  %2754 = vmatprep.subr.bf16.mxu0 %v3840_v17  ;;  %v3916_v7 = vld [vmem:[#allocation6 + $0x420] ss:$16 sps:$4 sm:$0xff]  }
 0xa25   :  { %v1856_v17 = vld [vmem:[#allocation6 + $0x460] sm:$0xff] }
 0xa26   :  { %v3445_v1 = vcombine.high %v1856_v17, %v1856_v17 }
 0xa27   :  { %2632 = vmatpush1.bf16.msra.mxu1 %v3835_v31  ;;  %2755 = vmatpush1.bf16.msra.mxu0 %v3838_v36  ;;  %v3444_v31 = vcombine.low %v1856_v17, %v1856_v17  ;;  %v1703_v36 = vpop.permute.xlu0 %1702 }
 0xa28   :  { %2633 = vmatprep.subr.bf16.mxu1 %v3843_v18  ;;  %2756 = vmatprep.subr.bf16.mxu0 %v3846_v37  ;;  %v3926_v37 = vld [vmem:[#allocation6 + $0x40c] ss:$16 sps:$4 sm:$0xff]  }
 0xa29   :  { %v2573_v18 = vsel %vm1332_vm3, %v3444_v31, 0 }
 0xa2b   :  { %2634 = vmatpush1.bf16.msra.mxu1 %v3841_v10  ;;  %2757 = vmatpush1.bf16.msra.mxu0 %v3844_v29  ;;  %v1705_v10 = vsel %vm1704_vm1, %v4863_v21, %v1703_v36  ;;  %v3924_v29 = vld [vmem:[#allocation6 + $0x408] ss:$16 sps:$4 sm:$0xff]  }
 0xa2c   :  { %2635 = vmatprep.subr.bf16.mxu1 %v3849_v47  ;;  %2758 = vmatprep.subr.bf16.mxu0 %v3852_v46  ;;  %v1715_v47 = vpack.c.bf16 %v1705_v10, %v1705_v10  ;;  %v3929_v46 = vld [vmem:[#allocation6 + $0x42c] ss:$16 sps:$4 sm:$0xff]  }
 0xa2f   :  { %2636 = vmatpush1.bf16.msra.mxu1 %v3847_v33  ;;  %2759 = vmatpush1.bf16.msra.mxu0 %v3850_v53  ;;  %v3927_v33 = vld [vmem:[#allocation6 + $0x428] ss:$16 sps:$4 sm:$0xff]   ;;  %v3932_v53 = vld [vmem:[#allocation6 + $0x44c] ss:$16 sps:$4 sm:$0xff]  }
 0xa30   :  { %2637 = vmatprep.subr.bf16.mxu1 %v3855_v23  ;;  %2760 = vmatprep.subr.bf16.mxu0 %v3858_v13  ;;  %v1857_v23 = vld [vmem:[#allocation6 + $0x468] sm:$0xff] }
 0xa31   :  { %v3930_v13 = vld [vmem:[#allocation6 + $0x448] ss:$16 sps:$4 sm:$0xff]   ;;  %v3446_v21 = vcombine.low %v1857_v23, %v1857_v23 }
 0xa33   :  { %2638 = vmatpush1.bf16.msra.mxu1 %v3853_v44  ;;  %2761 = vmatpush1.bf16.msra.mxu0 %v3856_v45  ;;  %v3447_v44 = vcombine.high %v1857_v23, %v1857_v23  ;;  %v2579_v45 = vsel %vm1332_vm3, %v3446_v21, 0 }
 0xa34   :  { %2639 = vmatprep.subr.bf16.mxu1 %v3861_v52  ;;  %2762 = vmatprep.subr.bf16.mxu0 %v3864_v43 }
 0xa37   :  { %2640 = vmatpush1.bf16.msra.mxu1 %v3859_v2  ;;  %2763 = vmatpush1.bf16.msra.mxu0 %v3862_v28 }
 0xa38   :  { %2641 = vmatprep.subr.bf16.mxu1 %v3867_v15  ;;  %2764 = vmatprep.subr.bf16.mxu0 %v3870_v35 }
 0xa3b   :  { %2642 = vmatpush1.bf16.msra.mxu1 %v3865_v58  ;;  %2765 = vmatpush1.bf16.msra.mxu0 %v3868_v42 }
 0xa3c   :  { %2643 = vmatprep.subr.bf16.mxu1 %v3873_v40  ;;  %2766 = vmatprep.subr.bf16.mxu0 %v3876_v22 }
 0xa3f   :  { %2644 = vmatpush1.bf16.msra.mxu1 %v3871_v48  ;;  %2767 = vmatpush1.bf16.msra.mxu0 %v3874_v0 }
 0xa40   :  { %2645 = vmatprep.subr.bf16.mxu1 %v3879_v50  ;;  %2768 = vmatprep.subr.bf16.mxu0 %v3882_v55 }
 0xa43   :  { %2646 = vmatpush1.bf16.msra.mxu1 %v3877_v8  ;;  %2769 = vmatpush1.bf16.msra.mxu0 %v3880_v60 }
 0xa44   :  { %2647 = vmatprep.subr.bf16.mxu1 %v3885_v30  ;;  %2770 = vmatprep.subr.bf16.mxu0 %v3888_v19 }
 0xa47   :  { %2648 = vmatpush1.bf16.msra.mxu1 %v3883_v54  ;;  %2771 = vmatpush1.bf16.msra.mxu0 %v3886_v41 }
 0xa48   :  { %2649 = vmatprep.subr.bf16.mxu1 %v3891_v5  ;;  %2772 = vmatprep.subr.bf16.mxu0 %v3894_v61 }
 0xa4b   :  { %2650 = vmatpush1.bf16.msra.mxu1 %v3889_v57  ;;  %2773 = vmatpush1.bf16.msra.mxu0 %v3892_v24 }
 0xa4c   :  { %2651 = vmatprep.subr.bf16.mxu1 %v3897_v49  ;;  %2774 = vmatprep.subr.bf16.mxu0 %v3900_v3 }
 0xa4f   :  { %2652 = vmatpush1.bf16.msra.mxu1 %v3895_v12  ;;  %2775 = vmatpush1.bf16.msra.mxu0 %v3898_v56 }
 0xa50   :  { %2653 = vmatprep.subr.bf16.mxu1 %v3903_v4  ;;  %2776 = vmatprep.subr.bf16.mxu0 %v3906_v51 }
 0xa53   :  { %2654 = vmatpush1.bf16.msra.mxu1 %v3901_v25  ;;  %2777 = vmatpush1.bf16.msra.mxu0 %v3904_v38 }
 0xa54   :  { %2655 = vmatprep.subr.bf16.mxu1 %v3909_v26  ;;  %2778 = vmatprep.subr.bf16.mxu0 %v3912_v14 }
 0xa57   :  { %2656 = vmatpush1.bf16.msra.mxu1 %v3907_v9  ;;  %2779 = vmatpush1.bf16.msra.mxu0 %v3910_v34 }
 0xa58   :  { %2666 = vmatprep.subr.bf16.mxu1 %v3915_v11 }
 0xa5a   :  { %2658 = vmatmul.mubr.bf16.vlgmr.msra.gmra.mrb[12].mxu1 %v1713_v59  ;;  %2781 = vmatmul.mubr.bf16.vlgmr.msra.gmra.mrb[24].mxu0 %v1713_v59 }
 0xa5b   :  { %2667 = vmatpush1.bf16.msra.mxu1 %v3913_v27  ;;  %2698 = vmatprep.mubr.bf16.mxu1 %v4035_v62 }
 0xa5c   :  { %2668 = vmatprep.subr.bf16.mxu1 %v3918_v20  ;;  %3184 = vmatprep.mubr.bf16.mxu0 %v4035_v62 }
 0xa5f   :  { %2669 = vmatpush1.bf16.msra.mxu1 %v3916_v7 }
 0xa60   :  { %2670 = vmatprep.subr.bf16.mxu1 %v3921_v6 }
 0xa63   :  { %2671 = vmatpush1.bf16.msra.mxu1 %v3919_v32 }
 0xa64   :  { %3448 = vmatprep.subr.msk.bf16.mxu1 %vm1332_vm3, %v3445_v1 }
 0xa67   :  { %2673 = vmatpush1.bf16.msra.mxu1 %v2573_v18 }
 0xa68   :  { %2789 = vmatprep.subr.bf16.mxu1 %v3926_v37 }
 0xa6a   :  { %3449 = vmatmul.mubr.msk.bf16.vlgmr.msra.gmra.mrb[12].mxu1 %vm2568_vm2, %v1715_v47 }
 0xa6b   :  { %2790 = vmatpush1.bf16.msra.mxu1 %v3924_v29  ;;  %2821 = vmatprep.mubr.bf16.mxu1 %v4035_v62 }
 0xa6c   :  { %2791 = vmatprep.subr.bf16.mxu1 %v3929_v46 }
 0xa6f   :  { %2792 = vmatpush1.bf16.msra.mxu1 %v3927_v33 }
 0xa70   :  { %2793 = vmatprep.subr.bf16.mxu1 %v3932_v53 }
 0xa73   :  { %2794 = vmatpush1.bf16.msra.mxu1 %v3930_v13 }
 0xa74   :  { %3450 = vmatprep.subr.msk.bf16.mxu1 %vm1332_vm3, %v3447_v44  ;;  %vm2874_vm3 = vcmask 138240  }
 0xa77   :  { %2796 = vmatpush1.bf16.msra.mxu1 %v2579_v45 }
 0xa7a   :  { %3451 = vmatmul.mubr.msk.bf16.vlgmr.msra.gmra.mrb[16].mxu1 %vm2568_vm2, %v1715_v47 }
 0xa7b   :  { %3141 = vmatprep.mubr.bf16.mxu1 %v4035_v62 }
 0xb2d   :  { %v2782_v52 = vpop.f32.mrb[24].mxu0 }
 0xb2e   :  { %v2784_v43 = vpop.f32.mrb[25].mxu0 }
 0xb2f   :  { %v2786_v2 = vpop.f32.mrb[26].mxu0 }
 0xb30   :  { %v2787_v28 = vpop.f32.mrb[27].mxu0 }
 0xb3d   :  { %v4884_v15 = vpop.f32.mrb[12].mxu1 }
 0xb3e   :  { %v4886_v35 = vpop.f32.mrb[13].mxu1 }
 0xb3f   :  { %v2704_v58 = vpop.f32.mrb[14].mxu1  ;;  %v3575_v42 = vpack.i.bf16 %v4886_v35, %v4884_v15 }
 0xb40   :  { %v2705_v40 = vpop.f32.mrb[15].mxu1 }
 0xb41   :  { %3576 = vrot.lane.b32.xlu1 %v3575_v42, %s4042_s5 }
 0xb45   :  { %3581 = vrot.lane.b32.xlu1 %v3575_v42, %s4034_s28 }
 0xb49   :  { %3586 = vrot.lane.b32.xlu1 %v3575_v42, %s4051_s4 }
 0xb4d   :  { %3591 = vrot.lane.b32.xlu1 %v3575_v42, %s4052_s17  ;;  %v2823_v62 = vpop.f32.mrb[16].mxu1 }
 0xb4e   :  { %v4892_v22 = vadd.f32 %v2823_v62, %v2782_v52  ;;  %v2825_v48 = vpop.f32.mrb[17].mxu1 }
 0xb4f   :  { %v4894_v0 = vadd.f32 %v2825_v48, %v2784_v43  ;;  %v2827_v50 = vpop.f32.mrb[18].mxu1 }
 0xb50   :  { %v2828_v55 = vpop.f32.mrb[19].mxu1  ;;  %v3595_v8 = vpack.i.bf16 %v4892_v22, %v4886_v35 }
 0xb51   :  { %v3610_v60 = vpack.i.bf16 %v4894_v0, %v4892_v22  ;;  %v3625_v30 = vpack.i.bf16 %v4884_v15, %v4894_v0 }
 0xb52   :  { %3596 = vrot.lane.b32.xlu1 %v3595_v8, %s4036_s3 }
 0xb53   :  { %3611 = vrot.lane.b32.xlu0 %v3610_v60, %s4042_s5 }
 0xb56   :  { %3601 = vrot.lane.b32.xlu1 %v3595_v8, %s4053_s18 }
 0xb57   :  { %3616 = vrot.lane.b32.xlu0 %v3610_v60, %s4034_s28 }
 0xb5a   :  { %3606 = vrot.lane.b32.xlu1 %v3595_v8, %s4054_s12 }
 0xb5b   :  { %3621 = vrot.lane.b32.xlu0 %v3610_v60, %s4051_s4 }
 0xb5e   :  { %3646 = vrot.lane.b32.xlu1 %v3595_v8, %s4055_s27 }
 0xb5f   :  { %3626 = vrot.lane.b32.xlu0 %v3625_v30, %s4036_s3 }
 0xb63   :  { %3631 = vrot.lane.b32.xlu0 %v3610_v60, %s4052_s17 }
 0xb67   :  { %3636 = vrot.lane.b32.xlu0 %v3625_v30, %s4053_s18 }
 0xb6b   :  { %3641 = vrot.lane.b32.xlu0 %v3625_v30, %s4054_s12 }
 0xb6f   :  { %3651 = vrot.lane.b32.xlu0 %v3625_v30, %s4055_s27 }
 0xbb3   :  { %v3577_v19 = vpop.permute.xlu1 %3576 }
 0xbb4   :  { %v3578_v54 = vunpack.i.l.bf16 %v3577_v19  ;;  %v3579_v61 = vunpack.i.h.bf16 %v3577_v19 }
 0xbb6   :  { %v2962_v41 = vpack.c.bf16 %v3578_v54, %v4884_v15  ;;  %v2843_v12 = vsel %vm1390_vm7, %v3578_v54, %v3579_v61 }
 0xbb7   :  { %v3582_v5 = vpop.permute.xlu1 %3581  ;;  %v2963_v51 = vpack.c.bf16 %v2843_v12, %v4886_v35 }
 0xbb8   :  { %3018 = vrot.lane.b32.xlu1 %v2962_v41, %s4055_s27  ;;  %v4910_v24 = vunpack.i.l.bf16 %v3582_v5  ;;  %v3584_v4 = vunpack.i.h.bf16 %v3582_v5 }
 0xbba   :  { %v2859_v38 = vsel %vm2858_vm4, %v4910_v24, %v3584_v4 }
 0xbbb   :  { %v3587_v57 = vpop.permute.xlu1 %3586 }
 0xbbc   :  { %v3588_v49 = vunpack.i.l.bf16 %v3587_v57  ;;  %v3589_v56 = vunpack.i.h.bf16 %v3587_v57 }
 0xbbe   :  { %v2966_v3 = vpack.c.bf16 %v3588_v49, %v4910_v24  ;;  %v2875_v25 = vsel %vm2874_vm3, %v3588_v49, %v3589_v56 }
 0xbbf   :  { %v2967_v14 = vpack.c.bf16 %v2875_v25, %v2859_v38  ;;  %v3592_v34 = vpop.permute.xlu1 %3591 }
 0xbc0   :  { %3026 = vrot.lane.b32.xlu1 %v2966_v3, %s4055_s27  ;;  %v3594_v17 = vunpack.i.h.bf16 %v3592_v34  ;;  %v3593_v31 = vunpack.i.l.bf16 %v3592_v34 }
 0xbc2   :  { %v2907_v53 = vsel %vm2906_vm5, %v3593_v31, %v3594_v17 }
 0xbc3   :  { %v2975_v45 = vpack.c.bf16 %v2859_v38, %v2907_v53 }
 0xbc4   :  { %3020 = vrot.lane.b32.xlu1 %v2963_v51, %s4055_s27  ;;  %v3597_v20 = vpop.permute.xlu1 %3596 }
 0xbc5   :  { %v3612_v26 = vpop.permute.xlu0 %3611  ;;  %v3598_v36 = vunpack.i.l.bf16 %v3597_v20  ;;  %v3599_v23 = vunpack.i.h.bf16 %v3597_v20 }
 0xbc6   :  { %v3613_v16 = vunpack.i.l.bf16 %v3612_v26  ;;  %v3614_v13 = vunpack.i.h.bf16 %v3612_v26 }
 0xbc7   :  { %v2892_v2 = vsel %vm1408_vm10, %v3598_v36, %v3599_v23 }
 0xbc8   :  { %v2844_v9 = vsel %vm1390_vm7, %v3579_v61, %v3613_v16  ;;  %3028 = vrot.lane.b32.xlu1 %v2967_v14, %s4055_s27  ;;  %v4929_v47 = vpop.permute.xlu1 %3601  ;;  %v2845_v28 = vsel %vm1390_vm7, %v3613_v16, %v3614_v13  ;;  %v2971_v40 = vpack.c.bf16 %v4886_v35, %v2892_v2  ;;  %v2974_v35 = vpack.c.bf16 %v4910_v24, %v3593_v31 }
 0xbc9   :  { %v2964_v39 = vpack.c.bf16 %v2844_v9, %v4892_v22  ;;  %v3617_v11 = vpop.permute.xlu0 %3616  ;;  %v2965_v62 = vpack.c.bf16 %v2845_v28, %v4894_v0  ;;  %v3604_v60 = vunpack.i.h.bf16 %v4929_v47  ;;  %v3603_v30 = vunpack.i.l.bf16 %v4929_v47 }
 0xbca   :  { %v3618_v63 = vunpack.i.l.bf16 %v3617_v11  ;;  %v3619_v42 = vunpack.i.h.bf16 %v3617_v11  ;;  %vm2922_vm7 = vcmask 916480  }
 0xbcb   :  { %3022 = vrot.lane.b32.xlu0 %v2964_v39, %s4055_s27  ;;  %v2924_v49 = vsel %vm2922_vm7, %v3603_v30, %v3604_v60 }
 0xbcc   :  { %v2860_v7 = vsel %vm2858_vm4, %v3584_v4, %v3618_v63  ;;  %v3607_v58 = vpop.permute.xlu1 %3606  ;;  %v2861_v19 = vsel %vm2858_vm4, %v3618_v63, %v3619_v42 }
 0xbcd   :  { %v3622_v27 = vpop.permute.xlu0 %3621  ;;  %v3609_v48 = vunpack.i.h.bf16 %v3607_v58  ;;  %v3608_v50 = vunpack.i.l.bf16 %v3607_v58 }
 0xbce   :  { %v3623_v59 = vunpack.i.l.bf16 %v3622_v27 }
 0xbcf   :  { %v2940_v54 = vsel %vm2938_vm6, %v3608_v50, %v3609_v48 }
 0xbd0   :  { %v2876_v6 = vsel %vm2874_vm3, %v3589_v56, %v3623_v59  ;;  %v3647_v41 = vpop.permute.xlu1 %3646  ;;  %v2979_v12 = vpack.c.bf16 %v2940_v54, %v2924_v49 }
 0xbd1   :  { %v2968_v32 = vpack.c.bf16 %v2876_v6, %v2860_v7  ;;  %v3627_v1 = vpop.permute.xlu0 %3626  ;;  %v3649_v56 = vunpack.i.h.bf16 %v3647_v41  ;;  %v3648_v4 = vunpack.i.l.bf16 %v3647_v41 }
 0xbd2   :  { %v3629_v18 = vunpack.i.h.bf16 %v3627_v1  ;;  %v3628_v37 = vunpack.i.l.bf16 %v3627_v1 }
 0xbd3   :  { %3030 = vrot.lane.b32.xlu0 %v2968_v32, %s4055_s27  ;;  %v2956_v39 = vsel %vm2954_vm8, %v3648_v4, %v3649_v56 }
 0xbd4   :  { %v2891_v10 = vsel %vm1408_vm10, %v3629_v18, %v3598_v36  ;;  %v2973_v29 = vpack.c.bf16 %v4894_v0, %v3628_v37  ;;  %v2893_v5 = vsel %vm1408_vm10, %v3599_v23, %v3628_v37  ;;  %vm3211_vm10 = vcmask 764928  }
 0xbd5   :  { %v2970_v46 = vpack.c.bf16 %v4884_v15, %v2891_v10  ;;  %v3632_v33 = vpop.permute.xlu0 %3631  ;;  %v3624_v15 = vunpack.i.h.bf16 %v3622_v27  ;;  %v2972_v24 = vpack.c.bf16 %v4892_v22, %v2893_v5  ;;  %v2983_v27 = vpack.c.bf16 %v2924_v49, %v2956_v39 }
 0xbd6   :  { %v3633_v44 = vunpack.i.l.bf16 %v3632_v33  ;;  %v3634_v61 = vunpack.i.h.bf16 %v3632_v33 }
 0xbd7   :  { %3040 = vrot.lane.b32.xlu0 %v2973_v29, %s4055_s27  ;;  %3034 = vrot.lane.b32.xlu1 %v2970_v46, %s4055_s27  ;;  %v2877_v55 = vsel %vm2874_vm3, %v3623_v59, %v3624_v15 }
 0xbd8   :  { %v2908_v21 = vsel %vm2906_vm5, %v3594_v17, %v3633_v44  ;;  %v2969_v0 = vpack.c.bf16 %v2877_v55, %v2861_v19  ;;  %v2909_v51 = vsel %vm2906_vm5, %v3633_v44, %v3634_v61 }
 0xbd9   :  { %v2976_v52 = vpack.c.bf16 %v2860_v7, %v2908_v21  ;;  %v3637_v43 = vpop.permute.xlu0 %3636  ;;  %v2977_v9 = vpack.c.bf16 %v2861_v19, %v2909_v51 }
 0xbda   :  { %v3639_v3 = vunpack.i.h.bf16 %v3637_v43  ;;  %v3638_v14 = vunpack.i.l.bf16 %v3637_v43 }
 0xbdb   :  { %3046 = vrot.lane.b32.xlu0 %v2976_v52, %s4055_s27  ;;  %3044 = vrot.lane.b32.xlu1 %v2975_v45, %s4055_s27 }
 0xbdc   :  { %v2923_v16 = vsel %vm2922_vm7, %v3639_v3, %v3603_v30  ;;  %v2925_v63 = vsel %vm2922_vm7, %v3604_v60, %v3638_v14 }
 0xbdd   :  { %v3642_v8 = vpop.permute.xlu0 %3641 }
 0xbde   :  { %v3644_v57 = vunpack.i.h.bf16 %v3642_v8  ;;  %v3643_v25 = vunpack.i.l.bf16 %v3642_v8 }
 0xbdf   :  { %3024 = vrot.lane.b32.xlu0 %v2965_v62, %s4055_s27  ;;  %3036 = vrot.lane.b32.xlu1 %v2971_v40, %s4055_s27 }
 0xbe0   :  { %v2939_v38 = vsel %vm2938_vm6, %v3644_v57, %v3608_v50  ;;  %v2941_v22 = vsel %vm2938_vm6, %v3609_v48, %v3643_v25  ;;  %v2981_v6 = vpack.c.bf16 %v3643_v25, %v3638_v14 }
 0xbe1   :  { %v3652_v26 = vpop.permute.xlu0 %3651  ;;  %v2978_v34 = vpack.c.bf16 %v2939_v38, %v2923_v16  ;;  %v2980_v59 = vpack.c.bf16 %v2941_v22, %v2925_v63 }
 0xbe2   :  { %v3654_v11 = vunpack.i.h.bf16 %v3652_v26  ;;  %v3653_v20 = vunpack.i.l.bf16 %v3652_v26 }
 0xbe3   :  { %3032 = vrot.lane.b32.xlu0 %v2969_v0, %s4055_s27  ;;  %3042 = vrot.lane.b32.xlu1 %v2974_v35, %s4055_s27 }
 0xbe4   :  { %v2955_v7 = vsel %vm2954_vm8, %v3654_v11, %v3648_v4  ;;  %v2957_v32 = vsel %vm2954_vm8, %v3649_v56, %v3653_v20  ;;  %v2985_v31 = vpack.c.bf16 %v3638_v14, %v3653_v20  ;;  %v3935_v4 = vld [vmem:[%s5033_s15] sm:$0x3f]  }
 0xbe5   :  { %v2982_v17 = vpack.c.bf16 %v2923_v16, %v2955_v7  ;;  %v2984_v1 = vpack.c.bf16 %v2925_v63, %v2957_v32 }
 0xbe7   :  { %3038 = vrot.lane.b32.xlu0 %v2972_v24, %s4055_s27  ;;  %3052 = vrot.lane.b32.xlu1 %v2979_v12, %s4055_s27 }
 0xbeb   :  { %3048 = vrot.lane.b32.xlu0 %v2977_v9, %s4055_s27  ;;  %3050 = vrot.lane.b32.xlu1 %v2978_v34, %s4055_s27 }
 0xbef   :  { %3054 = vrot.lane.b32.xlu0 %v2980_v59, %s4055_s27  ;;  %3060 = vrot.lane.b32.xlu1 %v2983_v27, %s4055_s27 }
 0xbf3   :  { %3056 = vrot.lane.b32.xlu0 %v2981_v6, %s4055_s27  ;;  %3058 = vrot.lane.b32.xlu1 %v2982_v17, %s4055_s27 }
 0xbf7   :  { %3062 = vrot.lane.b32.xlu0 %v2984_v1, %s4055_s27 }
 0xbfb   :  { %3064 = vrot.lane.b32.xlu0 %v2985_v31, %s4055_s27 }
 0xc2a   :  { %v3019_v36 = vpop.permute.xlu1 %3018 }
 0xc32   :  { %v3027_v18 = vpop.permute.xlu1 %3026 }
 0xc36   :  { %v3021_v37 = vpop.permute.xlu1 %3020 }
 0xc37   :  { %v3067_v47 = vsel %vm2954_vm8, %v3019_v36, %v3021_v37 }
 0xc3a   :  { %v3029_v46 = vpop.permute.xlu1 %3028 }
 0xc3b   :  { %v3070_v23 = vsel %vm2954_vm8, %v3027_v18, %v3029_v46 }
 0xc3d   :  { %v3023_v10 = vpop.permute.xlu0 %3022 }
 0xc3e   :  { %v3068_v29 = vsel %vm2954_vm8, %v3021_v37, %v3023_v10 }
 0xc3f   :  { %3109 = vmatprep.subr.bf16.mxu1 %v3068_v29 }
 0xc40   :  { %3110 = vmatpush1.bf16.msra.mxu1 %v3067_v47 }
 0xc45   :  { %v3031_v33 = vpop.permute.xlu0 %3030 }
 0xc46   :  { %v3071_v53 = vsel %vm2954_vm8, %v3029_v46, %v3031_v33 }
 0xc47   :  { %3111 = vmatprep.subr.bf16.mxu1 %v3071_v53 }
 0xc48   :  { %3112 = vmatpush1.bf16.msra.mxu1 %v3070_v23 }
 0xc49   :  { %v3041_v13 = vpop.permute.xlu0 %3040  ;;  %v3035_v44 = vpop.permute.xlu1 %3034 }
 0xc4d   :  { %v3047_v21 = vpop.permute.xlu0 %3046  ;;  %v3045_v45 = vpop.permute.xlu1 %3044 }
 0xc4e   :  { %v3077_v55 = vsel %vm2954_vm8, %v3045_v45, %v3047_v21 }
 0xc51   :  { %v3025_v52 = vpop.permute.xlu0 %3024  ;;  %v3037_v43 = vpop.permute.xlu1 %3036 }
 0xc52   :  { %3152 = vmatprep.subr.bf16.mxu0 %v3025_v52  ;;  %v3069_v2 = vsel %vm2954_vm8, %v3023_v10, %v3025_v52  ;;  %v3073_v50 = vsel %vm2954_vm8, %v3035_v44, %v3037_v43 }
 0xc53   :  { %3153 = vmatpush1.bf16.msra.mxu0 %v3069_v2 }
 0xc55   :  { %v3033_v28 = vpop.permute.xlu0 %3032  ;;  %v3043_v15 = vpop.permute.xlu1 %3042 }
 0xc56   :  { %v3072_v58 = vsel %vm2954_vm8, %v3031_v33, %v3033_v28  ;;  %3154 = vmatprep.subr.bf16.mxu0 %v3033_v28  ;;  %v3076_v19 = vsel %vm2954_vm8, %v3043_v15, %v3045_v45 }
 0xc57   :  { %3155 = vmatpush1.bf16.msra.mxu0 %v3072_v58 }
 0xc58   :  { %3156 = vmatprep.subr.bf16.mxu0 %v3041_v13 }
 0xc59   :  { %v3039_v42 = vpop.permute.xlu0 %3038  ;;  %v3053_v40 = vpop.permute.xlu1 %3052 }
 0xc5a   :  { %v3075_v62 = vsel %vm2954_vm8, %v3039_v42, %v3041_v13  ;;  %v3074_v48 = vsel %vm2954_vm8, %v3037_v43, %v3039_v42 }
 0xc5b   :  { %3113 = vmatprep.subr.bf16.mxu1 %v3074_v48  ;;  %3157 = vmatpush1.bf16.msra.mxu0 %v3075_v62 }
 0xc5c   :  { %3114 = vmatpush1.bf16.msra.mxu1 %v3073_v50 }
 0xc5d   :  { %v3049_v8 = vpop.permute.xlu0 %3048  ;;  %3115 = vmatprep.subr.bf16.mxu1 %v3077_v55  ;;  %v3051_v60 = vpop.permute.xlu1 %3050 }
 0xc5e   :  { %v3078_v30 = vsel %vm2954_vm8, %v3047_v21, %v3049_v8  ;;  %3158 = vmatprep.subr.bf16.mxu0 %v3049_v8  ;;  %v3079_v41 = vsel %vm2954_vm8, %v3051_v60, %v3053_v40 }
 0xc5f   :  { %3159 = vmatpush1.bf16.msra.mxu0 %v3078_v30 }
 0xc60   :  { %3116 = vmatpush1.bf16.msra.mxu1 %v3076_v19 }
 0xc61   :  { %v3055_v35 = vpop.permute.xlu0 %3054  ;;  %v3061_v0 = vpop.permute.xlu1 %3060 }
 0xc62   :  { %v3080_v54 = vsel %vm2954_vm8, %v3053_v40, %v3055_v35 }
 0xc63   :  { %3117 = vmatprep.subr.bf16.mxu1 %v3080_v54 }
 0xc64   :  { %3118 = vmatpush1.bf16.msra.mxu1 %v3079_v41 }
 0xc65   :  { %v3057_v5 = vpop.permute.xlu0 %3056  ;;  %3119 = vmatprep.subr.bf16.mxu1 %v3068_v29  ;;  %v3059_v57 = vpop.permute.xlu1 %3058 }
 0xc66   :  { %v3081_v61 = vsel %vm2954_vm8, %v3055_v35, %v3057_v5  ;;  %3160 = vmatprep.subr.bf16.mxu0 %v3057_v5  ;;  %v3082_v12 = vsel %vm2954_vm8, %v3059_v57, %v3061_v0 }
 0xc67   :  { %3161 = vmatpush1.bf16.msra.mxu0 %v3081_v61 }
 0xc68   :  { %3120 = vmatpush1.bf16.msra.mxu1 %v3067_v47  ;;  %3162 = vmatprep.subr.bf16.mxu0 %v3025_v52 }
 0xc69   :  { %v3063_v49 = vpop.permute.xlu0 %3062 }
 0xc6a   :  { %v3083_v3 = vsel %vm2954_vm8, %v3061_v0, %v3063_v49 }
 0xc6b   :  { %3121 = vmatprep.subr.bf16.mxu1 %v3083_v3  ;;  %3163 = vmatpush1.bf16.msra.mxu0 %v3069_v2 }
 0xc6c   :  { %3122 = vmatpush1.bf16.msra.mxu1 %v3082_v12 }
 0xc6d   :  { %v3065_v56 = vpop.permute.xlu0 %3064  ;;  %3123 = vmatprep.subr.bf16.mxu1 %v3074_v48 }
 0xc6e   :  { %v3084_v24 = vsel %vm2954_vm8, %v3063_v49, %v3065_v56  ;;  %3164 = vmatprep.subr.bf16.mxu0 %v3065_v56 }
 0xc6f   :  { %3165 = vmatpush1.bf16.msra.mxu0 %v3084_v24 }
 0xc70   :  { %3124 = vmatpush1.bf16.msra.mxu1 %v3073_v50  ;;  %3166 = vmatprep.subr.bf16.mxu0 %v3041_v13 }
 0xc73   :  { %3142 = vmatmul.mubr.bf16.vlgmr.msra.gmra.mrb[20].mxu1 %v3935_v4  ;;  %3167 = vmatpush1.bf16.msra.mxu0 %v3075_v62 }
 0xc76   :  { %3185 = vmatmul.mubr.bf16.vlgmr.msra.gmra.mrb[28].mxu0 %v3935_v4 }
 0xd46   :  { %v3143_v51 = vpop.f32.mrb[20].mxu1 }
 0xd47   :  { %3950 = vtanh.f32 %v3143_v51  ;;  %v3145_v25 = vpop.f32.mrb[21].mxu1 }
 0xd48   :  { %3952 = vtanh.f32 %v3145_v25  ;;  %v3147_v38 = vpop.f32.mrb[22].mxu1 }
 0xd49   :  { %3954 = vtanh.f32 %v3147_v38  ;;  %v3149_v26 = vpop.f32.mrb[23].mxu1  ;;  %v3186_v14 = vpop.f32.mrb[28].mxu0 }
 0xd4a   :  { %3956 = vtanh.f32 %v3149_v26  ;;  %v3188_v16 = vpop.f32.mrb[29].mxu0 }
 0xd4b   :  { %3958 = vtanh.f32 %v3186_v14  ;;  %v3190_v9 = vpop.f32.mrb[30].mxu0 }
 0xd4c   :  { %3960 = vtanh.f32 %v3188_v16  ;;  %v3192_v34 = vpop.f32.mrb[31].mxu0 }
 0xd4d   :  { %3962 = vtanh.f32 %v3190_v9 }
 0xd4e   :  { %3964 = vtanh.f32 %v3192_v34 }
 0xd51   :  { %v3951_v39 = vpop.eup %3950 }
 0xd52   :  { %v3953_v22 = vpop.eup %3952  ;;  %3203 = vst [vmem:[%s5034_s16] sm:$0xff] %v3951_v39 }
 0xd53   :  { %v3955_v11 = vpop.eup %3954  ;;  %3204 = vst [vmem:[%s5034_s16 + $0x8] sm:$0xff] %v3953_v22 }
 0xd54   :  { %v3957_v63 = vpop.eup %3956  ;;  %3208 = vst [vmem:[%s5034_s16 + $0x20] sm:$0xf] %v3955_v11 }
 0xd55   :  { %v3959_v27 = vpop.eup %3958  ;;  %3209 = vst [vmem:[%s5034_s16 + $0x28] sm:$0xf] %v3957_v63 }
 0xd56   :  { %v3961_v59 = vpop.eup %3960  ;;  %3205 = vst [vmem:[%s5034_s16 + $0x10] sm:$0xff] %v3959_v27 }
 0xd57   :  { %v3963_v20 = vpop.eup %3962  ;;  %3207 = vst.msk [vmem:[%s5034_s16 + $0x18] sm:$0xff] %vm3206_vm9, %v3961_v59 }
 0xd58   :  { %v3965_v7 = vpop.eup %3964  ;;  %3210 = vst [vmem:[%s5034_s16 + $0x30] sm:$0xf] %v3963_v20 }
 0xd59   :  { %3212 = vst.msk [vmem:[%s5034_s16 + $0x38] sm:$0xf] %vm3211_vm10, %v3965_v7 }
 0xd5a   :  { %3217 = vsyncpa [#allocation3], 1 }
 0xd5b   :  { %3218 = vsyncpa [#allocation7], 1 }
 0xd5c   :  { %3219 = vsyncpa [#allocation4], 1 }

</bundles_post_ra>
